<compile_context>
chip_gen: v7x
topology: tpu7x:2x2x1
jax: 0.10.0
libtpu: 0.0.40
codegen_flags: <defaults>
</compile_context>

<pallas_src>
import numpy as np

import jax
import jax.numpy as jnp
from jax.experimental import pallas as pl
from jax.experimental.pallas import tpu as pltpu

EPS = 1e-5
LANE = 128
GUARD = 8            # guard rows above/below the y1 slab (values never used)


def _round_up(x, m):
    return (x + m - 1) // m * m


def _bn_fold(gamma, beta, mean, var, eps=EPS):
    scale = gamma / jnp.sqrt(var + eps)
    shift = beta - mean * scale
    return scale, shift


def _pick_tile_h(H, W, target_rows):
    """Smallest divisor of H whose tile has >= target_rows activation rows."""
    for th in range(1, H + 1):
        if H % th == 0 and th * W >= target_rows:
            return th
    return H


def _vmem_capacity_bytes():
    try:
        return int(pltpu.get_tpu_info().vmem_capacity_bytes)
    except Exception:
        return 64 * 1024 * 1024   # conservative (v7x-sized) fallback


def _make_bottleneck_kernel(W, R, P_p, compute_dtype):
    """R = tile_h * W activation rows per grid step; P_p = padded planes."""
    f32 = jnp.float32
    cdt = compute_dtype
    S = R + 2 * W          # halo'd y1 rows: tile rows + 1 image row above/below
    B = GUARD              # slab row offset (guard rows are always masked off)
    K2 = 3 * P_p           # conv2 contraction depth per ky tap

    def kernel(x_ref, halo_ref, w1_ref, b1_ref, w2_ref, b2_ref, w3_ref, b3_ref,
               o_ref, slab_ref):
        t = pl.program_id(1)
        nt = pl.num_programs(1)

        # ---- conv1 (1x1, BN scale folded into w1) + relu --------------------
        y1 = jnp.maximum(
            jnp.dot(x_ref[...], w1_ref[...], preferred_element_type=f32)
            + b1_ref[...], 0.0)                                   # (R, P_p)
        yh = jnp.maximum(
            jnp.dot(halo_ref[...], w1_ref[...], preferred_element_type=f32)
            + b1_ref[...], 0.0)                                   # (2W, P_p)

        # Halo image rows outside the picture must act like conv2's zero
        # padding on y1 (relu(b1_shift) != 0), so zero them at image borders.
        top = jnp.where(t > 0, yh[0:W, :], 0.0)
        bot = jnp.where(t < nt - 1, yh[W:2 * W, :], 0.0)

        # ---- build the 3-tap channel-concat slab ONCE (compute dtype) -------
        # Slab rows [B, B+S) hold the halo'd y1; column blocks are
        #   [0    : P_p ]  y1[h, w-1]   (kx = 0 tap)
        #   [P_p  : 2P_p]  y1[h, w]     (kx = 1 tap)
        #   [2P_p : 3P_p]  y1[h, w+1]   (kx = 2 tap)
        slab_ref[B:B + W, P_p:2 * P_p] = top.astype(cdt)
        slab_ref[B + W:B + W + R, P_p:2 * P_p] = y1.astype(cdt)
        slab_ref[B + W + R:B + S, P_p:2 * P_p] = bot.astype(cdt)

        # A column shift is a +/-1 row shift of the flattened slab plus a
        # border mask at w == 0 / w == W-1 (generated in-kernel from an iota).
        # The single guard row each shifted read touches is always masked off.
        w_pos = jax.lax.broadcasted_iota(jnp.int32, (S, 1), 0) % W
        zero = jnp.zeros((), cdt)
        base_m1 = slab_ref[B - 1:B - 1 + S, P_p:2 * P_p]          # y1[h, w-1]
        base_p1 = slab_ref[B + 1:B + 1 + S, P_p:2 * P_p]          # y1[h, w+1]
        slab_ref[B:B + S, 0:P_p] = jnp.where(w_pos != 0, base_m1, zero)
        slab_ref[B:B + S, 2 * P_p:3 * P_p] = jnp.where(w_pos != W - 1,
                                                       base_p1, zero)

        # ---- conv2 (3x3, BN folded) + relu: 3 MXU dots with K = 3*P_p -------
        acc = jnp.dot(slab_ref[B:B + R, :], w2_ref[0:K2, :],
                      preferred_element_type=f32)                 # ky = 0
        acc = acc + jnp.dot(slab_ref[B + W:B + W + R, :],
                            w2_ref[K2:2 * K2, :],
                            preferred_element_type=f32)           # ky = 1
        acc = acc + jnp.dot(slab_ref[B + 2 * W:B + 2 * W + R, :],
                            w2_ref[2 * K2:3 * K2, :],
                            preferred_element_type=f32)           # ky = 2
        y2 = jnp.maximum(acc + b2_ref[...], 0.0).astype(cdt)      # (R, P_p)

        # ---- conv3 (1x1, BN folded) + residual + relu ------------------------
        # Residual re-reads the VMEM-resident input block at the point of use.
        y3 = (jnp.dot(y2, w3_ref[...], preferred_element_type=f32)
              + b3_ref[...] + x_ref[...].astype(f32))
        o_ref[...] = jnp.maximum(y3, 0.0).astype(o_ref.dtype)

    return kernel


def bottleneck_forward(x_nchw, params, *, tile_h=None,
                       compute_dtype=jnp.bfloat16):
    """Fused Pallas forward for Bottleneck (stride=1, downsample=None, eval BN)."""
    N, Cin, H, W = x_nchw.shape
    P = params["w1_t"].shape[0]          # planes
    Cout = 4 * P                         # planes * expansion
    assert Cin == Cout, "downsample=None requires inplanes == planes * 4"

    vmem_cap = _vmem_capacity_bytes()
    vmem_limit = int(min(vmem_cap * 3 // 4, 96 * 1024 * 1024))

    if tile_h is None:
        target_rows = 1024 if vmem_cap > 64 * 1024 * 1024 else 512
        tile_h = _pick_tile_h(H, W, target_rows)
    assert H % tile_h == 0, "tile_h must divide H"
    nt = H // tile_h
    R = tile_h * W                       # activation rows per grid step
    slab_rows = (tile_h + 2) * W + 2 * GUARD

    Cin_p = _round_up(Cin, LANE)
    P_p = _round_up(P, LANE)
    Cout_p = _round_up(Cout, LANE)       # == Cin_p

    f32 = jnp.float32
    cdt = compute_dtype

    # ---- activations: NCHW -> NHWC (lane-dense channels), pad channels -----
    x_nhwc = jnp.transpose(x_nchw, (0, 2, 3, 1)).astype(cdt)
    x_nhwc = jnp.pad(x_nhwc, ((0, 0), (0, 0), (0, 0), (0, Cin_p - Cin)))
    x_tiles = x_nhwc.reshape(N * nt, R, Cin_p)

    # One x image row above / below each tile (zeros at the image border).
    # The kernel recomputes y1 for these 2 rows, so conv2 needs no overlapping
    # block reads and no HBM-materialised im2col.
    xp = jnp.pad(x_nhwc, ((0, 0), (1, 1), (0, 0), (0, 0)))
    top = xp[:, 0:H:tile_h]                           # (N, nt, W, Cin_p)
    bot = xp[:, tile_h + 1:H + 2:tile_h]              # (N, nt, W, Cin_p)
    halo = jnp.stack([top, bot], axis=2).reshape(N * nt, 2 * W, Cin_p)

    # ---- weights: fold BN scale, pad channels, cast to compute dtype --------
    s1, b1 = _bn_fold(params["g1"], params["b1"], params["m1"], params["v1"])
    s2, b2 = _bn_fold(params["g2"], params["b2"], params["m2"], params["v2"])
    s3, b3 = _bn_fold(params["g3"], params["b3"], params["m3"], params["v3"])

    w1 = jnp.transpose(params["w1_t"][:, :, 0, 0], (1, 0)) * s1[None, :]
    w1 = jnp.pad(w1, ((0, Cin_p - Cin), (0, P_p - P))).astype(cdt)
    b1 = jnp.pad(b1, (0, P_p - P)).reshape(1, P_p).astype(f32)

    # torch [cout, cin, kh, kw] -> [kh, kw, cin, cout], scale on cout.
    # reshape(9*P_p, P_p): row index = (ky, kx, cin) -> the (3*P_p, P_p) block
    # for each ky matches the slab's [w-1 | w | w+1] channel-concat layout.
    w2 = jnp.transpose(params["w2_t"], (2, 3, 1, 0)) * s2[None, None, None, :]
    w2 = jnp.pad(w2, ((0, 0), (0, 0), (0, P_p - P), (0, P_p - P)))
    w2 = w2.reshape(9 * P_p, P_p).astype(cdt)
    b2 = jnp.pad(b2, (0, P_p - P)).reshape(1, P_p).astype(f32)

    w3 = jnp.transpose(params["w3_t"][:, :, 0, 0], (1, 0)) * s3[None, :]
    w3 = jnp.pad(w3, ((0, P_p - P), (0, Cout_p - Cout))).astype(cdt)
    b3 = jnp.pad(b3, (0, Cout_p - Cout)).reshape(1, Cout_p).astype(f32)

    kernel = _make_bottleneck_kernel(W, R, P_p, cdt)

    tile_map = lambda n, t: (n * nt + t, 0, 0)
    fixed2 = lambda n, t: (0, 0)

    def call(single_buffer_weights):
        if single_buffer_weights:
            # Constant-index operands never get re-fetched; one buffer is enough
            # (matters for layer4-scale channels on v7x's 64 MiB VMEM).
            const = lambda shape: pl.BlockSpec(shape, fixed2,
                                               pipeline_mode=pl.Buffered(1))
        else:
            const = lambda shape: pl.BlockSpec(shape, fixed2)
        return pl.pallas_call(
            kernel,
            grid=(N, nt),
            in_specs=[
                pl.BlockSpec((None, R, Cin_p), tile_map),      # x tile / residual
                pl.BlockSpec((None, 2 * W, Cin_p), tile_map),  # halo x rows
                const((Cin_p, P_p)),                           # w1 (BN folded)
                const((1, P_p)),                               # bn1 shift
                const((9 * P_p, P_p)),                         # w2 (BN folded)
                const((1, P_p)),                               # bn2 shift
                const((P_p, Cout_p)),                          # w3 (BN folded)
                const((1, Cout_p)),                            # bn3 shift
            ],
            out_specs=pl.BlockSpec((None, R, Cout_p), tile_map),
            out_shape=jax.ShapeDtypeStruct((N * nt, R, Cout_p), cdt),
            scratch_shapes=[pltpu.VMEM((slab_rows, 3 * P_p), cdt)],
            compiler_params=pltpu.CompilerParams(
                dimension_semantics=("parallel", "parallel"),
                vmem_limit_bytes=vmem_limit,
            ),
        )(x_tiles, halo, w1, b1, w2, b2, w3, b3)

    try:
        out_tiles = call(True)
    except Exception:
        # pipeline_mode=pl.Buffered(1) may not be plumbed for top-level
        # pallas_call operands on every jax version; fall back to defaults.
        out_tiles = call(False)

    out = out_tiles.reshape(N, H, W, Cout_p)[..., :Cout].astype(x_nchw.dtype)
    return jnp.transpose(out, (0, 3, 1, 2))                  # back to NCHW


# ------------------------- plain-JAX reference ------------------------------

def bottleneck_reference(x, p):
    def conv(x, w, pad=0):
        return jax.lax.conv_general_dilated(
            x, w, (1, 1), [(pad, pad), (pad, pad)],
            dimension_numbers=("NCHW", "OIHW", "NCHW"))

    def bn(x, g, b, m, v):
        g, b, m, v = (a[None, :, None, None] for a in (g, b, m, v))
        return (x - m) / jnp.sqrt(v + EPS) * g + b

    out = jax.nn.relu(bn(conv(x, p["w1_t"]), p["g1"], p["b1"], p["m1"], p["v1"]))
    out = jax.nn.relu(bn(conv(out, p["w2_t"], pad=1), p["g2"], p["b2"], p["m2"], p["v2"]))
    out = bn(conv(out, p["w3_t"]), p["g3"], p["b3"], p["m3"], p["v3"])
    return jax.nn.relu(out + x)


# --------------------------------- main -------------------------------------

if __name__ == "__main__":
    # Small deterministic shapes: inplanes = planes*4 so the identity residual
    # applies.  tile_h=8 on the f32 run (2 row tiles) exercises the halo path.
    N, H, W = 2, 16, 16
    planes = 4
    inplanes = planes * 4  # 16

    key = jax.random.PRNGKey(0)
    ks = jax.random.split(key, 16)

    params = {
        # conv weights in PyTorch layout [out, in, kh, kw]
        "w1_t": 0.1 * jax.random.normal(ks[0], (planes, inplanes, 1, 1), jnp.float32),
        "w2_t": 0.1 * jax.random.normal(ks[1], (planes, planes, 3, 3), jnp.float32),
        "w3_t": 0.1 * jax.random.normal(ks[2], (planes * 4, planes, 1, 1), jnp.float32),
        # BN params (eval-mode running stats)
        "g1": 1.0 + 0.1 * jax.random.normal(ks[3], (planes,), jnp.float32),
        "b1": 0.1 * jax.random.normal(ks[4], (planes,), jnp.float32),
        "m1": 0.1 * jax.random.normal(ks[5], (planes,), jnp.float32),
        "v1": 0.5 + jax.random.uniform(ks[6], (planes,), jnp.float32),
        "g2": 1.0 + 0.1 * jax.random.normal(ks[7], (planes,), jnp.float32),
        "b2": 0.1 * jax.random.normal(ks[8], (planes,), jnp.float32),
        "m2": 0.1 * jax.random.normal(ks[9], (planes,), jnp.float32),
        "v2": 0.5 + jax.random.uniform(ks[10], (planes,), jnp.float32),
        "g3": 1.0 + 0.1 * jax.random.normal(ks[11], (planes * 4,), jnp.float32),
        "b3": 0.1 * jax.random.normal(ks[12], (planes * 4,), jnp.float32),
        "m3": 0.1 * jax.random.normal(ks[13], (planes * 4,), jnp.float32),
        "v3": 0.5 + jax.random.uniform(ks[14], (planes * 4,), jnp.float32),
    }

    x = jax.random.normal(ks[15], (N, inplanes, H, W), jnp.float32)

    ref = jax.block_until_ready(bottleneck_reference(x, params))

    # Exact-precision path (f32 compute), forced 2 row tiles -> halo path.
    out_f32 = jax.block_until_ready(
        bottleneck_forward(x, params, tile_h=8, compute_dtype=jnp.float32))
    np.testing.assert_allclose(np.asarray(out_f32), np.asarray(ref),
                               rtol=1e-4, atol=1e-4)

    # Default path: bf16 activations/weights, f32 MXU accumulation.
    out_bf16 = jax.block_until_ready(bottleneck_forward(x, params))
    np.testing.assert_allclose(np.asarray(out_bf16), np.asarray(ref),
                               rtol=5e-2, atol=5e-2)

    print("KERNEL_OK")
</pallas_src>

<mosaic_0001>
module attributes {stable_mosaic.version = 11 : i64} {
  func.func @kernel(%arg0: i32, %arg1: i32, %arg2: memref<1x128x128xf32, #tpu.memory_space<vmem>>, %arg3: memref<1x32x128xf32, #tpu.memory_space<vmem>>, %arg4: memref<128x128xf32, #tpu.memory_space<vmem>>, %arg5: memref<1x128xf32, #tpu.memory_space<vmem>>, %arg6: memref<1152x128xf32, #tpu.memory_space<vmem>>, %arg7: memref<1x128xf32, #tpu.memory_space<vmem>>, %arg8: memref<128x128xf32, #tpu.memory_space<vmem>>, %arg9: memref<1x128xf32, #tpu.memory_space<vmem>>, %arg10: memref<1x128x128xf32, #tpu.memory_space<vmem>>, %arg11: memref<176x384xf32, #tpu.memory_space<vmem>>) attributes {dimension_semantics = [#tpu.dimension_semantics<parallel>, #tpu.dimension_semantics<parallel>], iteration_bounds = array<i64: 2, 2>, scalar_prefetch = 0 : i64, scratch_operands = 1 : i64, tpu.core_type = #tpu.core_type<tc>, window_params = [{transform_indices = @transform_0, window_bounds = array<i64: 1, 128, 128>}, {transform_indices = @transform_1, window_bounds = array<i64: 1, 32, 128>}, {pipeline_mode = #tpu.pipeline_mode<synchronous>, transform_indices = @transform_2, window_bounds = array<i64: 128, 128>}, {pipeline_mode = #tpu.pipeline_mode<synchronous>, transform_indices = @transform_3, window_bounds = array<i64: 1, 128>}, {pipeline_mode = #tpu.pipeline_mode<synchronous>, transform_indices = @transform_4, window_bounds = array<i64: 1152, 128>}, {pipeline_mode = #tpu.pipeline_mode<synchronous>, transform_indices = @transform_5, window_bounds = array<i64: 1, 128>}, {pipeline_mode = #tpu.pipeline_mode<synchronous>, transform_indices = @transform_6, window_bounds = array<i64: 128, 128>}, {pipeline_mode = #tpu.pipeline_mode<synchronous>, transform_indices = @transform_7, window_bounds = array<i64: 1, 128>}, {transform_indices = @transform_8, window_bounds = array<i64: 1, 128, 128>}]} {
    %c0 = arith.constant 0 : index
    %c0_0 = arith.constant 0 : index
    %c0_1 = arith.constant 0 : index
    %0 = vector.load %arg2[%c0, %c0_0, %c0_1] : memref<1x128x128xf32, #tpu.memory_space<vmem>>, vector<1x128x128xf32>
    %1 = vector.shape_cast %0 : vector<1x128x128xf32> to vector<128x128xf32>
    %c0_2 = arith.constant 0 : index
    %c0_3 = arith.constant 0 : index
    %2 = vector.load %arg4[%c0_2, %c0_3] : memref<128x128xf32, #tpu.memory_space<vmem>>, vector<128x128xf32>
    %cst = arith.constant dense<0.000000e+00> : vector<128x128xf32>
    %3 = tpu.matmul %1, %2, %cst {dimension_numbers = #tpu.dot_dimension_numbers<[1], [0], [0], [1], [0, 0, 1, 1], [], []>} : vector<128x128xf32>, vector<128x128xf32>, vector<128x128xf32> -> vector<128x128xf32>
    %c0_4 = arith.constant 0 : index
    %c0_5 = arith.constant 0 : index
    %4 = vector.load %arg5[%c0_4, %c0_5] : memref<1x128xf32, #tpu.memory_space<vmem>>, vector<1x128xf32>
    %5 = vector.broadcast %4 : vector<1x128xf32> to vector<128x128xf32>
    %6 = arith.addf %3, %5 : vector<128x128xf32>
    %cst_6 = arith.constant 0.000000e+00 : f32
    %7 = vector.broadcast %cst_6 : f32 to vector<128x128xf32>
    %8 = arith.maximumf %6, %7 : vector<128x128xf32>
    %c0_7 = arith.constant 0 : index
    %c0_8 = arith.constant 0 : index
    %c0_9 = arith.constant 0 : index
    %9 = vector.load %arg3[%c0_7, %c0_8, %c0_9] : memref<1x32x128xf32, #tpu.memory_space<vmem>>, vector<1x32x128xf32>
    %10 = vector.shape_cast %9 : vector<1x32x128xf32> to vector<32x128xf32>
    %c0_10 = arith.constant 0 : index
    %c0_11 = arith.constant 0 : index
    %11 = vector.load %arg4[%c0_10, %c0_11] : memref<128x128xf32, #tpu.memory_space<vmem>>, vector<128x128xf32>
    %cst_12 = arith.constant dense<0.000000e+00> : vector<32x128xf32>
    %12 = tpu.matmul %10, %11, %cst_12 {dimension_numbers = #tpu.dot_dimension_numbers<[1], [0], [0], [1], [0, 0, 1, 1], [], []>} : vector<32x128xf32>, vector<128x128xf32>, vector<32x128xf32> -> vector<32x128xf32>
    %c0_13 = arith.constant 0 : index
    %c0_14 = arith.constant 0 : index
    %13 = vector.load %arg5[%c0_13, %c0_14] : memref<1x128xf32, #tpu.memory_space<vmem>>, vector<1x128xf32>
    %14 = vector.broadcast %13 : vector<1x128xf32> to vector<32x128xf32>
    %15 = arith.addf %12, %14 : vector<32x128xf32>
    %cst_15 = arith.constant 0.000000e+00 : f32
    %16 = vector.broadcast %cst_15 : f32 to vector<32x128xf32>
    %17 = arith.maximumf %15, %16 : vector<32x128xf32>
    %c0_i32 = arith.constant 0 : i32
    %18 = arith.cmpi sgt, %arg1, %c0_i32 : i32
    %19 = vector.extract_strided_slice %17 {offsets = [0, 0], sizes = [16, 128], strides = [1, 1]} : vector<32x128xf32> to vector<16x128xf32>
    %cst_16 = arith.constant 0.000000e+00 : f32
    %20 = vector.broadcast %cst_16 : f32 to vector<16x128xf32>
    %21 = arith.select %18, %19, %20 : vector<16x128xf32>
    %c1_i32 = arith.constant 1 : i32
    %22 = arith.cmpi slt, %arg1, %c1_i32 : i32
    %23 = vector.extract_strided_slice %17 {offsets = [16, 0], sizes = [16, 128], strides = [1, 1]} : vector<32x128xf32> to vector<16x128xf32>
    %cst_17 = arith.constant 0.000000e+00 : f32
    %24 = vector.broadcast %cst_17 : f32 to vector<16x128xf32>
    %25 = arith.select %22, %23, %24 : vector<16x128xf32>
    %c8 = arith.constant 8 : index
    %c128 = arith.constant 128 : index
    %26 = vector.load %arg11[%c8, %c128] : memref<176x384xf32, #tpu.memory_space<vmem>>, vector<16x128xf32>
    tpu.vector_store %arg11[%c8, %c128], %21 {strides = array<i32>} : memref<176x384xf32, #tpu.memory_space<vmem>>, vector<16x128xf32>,
    %c24 = arith.constant 24 : index
    %c128_18 = arith.constant 128 : index
    %27 = vector.load %arg11[%c24, %c128_18] : memref<176x384xf32, #tpu.memory_space<vmem>>, vector<128x128xf32>
    tpu.vector_store %arg11[%c24, %c128_18], %8 {strides = array<i32>} : memref<176x384xf32, #tpu.memory_space<vmem>>, vector<128x128xf32>,
    %c152 = arith.constant 152 : index
    %c128_19 = arith.constant 128 : index
    %28 = vector.load %arg11[%c152, %c128_19] : memref<176x384xf32, #tpu.memory_space<vmem>>, vector<16x128xf32>
    tpu.vector_store %arg11[%c152, %c128_19], %25 {strides = array<i32>} : memref<176x384xf32, #tpu.memory_space<vmem>>, vector<16x128xf32>,
    %29 = tpu.iota {dimensions = array<i32: 0>} : vector<160x1xi32>
    %c16_i32 = arith.constant 16 : i32
    %c0_i32_20 = arith.constant 0 : i32
    %30 = arith.cmpi eq, %c16_i32, %c0_i32_20 : i32
    %c1_i32_21 = arith.constant 1 : i32
    %31 = arith.select %30, %c1_i32_21, %c16_i32 : i32
    %32 = vector.broadcast %31 : i32 to vector<160x1xi32>
    %33 = arith.remsi %29, %32 : vector<160x1xi32>
    %c0_i32_22 = arith.constant 0 : i32
    %34 = vector.broadcast %c0_i32_22 : i32 to vector<160x1xi32>
    %35 = arith.cmpi ne, %33, %34 : vector<160x1xi32>
    %c0_i32_23 = arith.constant 0 : i32
    %36 = vector.broadcast %c0_i32_23 : i32 to vector<160x1xi32>
    %37 = arith.cmpi slt, %33, %36 : vector<160x1xi32>
    %c0_i32_24 = arith.constant 0 : i32
    %38 = arith.cmpi slt, %31, %c0_i32_24 : i32
    %39 = vector.broadcast %38 : i1 to vector<160x1xi1>
    %40 = vector.broadcast %39 : vector<160x1xi1> to vector<160x1xi1>
    %41 = arith.xori %37, %40 : vector<160x1xi1>
    %42 = arith.andi %41, %35 : vector<160x1xi1>
    %43 = vector.broadcast %31 : i32 to vector<160x1xi32>
    %44 = arith.addi %33, %43 : vector<160x1xi32>
    %45 = arith.select %42, %44, %33 : vector<160x1xi1>, vector<160x1xi32>
    %c7 = arith.constant 7 : index
    %c128_25 = arith.constant 128 : index
    %46 = vector.load %arg11[%c7, %c128_25] : memref<176x384xf32, #tpu.memory_space<vmem>>, vector<160x128xf32>
    %c9 = arith.constant 9 : index
    %c128_26 = arith.constant 128 : index
    %47 = vector.load %arg11[%c9, %c128_26] : memref<176x384xf32, #tpu.memory_space<vmem>>, vector<160x128xf32>
    %c0_i32_27 = arith.constant 0 : i32
    %48 = vector.broadcast %c0_i32_27 : i32 to vector<160x1xi32>
    %49 = arith.cmpi ne, %45, %48 : vector<160x1xi32>
    %cst_28 = arith.constant 0.000000e+00 : f32
    %50 = vector.shape_cast %49 : vector<160x1xi1> to vector<160x1xi1>
    %51 = vector.broadcast %50 : vector<160x1xi1> to vector<160x128xi1>
    %52 = vector.broadcast %cst_28 : f32 to vector<160x128xf32>
    %53 = arith.select %51, %46, %52 : vector<160x128xi1>, vector<160x128xf32>
    %c8_29 = arith.constant 8 : index
    %c0_30 = arith.constant 0 : index
    %54 = vector.load %arg11[%c8_29, %c0_30] : memref<176x384xf32, #tpu.memory_space<vmem>>, vector<160x128xf32>
    tpu.vector_store %arg11[%c8_29, %c0_30], %53 {strides = array<i32>} : memref<176x384xf32, #tpu.memory_space<vmem>>, vector<160x128xf32>,
    %c15_i32 = arith.constant 15 : i32
    %55 = vector.broadcast %c15_i32 : i32 to vector<160x1xi32>
    %56 = arith.cmpi ne, %45, %55 : vector<160x1xi32>
    %cst_31 = arith.constant 0.000000e+00 : f32
    %57 = vector.shape_cast %56 : vector<160x1xi1> to vector<160x1xi1>
    %58 = vector.broadcast %57 : vector<160x1xi1> to vector<160x128xi1>
    %59 = vector.broadcast %cst_31 : f32 to vector<160x128xf32>
    %60 = arith.select %58, %47, %59 : vector<160x128xi1>, vector<160x128xf32>
    %c8_32 = arith.constant 8 : index
    %c256 = arith.constant 256 : index
    %61 = vector.load %arg11[%c8_32, %c256] : memref<176x384xf32, #tpu.memory_space<vmem>>, vector<160x128xf32>
    tpu.vector_store %arg11[%c8_32, %c256], %60 {strides = array<i32>} : memref<176x384xf32, #tpu.memory_space<vmem>>, vector<160x128xf32>,
    %c8_33 = arith.constant 8 : index
    %c0_34 = arith.constant 0 : index
    %62 = vector.load %arg11[%c8_33, %c0_34] : memref<176x384xf32, #tpu.memory_space<vmem>>, vector<128x384xf32>
    %c0_35 = arith.constant 0 : index
    %c0_36 = arith.constant 0 : index
    %63 = vector.load %arg6[%c0_35, %c0_36] : memref<1152x128xf32, #tpu.memory_space<vmem>>, vector<384x128xf32>
    %cst_37 = arith.constant dense<0.000000e+00> : vector<128x128xf32>
    %64 = tpu.matmul %62, %63, %cst_37 {dimension_numbers = #tpu.dot_dimension_numbers<[1], [0], [0], [1], [0, 0, 1, 1], [], []>} : vector<128x384xf32>, vector<384x128xf32>, vector<128x128xf32> -> vector<128x128xf32>
    %c24_38 = arith.constant 24 : index
    %c0_39 = arith.constant 0 : index
    %65 = vector.load %arg11[%c24_38, %c0_39] : memref<176x384xf32, #tpu.memory_space<vmem>>, vector<128x384xf32>
    %c384 = arith.constant 384 : index
    %c0_40 = arith.constant 0 : index
    %66 = vector.load %arg6[%c384, %c0_40] : memref<1152x128xf32, #tpu.memory_space<vmem>>, vector<384x128xf32>
    %cst_41 = arith.constant dense<0.000000e+00> : vector<128x128xf32>
    %67 = tpu.matmul %65, %66, %cst_41 {dimension_numbers = #tpu.dot_dimension_numbers<[1], [0], [0], [1], [0, 0, 1, 1], [], []>} : vector<128x384xf32>, vector<384x128xf32>, vector<128x128xf32> -> vector<128x128xf32>
    %68 = arith.addf %64, %67 : vector<128x128xf32>
    %c40 = arith.constant 40 : index
    %c0_42 = arith.constant 0 : index
    %69 = vector.load %arg11[%c40, %c0_42] : memref<176x384xf32, #tpu.memory_space<vmem>>, vector<128x384xf32>
    %c768 = arith.constant 768 : index
    %c0_43 = arith.constant 0 : index
    %70 = vector.load %arg6[%c768, %c0_43] : memref<1152x128xf32, #tpu.memory_space<vmem>>, vector<384x128xf32>
    %cst_44 = arith.constant dense<0.000000e+00> : vector<128x128xf32>
    %71 = tpu.matmul %69, %70, %cst_44 {dimension_numbers = #tpu.dot_dimension_numbers<[1], [0], [0], [1], [0, 0, 1, 1], [], []>} : vector<128x384xf32>, vector<384x128xf32>, vector<128x128xf32> -> vector<128x128xf32>
    %72 = arith.addf %68, %71 : vector<128x128xf32>
    %c0_45 = arith.constant 0 : index
    %c0_46 = arith.constant 0 : index
    %73 = vector.load %arg7[%c0_45, %c0_46] : memref<1x128xf32, #tpu.memory_space<vmem>>, vector<1x128xf32>
    %74 = vector.broadcast %73 : vector<1x128xf32> to vector<128x128xf32>
    %75 = arith.addf %72, %74 : vector<128x128xf32>
    %cst_47 = arith.constant 0.000000e+00 : f32
    %76 = vector.broadcast %cst_47 : f32 to vector<128x128xf32>
    %77 = arith.maximumf %75, %76 : vector<128x128xf32>
    %c0_48 = arith.constant 0 : index
    %c0_49 = arith.constant 0 : index
    %78 = vector.load %arg8[%c0_48, %c0_49] : memref<128x128xf32, #tpu.memory_space<vmem>>, vector<128x128xf32>
    %cst_50 = arith.constant dense<0.000000e+00> : vector<128x128xf32>
    %79 = tpu.matmul %77, %78, %cst_50 {dimension_numbers = #tpu.dot_dimension_numbers<[1], [0], [0], [1], [0, 0, 1, 1], [], []>} : vector<128x128xf32>, vector<128x128xf32>, vector<128x128xf32> -> vector<128x128xf32>
    %c0_51 = arith.constant 0 : index
    %c0_52 = arith.constant 0 : index
    %80 = vector.load %arg9[%c0_51, %c0_52] : memref<1x128xf32, #tpu.memory_space<vmem>>, vector<1x128xf32>
    %81 = vector.broadcast %80 : vector<1x128xf32> to vector<128x128xf32>
    %82 = arith.addf %79, %81 : vector<128x128xf32>
    %c0_53 = arith.constant 0 : index
    %c0_54 = arith.constant 0 : index
    %c0_55 = arith.constant 0 : index
    %83 = vector.load %arg2[%c0_53, %c0_54, %c0_55] : memref<1x128x128xf32, #tpu.memory_space<vmem>>, vector<1x128x128xf32>
    %84 = vector.shape_cast %83 : vector<1x128x128xf32> to vector<128x128xf32>
    %85 = arith.addf %82, %84 : vector<128x128xf32>
    %cst_56 = arith.constant 0.000000e+00 : f32
    %86 = vector.broadcast %cst_56 : f32 to vector<128x128xf32>
    %87 = arith.maximumf %85, %86 : vector<128x128xf32>
    %c0_57 = arith.constant 0 : index
    %c0_58 = arith.constant 0 : index
    %c0_59 = arith.constant 0 : index
    %88 = vector.load %arg10[%c0_57, %c0_58, %c0_59] : memref<1x128x128xf32, #tpu.memory_space<vmem>>, vector<1x128x128xf32>
    %89 = vector.shape_cast %88 : vector<1x128x128xf32> to vector<128x128xf32>
    %90 = vector.shape_cast %87 : vector<128x128xf32> to vector<1x128x128xf32>
    tpu.vector_store %arg10[%c0_57, %c0_58, %c0_59], %90 {strides = array<i32>} : memref<1x128x128xf32, #tpu.memory_space<vmem>>, vector<1x128x128xf32>,
    return
  }
  func.func @transform_0(%arg0: i32, %arg1: i32) -> (i32, i32, i32) {
    %c2_i32 = arith.constant 2 : i32
    %0 = arith.muli %arg0, %c2_i32 : i32
    %1 = arith.addi %0, %arg1 : i32
    %c0_i32 = arith.constant 0 : i32
    %c0_i32_0 = arith.constant 0 : i32
    %c0_i32_1 = arith.constant 0 : i32
    return %1, %c0_i32, %c0_i32_0 : i32, i32, i32
  }
  func.func @transform_1(%arg0: i32, %arg1: i32) -> (i32, i32, i32) {
    %c2_i32 = arith.constant 2 : i32
    %0 = arith.muli %arg0, %c2_i32 : i32
    %1 = arith.addi %0, %arg1 : i32
    %c0_i32 = arith.constant 0 : i32
    %c0_i32_0 = arith.constant 0 : i32
    %c0_i32_1 = arith.constant 0 : i32
    return %1, %c0_i32, %c0_i32_0 : i32, i32, i32
  }
  func.func @transform_2(%arg0: i32, %arg1: i32) -> (i32, i32) {
    %c0_i32 = arith.constant 0 : i32
    %c0_i32_0 = arith.constant 0 : i32
    %c0_i32_1 = arith.constant 0 : i32
    return %c0_i32, %c0_i32_0 : i32, i32
  }
  func.func @transform_3(%arg0: i32, %arg1: i32) -> (i32, i32) {
    %c0_i32 = arith.constant 0 : i32
    %c0_i32_0 = arith.constant 0 : i32
    %c0_i32_1 = arith.constant 0 : i32
    return %c0_i32, %c0_i32_0 : i32, i32
  }
  func.func @transform_4(%arg0: i32, %arg1: i32) -> (i32, i32) {
    %c0_i32 = arith.constant 0 : i32
    %c0_i32_0 = arith.constant 0 : i32
    %c0_i32_1 = arith.constant 0 : i32
    return %c0_i32, %c0_i32_0 : i32, i32
  }
  func.func @transform_5(%arg0: i32, %arg1: i32) -> (i32, i32) {
    %c0_i32 = arith.constant 0 : i32
    %c0_i32_0 = arith.constant 0 : i32
    %c0_i32_1 = arith.constant 0 : i32
    return %c0_i32, %c0_i32_0 : i32, i32
  }
  func.func @transform_6(%arg0: i32, %arg1: i32) -> (i32, i32) {
    %c0_i32 = arith.constant 0 : i32
    %c0_i32_0 = arith.constant 0 : i32
    %c0_i32_1 = arith.constant 0 : i32
    return %c0_i32, %c0_i32_0 : i32, i32
  }
  func.func @transform_7(%arg0: i32, %arg1: i32) -> (i32, i32) {
    %c0_i32 = arith.constant 0 : i32
    %c0_i32_0 = arith.constant 0 : i32
    %c0_i32_1 = arith.constant 0 : i32
    return %c0_i32, %c0_i32_0 : i32, i32
  }
  func.func @transform_8(%arg0: i32, %arg1: i32) -> (i32, i32, i32) {
    %c2_i32 = arith.constant 2 : i32
    %0 = arith.muli %arg0, %c2_i32 : i32
    %1 = arith.addi %0, %arg1 : i32
    %c0_i32 = arith.constant 0 : i32
    %c0_i32_0 = arith.constant 0 : i32
    %c0_i32_1 = arith.constant 0 : i32
    return %1, %c0_i32, %c0_i32_0 : i32, i32, i32
  }
}

module attributes {stable_mosaic.version = 11 : i64} {
  func.func @kernel(%arg0: i32, %arg1: i32, %arg2: memref<1x128x128xf32, #tpu.memory_space<vmem>>, %arg3: memref<1x32x128xf32, #tpu.memory_space<vmem>>, %arg4: memref<128x128xf32, #tpu.memory_space<vmem>>, %arg5: memref<1x128xf32, #tpu.memory_space<vmem>>, %arg6: memref<1152x128xf32, #tpu.memory_space<vmem>>, %arg7: memref<1x128xf32, #tpu.memory_space<vmem>>, %arg8: memref<128x128xf32, #tpu.memory_space<vmem>>, %arg9: memref<1x128xf32, #tpu.memory_space<vmem>>, %arg10: memref<1x128x128xf32, #tpu.memory_space<vmem>>, %arg11: memref<176x384xf32, #tpu.memory_space<vmem>>) attributes {dimension_semantics = [#tpu.dimension_semantics<parallel>, #tpu.dimension_semantics<parallel>], iteration_bounds = array<i64: 2, 2>, scalar_prefetch = 0 : i64, scratch_operands = 1 : i64, tpu.core_type = #tpu.core_type<tc>, window_params = [{transform_indices = @transform_0, window_bounds = array<i64: 1, 128, 128>}, {transform_indices = @transform_1, window_bounds = array<i64: 1, 32, 128>}, {pipeline_mode = #tpu.pipeline_mode<synchronous>, transform_indices = @transform_2, window_bounds = array<i64: 128, 128>}, {pipeline_mode = #tpu.pipeline_mode<synchronous>, transform_indices = @transform_3, window_bounds = array<i64: 1, 128>}, {pipeline_mode = #tpu.pipeline_mode<synchronous>, transform_indices = @transform_4, window_bounds = array<i64: 1152, 128>}, {pipeline_mode = #tpu.pipeline_mode<synchronous>, transform_indices = @transform_5, window_bounds = array<i64: 1, 128>}, {pipeline_mode = #tpu.pipeline_mode<synchronous>, transform_indices = @transform_6, window_bounds = array<i64: 128, 128>}, {pipeline_mode = #tpu.pipeline_mode<synchronous>, transform_indices = @transform_7, window_bounds = array<i64: 1, 128>}, {transform_indices = @transform_8, window_bounds = array<i64: 1, 128, 128>}]} {
    %c0 = arith.constant 0 : index
    %c0_0 = arith.constant 0 : index
    %c0_1 = arith.constant 0 : index
    %0 = vector.load %arg2[%c0, %c0_0, %c0_1] : memref<1x128x128xf32, #tpu.memory_space<vmem>>, vector<1x128x128xf32>
    %1 = vector.shape_cast %0 : vector<1x128x128xf32> to vector<128x128xf32>
    %c0_2 = arith.constant 0 : index
    %c0_3 = arith.constant 0 : index
    %2 = vector.load %arg4[%c0_2, %c0_3] : memref<128x128xf32, #tpu.memory_space<vmem>>, vector<128x128xf32>
    %cst = arith.constant dense<0.000000e+00> : vector<128x128xf32>
    %3 = tpu.matmul %1, %2, %cst {dimension_numbers = #tpu.dot_dimension_numbers<[1], [0], [0], [1], [0, 0, 1, 1], [], []>} : vector<128x128xf32>, vector<128x128xf32>, vector<128x128xf32> -> vector<128x128xf32>
    %c0_4 = arith.constant 0 : index
    %c0_5 = arith.constant 0 : index
    %4 = vector.load %arg5[%c0_4, %c0_5] : memref<1x128xf32, #tpu.memory_space<vmem>>, vector<1x128xf32>
    %5 = vector.broadcast %4 : vector<1x128xf32> to vector<128x128xf32>
    %6 = arith.addf %3, %5 : vector<128x128xf32>
    %cst_6 = arith.constant 0.000000e+00 : f32
    %7 = vector.broadcast %cst_6 : f32 to vector<128x128xf32>
    %8 = arith.maximumf %6, %7 : vector<128x128xf32>
    %c0_7 = arith.constant 0 : index
    %c0_8 = arith.constant 0 : index
    %c0_9 = arith.constant 0 : index
    %9 = vector.load %arg3[%c0_7, %c0_8, %c0_9] : memref<1x32x128xf32, #tpu.memory_space<vmem>>, vector<1x32x128xf32>
    %10 = vector.shape_cast %9 : vector<1x32x128xf32> to vector<32x128xf32>
    %c0_10 = arith.constant 0 : index
    %c0_11 = arith.constant 0 : index
    %11 = vector.load %arg4[%c0_10, %c0_11] : memref<128x128xf32, #tpu.memory_space<vmem>>, vector<128x128xf32>
    %cst_12 = arith.constant dense<0.000000e+00> : vector<32x128xf32>
    %12 = tpu.matmul %10, %11, %cst_12 {dimension_numbers = #tpu.dot_dimension_numbers<[1], [0], [0], [1], [0, 0, 1, 1], [], []>} : vector<32x128xf32>, vector<128x128xf32>, vector<32x128xf32> -> vector<32x128xf32>
    %c0_13 = arith.constant 0 : index
    %c0_14 = arith.constant 0 : index
    %13 = vector.load %arg5[%c0_13, %c0_14] : memref<1x128xf32, #tpu.memory_space<vmem>>, vector<1x128xf32>
    %14 = vector.broadcast %13 : vector<1x128xf32> to vector<32x128xf32>
    %15 = arith.addf %12, %14 : vector<32x128xf32>
    %cst_15 = arith.constant 0.000000e+00 : f32
    %16 = vector.broadcast %cst_15 : f32 to vector<32x128xf32>
    %17 = arith.maximumf %15, %16 : vector<32x128xf32>
    %c0_i32 = arith.constant 0 : i32
    %18 = arith.cmpi sgt, %arg1, %c0_i32 : i32
    %19 = vector.extract_strided_slice %17 {offsets = [0, 0], sizes = [16, 128], strides = [1, 1]} : vector<32x128xf32> to vector<16x128xf32>
    %cst_16 = arith.constant 0.000000e+00 : f32
    %20 = vector.broadcast %cst_16 : f32 to vector<16x128xf32>
    %21 = arith.select %18, %19, %20 : vector<16x128xf32>
    %c1_i32 = arith.constant 1 : i32
    %22 = arith.cmpi slt, %arg1, %c1_i32 : i32
    %23 = vector.extract_strided_slice %17 {offsets = [16, 0], sizes = [16, 128], strides = [1, 1]} : vector<32x128xf32> to vector<16x128xf32>
    %cst_17 = arith.constant 0.000000e+00 : f32
    %24 = vector.broadcast %cst_17 : f32 to vector<16x128xf32>
    %25 = arith.select %22, %23, %24 : vector<16x128xf32>
    %c8 = arith.constant 8 : index
    %c128 = arith.constant 128 : index
    %26 = vector.load %arg11[%c8, %c128] : memref<176x384xf32, #tpu.memory_space<vmem>>, vector<16x128xf32>
    tpu.vector_store %arg11[%c8, %c128], %21 {strides = array<i32>} : memref<176x384xf32, #tpu.memory_space<vmem>>, vector<16x128xf32>,
    %c24 = arith.constant 24 : index
    %c128_18 = arith.constant 128 : index
    %27 = vector.load %arg11[%c24, %c128_18] : memref<176x384xf32, #tpu.memory_space<vmem>>, vector<128x128xf32>
    tpu.vector_store %arg11[%c24, %c128_18], %8 {strides = array<i32>} : memref<176x384xf32, #tpu.memory_space<vmem>>, vector<128x128xf32>,
    %c152 = arith.constant 152 : index
    %c128_19 = arith.constant 128 : index
    %28 = vector.load %arg11[%c152, %c128_19] : memref<176x384xf32, #tpu.memory_space<vmem>>, vector<16x128xf32>
    tpu.vector_store %arg11[%c152, %c128_19], %25 {strides = array<i32>} : memref<176x384xf32, #tpu.memory_space<vmem>>, vector<16x128xf32>,
    %29 = tpu.iota {dimensions = array<i32: 0>} : vector<160x1xi32>
    %c16_i32 = arith.constant 16 : i32
    %c0_i32_20 = arith.constant 0 : i32
    %30 = arith.cmpi eq, %c16_i32, %c0_i32_20 : i32
    %c1_i32_21 = arith.constant 1 : i32
    %31 = arith.select %30, %c1_i32_21, %c16_i32 : i32
    %32 = vector.broadcast %31 : i32 to vector<160x1xi32>
    %33 = arith.remsi %29, %32 : vector<160x1xi32>
    %c0_i32_22 = arith.constant 0 : i32
    %34 = vector.broadcast %c0_i32_22 : i32 to vector<160x1xi32>
    %35 = arith.cmpi ne, %33, %34 : vector<160x1xi32>
    %c0_i32_23 = arith.constant 0 : i32
    %36 = vector.broadcast %c0_i32_23 : i32 to vector<160x1xi32>
    %37 = arith.cmpi slt, %33, %36 : vector<160x1xi32>
    %c0_i32_24 = arith.constant 0 : i32
    %38 = arith.cmpi slt, %31, %c0_i32_24 : i32
    %39 = vector.broadcast %38 : i1 to vector<160x1xi1>
    %40 = vector.broadcast %39 : vector<160x1xi1> to vector<160x1xi1>
    %41 = arith.xori %37, %40 : vector<160x1xi1>
    %42 = arith.andi %41, %35 : vector<160x1xi1>
    %43 = vector.broadcast %31 : i32 to vector<160x1xi32>
    %44 = arith.addi %33, %43 : vector<160x1xi32>
    %45 = arith.select %42, %44, %33 : vector<160x1xi1>, vector<160x1xi32>
    %c7 = arith.constant 7 : index
    %c128_25 = arith.constant 128 : index
    %46 = vector.load %arg11[%c7, %c128_25] : memref<176x384xf32, #tpu.memory_space<vmem>>, vector<160x128xf32>
    %c9 = arith.constant 9 : index
    %c128_26 = arith.constant 128 : index
    %47 = vector.load %arg11[%c9, %c128_26] : memref<176x384xf32, #tpu.memory_space<vmem>>, vector<160x128xf32>
    %c0_i32_27 = arith.constant 0 : i32
    %48 = vector.broadcast %c0_i32_27 : i32 to vector<160x1xi32>
    %49 = arith.cmpi ne, %45, %48 : vector<160x1xi32>
    %cst_28 = arith.constant 0.000000e+00 : f32
    %50 = vector.shape_cast %49 : vector<160x1xi1> to vector<160x1xi1>
    %51 = vector.broadcast %50 : vector<160x1xi1> to vector<160x128xi1>
    %52 = vector.broadcast %cst_28 : f32 to vector<160x128xf32>
    %53 = arith.select %51, %46, %52 : vector<160x128xi1>, vector<160x128xf32>
    %c8_29 = arith.constant 8 : index
    %c0_30 = arith.constant 0 : index
    %54 = vector.load %arg11[%c8_29, %c0_30] : memref<176x384xf32, #tpu.memory_space<vmem>>, vector<160x128xf32>
    tpu.vector_store %arg11[%c8_29, %c0_30], %53 {strides = array<i32>} : memref<176x384xf32, #tpu.memory_space<vmem>>, vector<160x128xf32>,
    %c15_i32 = arith.constant 15 : i32
    %55 = vector.broadcast %c15_i32 : i32 to vector<160x1xi32>
    %56 = arith.cmpi ne, %45, %55 : vector<160x1xi32>
    %cst_31 = arith.constant 0.000000e+00 : f32
    %57 = vector.shape_cast %56 : vector<160x1xi1> to vector<160x1xi1>
    %58 = vector.broadcast %57 : vector<160x1xi1> to vector<160x128xi1>
    %59 = vector.broadcast %cst_31 : f32 to vector<160x128xf32>
    %60 = arith.select %58, %47, %59 : vector<160x128xi1>, vector<160x128xf32>
    %c8_32 = arith.constant 8 : index
    %c256 = arith.constant 256 : index
    %61 = vector.load %arg11[%c8_32, %c256] : memref<176x384xf32, #tpu.memory_space<vmem>>, vector<160x128xf32>
    tpu.vector_store %arg11[%c8_32, %c256], %60 {strides = array<i32>} : memref<176x384xf32, #tpu.memory_space<vmem>>, vector<160x128xf32>,
    %c8_33 = arith.constant 8 : index
    %c0_34 = arith.constant 0 : index
    %62 = vector.load %arg11[%c8_33, %c0_34] : memref<176x384xf32, #tpu.memory_space<vmem>>, vector<128x384xf32>
    %c0_35 = arith.constant 0 : index
    %c0_36 = arith.constant 0 : index
    %63 = vector.load %arg6[%c0_35, %c0_36] : memref<1152x128xf32, #tpu.memory_space<vmem>>, vector<384x128xf32>
    %cst_37 = arith.constant dense<0.000000e+00> : vector<128x128xf32>
    %64 = tpu.matmul %62, %63, %cst_37 {dimension_numbers = #tpu.dot_dimension_numbers<[1], [0], [0], [1], [0, 0, 1, 1], [], []>} : vector<128x384xf32>, vector<384x128xf32>, vector<128x128xf32> -> vector<128x128xf32>
    %c24_38 = arith.constant 24 : index
    %c0_39 = arith.constant 0 : index
    %65 = vector.load %arg11[%c24_38, %c0_39] : memref<176x384xf32, #tpu.memory_space<vmem>>, vector<128x384xf32>
    %c384 = arith.constant 384 : index
    %c0_40 = arith.constant 0 : index
    %66 = vector.load %arg6[%c384, %c0_40] : memref<1152x128xf32, #tpu.memory_space<vmem>>, vector<384x128xf32>
    %cst_41 = arith.constant dense<0.000000e+00> : vector<128x128xf32>
    %67 = tpu.matmul %65, %66, %cst_41 {dimension_numbers = #tpu.dot_dimension_numbers<[1], [0], [0], [1], [0, 0, 1, 1], [], []>} : vector<128x384xf32>, vector<384x128xf32>, vector<128x128xf32> -> vector<128x128xf32>
    %68 = arith.addf %64, %67 : vector<128x128xf32>
    %c40 = arith.constant 40 : index
    %c0_42 = arith.constant 0 : index
    %69 = vector.load %arg11[%c40, %c0_42] : memref<176x384xf32, #tpu.memory_space<vmem>>, vector<128x384xf32>
    %c768 = arith.constant 768 : index
    %c0_43 = arith.constant 0 : index
    %70 = vector.load %arg6[%c768, %c0_43] : memref<1152x128xf32, #tpu.memory_space<vmem>>, vector<384x128xf32>
    %cst_44 = arith.constant dense<0.000000e+00> : vector<128x128xf32>
    %71 = tpu.matmul %69, %70, %cst_44 {dimension_numbers = #tpu.dot_dimension_numbers<[1], [0], [0], [1], [0, 0, 1, 1], [], []>} : vector<128x384xf32>, vector<384x128xf32>, vector<128x128xf32> -> vector<128x128xf32>
    %72 = arith.addf %68, %71 : vector<128x128xf32>
    %c0_45 = arith.constant 0 : index
    %c0_46 = arith.constant 0 : index
    %73 = vector.load %arg7[%c0_45, %c0_46] : memref<1x128xf32, #tpu.memory_space<vmem>>, vector<1x128xf32>
    %74 = vector.broadcast %73 : vector<1x128xf32> to vector<128x128xf32>
    %75 = arith.addf %72, %74 : vector<128x128xf32>
    %cst_47 = arith.constant 0.000000e+00 : f32
    %76 = vector.broadcast %cst_47 : f32 to vector<128x128xf32>
    %77 = arith.maximumf %75, %76 : vector<128x128xf32>
    %c0_48 = arith.constant 0 : index
    %c0_49 = arith.constant 0 : index
    %78 = vector.load %arg8[%c0_48, %c0_49] : memref<128x128xf32, #tpu.memory_space<vmem>>, vector<128x128xf32>
    %cst_50 = arith.constant dense<0.000000e+00> : vector<128x128xf32>
    %79 = tpu.matmul %77, %78, %cst_50 {dimension_numbers = #tpu.dot_dimension_numbers<[1], [0], [0], [1], [0, 0, 1, 1], [], []>} : vector<128x128xf32>, vector<128x128xf32>, vector<128x128xf32> -> vector<128x128xf32>
    %c0_51 = arith.constant 0 : index
    %c0_52 = arith.constant 0 : index
    %80 = vector.load %arg9[%c0_51, %c0_52] : memref<1x128xf32, #tpu.memory_space<vmem>>, vector<1x128xf32>
    %81 = vector.broadcast %80 : vector<1x128xf32> to vector<128x128xf32>
    %82 = arith.addf %79, %81 : vector<128x128xf32>
    %c0_53 = arith.constant 0 : index
    %c0_54 = arith.constant 0 : index
    %c0_55 = arith.constant 0 : index
    %83 = vector.load %arg2[%c0_53, %c0_54, %c0_55] : memref<1x128x128xf32, #tpu.memory_space<vmem>>, vector<1x128x128xf32>
    %84 = vector.shape_cast %83 : vector<1x128x128xf32> to vector<128x128xf32>
    %85 = arith.addf %82, %84 : vector<128x128xf32>
    %cst_56 = arith.constant 0.000000e+00 : f32
    %86 = vector.broadcast %cst_56 : f32 to vector<128x128xf32>
    %87 = arith.maximumf %85, %86 : vector<128x128xf32>
    %c0_57 = arith.constant 0 : index
    %c0_58 = arith.constant 0 : index
    %c0_59 = arith.constant 0 : index
    %88 = vector.load %arg10[%c0_57, %c0_58, %c0_59] : memref<1x128x128xf32, #tpu.memory_space<vmem>>, vector<1x128x128xf32>
    %89 = vector.shape_cast %88 : vector<1x128x128xf32> to vector<128x128xf32>
    %90 = vector.shape_cast %87 : vector<128x128xf32> to vector<1x128x128xf32>
    tpu.vector_store %arg10[%c0_57, %c0_58, %c0_59], %90 {strides = array<i32>} : memref<1x128x128xf32, #tpu.memory_space<vmem>>, vector<1x128x128xf32>,
    return
  }
  func.func @transform_0(%arg0: i32, %arg1: i32) -> (i32, i32, i32) {
    %c2_i32 = arith.constant 2 : i32
    %0 = arith.muli %arg0, %c2_i32 : i32
    %1 = arith.addi %0, %arg1 : i32
    %c0_i32 = arith.constant 0 : i32
    %c0_i32_0 = arith.constant 0 : i32
    %c0_i32_1 = arith.constant 0 : i32
    return %1, %c0_i32, %c0_i32_0 : i32, i32, i32
  }
  func.func @transform_1(%arg0: i32, %arg1: i32) -> (i32, i32, i32) {
    %c2_i32 = arith.constant 2 : i32
    %0 = arith.muli %arg0, %c2_i32 : i32
    %1 = arith.addi %0, %arg1 : i32
    %c0_i32 = arith.constant 0 : i32
    %c0_i32_0 = arith.constant 0 : i32
    %c0_i32_1 = arith.constant 0 : i32
    return %1, %c0_i32, %c0_i32_0 : i32, i32, i32
  }
  func.func @transform_2(%arg0: i32, %arg1: i32) -> (i32, i32) {
    %c0_i32 = arith.constant 0 : i32
    %c0_i32_0 = arith.constant 0 : i32
    %c0_i32_1 = arith.constant 0 : i32
    return %c0_i32, %c0_i32_0 : i32, i32
  }
  func.func @transform_3(%arg0: i32, %arg1: i32) -> (i32, i32) {
    %c0_i32 = arith.constant 0 : i32
    %c0_i32_0 = arith.constant 0 : i32
    %c0_i32_1 = arith.constant 0 : i32
    return %c0_i32, %c0_i32_0 : i32, i32
  }
  func.func @transform_4(%arg0: i32, %arg1: i32) -> (i32, i32) {
    %c0_i32 = arith.constant 0 : i32
    %c0_i32_0 = arith.constant 0 : i32
    %c0_i32_1 = arith.constant 0 : i32
    return %c0_i32, %c0_i32_0 : i32, i32
  }
  func.func @transform_5(%arg0: i32, %arg1: i32) -> (i32, i32) {
    %c0_i32 = arith.constant 0 : i32
    %c0_i32_0 = arith.constant 0 : i32
    %c0_i32_1 = arith.constant 0 : i32
    return %c0_i32, %c0_i32_0 : i32, i32
  }
  func.func @transform_6(%arg0: i32, %arg1: i32) -> (i32, i32) {
    %c0_i32 = arith.constant 0 : i32
    %c0_i32_0 = arith.constant 0 : i32
    %c0_i32_1 = arith.constant 0 : i32
    return %c0_i32, %c0_i32_0 : i32, i32
  }
  func.func @transform_7(%arg0: i32, %arg1: i32) -> (i32, i32) {
    %c0_i32 = arith.constant 0 : i32
    %c0_i32_0 = arith.constant 0 : i32
    %c0_i32_1 = arith.constant 0 : i32
    return %c0_i32, %c0_i32_0 : i32, i32
  }
  func.func @transform_8(%arg0: i32, %arg1: i32) -> (i32, i32, i32) {
    %c2_i32 = arith.constant 2 : i32
    %0 = arith.muli %arg0, %c2_i32 : i32
    %1 = arith.addi %0, %arg1 : i32
    %c0_i32 = arith.constant 0 : i32
    %c0_i32_0 = arith.constant 0 : i32
    %c0_i32_1 = arith.constant 0 : i32
    return %1, %c0_i32, %c0_i32_0 : i32, i32, i32
  }
}

</mosaic_0001>

<bundles_post_ra>
// kernel: tpu_custom_call.1
= control target key start
LH: loop header
LB: loop body
LE: loop exit
PB: predicated region body
PF: predicated region fallthrough
CT: control target
= control target key end

     0   :  { %s6153_s0 = inlined_call_operand.hbm [shape: f32[4,128,128], index: 0, kind: input, shape index: {}]   ;;  %s6154_s1 = inlined_call_operand.hbm [shape: f32[4,32,128], index: 1, kind: input, shape index: {}]   ;;  %s6155_s2 = inlined_call_operand.hbm [shape: f32[128,128], index: 2, kind: input, shape index: {}]   ;;  %s6156_s3 = inlined_call_operand.vmem [shape: f32[1,128], index: 3, kind: input, shape index: {}]   ;;  %s6157_s4 = inlined_call_operand.hbm [shape: f32[1152,128], index: 4, kind: input, shape index: {}]   ;;  %s6158_s5 = inlined_call_operand.vmem [shape: f32[1,128], index: 5, kind: input, shape index: {}]   ;;  %s6159_s6 = inlined_call_operand.hbm [shape: f32[128,128], index: 6, kind: input, shape index: {}]   ;;  %s6160_s7 = inlined_call_operand.vmem [shape: f32[1,128], index: 7, kind: input, shape index: {}]   ;;  %s6161_s8 = inlined_call_operand.hbm [shape: f32[4,128,128], index: 8, kind: output, shape index: {}]  }
   0x1   :  { %6268 = sst [smem:[#allocation84_spill]] %s6153_s0 }
   0x2   :  { %6269 = sst [smem:[#allocation85_spill]] %s6155_s2 }
   0x3   :  { %6270 = sst [smem:[#allocation86_spill]] %s6157_s4 }
   0x4   :  { %6271 = sst [smem:[#allocation87_spill]] %s6158_s5 }
   0x5   :  { %6272 = sst [smem:[#allocation88_spill]] %s6159_s6 }
   0x6   :  { %6273 = sst [smem:[#allocation89_spill]] %s6160_s7 }
   0x7   :  { %6274 = sst [smem:[#allocation90_spill]] %s6161_s8 }
   0x8   :  { %13 = vsyncpa [#allocation4], 0 }
   0x9   :  { %15 = vsyncpa [#allocation4 + $0x1], 0 }
   0xa   :  { %16 = vsyncpa [#allocation7], 0 }
   0xb   :  { %18 = vsyncpa [#allocation7 + $0x1], 0 }
   0xc   :  { %19 = vsyncpa [#allocation10], 0 }
   0xd   :  { %20 = vsyncpa [#allocation5], 0 }
   0xe   :  { %22 = vsyncpa [#allocation5 + $0x1], 0  ;;  %s4583_s27 = smov 0   ;;  %s4585_s28 = smov 0  }
   0xf   :  { %s4587_s29 = smov 0   ;;  %s4589_s30 = smov 0  }
  0x10   :  { %s4591_s9 = smov 0   ;;  %s4593_s10 = smov 0  }
  0x11   :  { %s4595_s11 = smov 0   ;;  %s4597_s12 = smov 0  }
  0x12 LB: > { %6275 = sst [smem:[#allocation18_spill]] %s4498_s27  ;;  %s4624_s13 = sadd.s32 4294967295, %s4526_s12   ;;  %s4526_s12 = sphi %s4597_s12, %s28_s12   ;;  %s4522_s11 = sphi %s4595_s11, %s6597_s11   ;;  %s4518_s10 = sphi %s4593_s10, %s6596_s10   ;;  %s4514_s9 = sphi %s4591_s9, %s6595_s9   ;;  %s4510_s30 = sphi %s4589_s30, %s6594_s30   ;;  %s4506_s29 = sphi %s4587_s29, %s6593_s29   ;;  %s4502_s28 = sphi %s4585_s28, %s6592_s28   ;;  %s4498_s27 = sphi %s4583_s27, %s6591_s27  }
  0x13   : > { %6276 = sst [smem:[#allocation19_spill]] %s4514_s9  ;;  %s2960_s14 = sadd.s32 4294967294, %s4526_s12  }
  0x14   : > { %p64_p0 = scmp.ne.s32.totalorder %s4502_s28, %s4498_s27  ;;  %p6164_p1 = scmp.eq.s32.totalorder %s4624_s13, 0 }
  0x15   : > { %p254_p3 = scmp.eq.s32.totalorder %s2960_s14, 3  ;;  %p2967_p5 = scmp.ge.s32.totalorder %s4526_s12, 1 }
  0x16   : > { %p4633_p4 = por %p6164_p1, %p64_p0  ;;  %p261_p7 = scmp.lt.s32.totalorder %s4526_s12, 5 }
  0x17   : > { %p4638_p6 = por %p254_p3, %p64_p0  ;;  %s4528_s18 = smov [#allocation8]  }
  0x18   : > { %s6277_s15 = scalar_select %p4633_p4, 1, 0 }
  0x19   : > { %s6278_s16 = scalar_select %p4638_p6, 1, 0 }
  0x1a   : > { %p4643_p8 = pnand %p2967_p5, %p261_p7  ;;  %s273_s19 = sshll.u32 %s4528_s18, 4  ;;  %s4647_s19 = int_to_ptr.vmem [resolvable:$true] %s273_s19 }
  0x1b   : > { %6279 = sst [smem:[#allocation20_spill]] %s6278_s16  ;;  %s4529_s21 = smov [#allocation9]  }
  0x1c   : > { %s6280_s17 = scalar_select %p4643_p8, 1, 0 }
  0x1d   : > { %p4123_p9 = pneg %p4643_p8  ;;  %s289_s22 = sshll.u32 %s4529_s21, 4  ;;  %s4657_s22 = int_to_ptr.vmem [resolvable:$true] %s289_s22 }
  0x1e   : > { %s4530_s23 = smov [#allocation11]   ;;  %s6282_s2 = sld [smem:[#allocation85_spill]] }
  0x1f   : > { %p4653_p10 = pnand %p4123_p9, %p6164_p1  ;;  %s4659_s24 = sshll.u32 %s4530_s23, 4  ;;  %s306_s24 = int_to_ptr.vmem [resolvable:$true] %s4659_s24 }
  0x21   : > { %p4669_p12 = pneg %p4653_p10 }
  0x24   : > { %s4272_s14 = scalar_lea.hbm %s6282_s2, 2048 }
  0x25   : > { %p4273_p11 = scmp.ne.s32.totalorder %s6282_s2, %s4272_s14  ;;  %p4279_p3 = scmp.lt.u32.totalorder %s4272_s14, %s6282_s2 }
  0x27   : > { %p4275_p13 = pnand %p4669_p12, %p4273_p11 }
  0x29   : > { %p4276_p0 = pneg %p4275_p13 }
  0x2b   : > { %p4281_p5 = pnand %p4279_p3, %p4276_p0 }
  0x2d   : > { %4284 = shalt.err (!%p4281_p5)
}
  0x2e   : > { %s4285_s16 = scalar_lea.vmem %s4647_s19, 2048  ;;  %p4293_p2 = scmp.lt.s32.totalorder %s4647_s19, %s4647_s19 }
  0x2f   : > { %p4286_p7 = scmp.ne.s32.totalorder %s4647_s19, %s4285_s16  ;;  %p4294_p6 = scmp.lt.s32.totalorder %s4285_s16, %s4285_s16 }
  0x31   : > { %p4288_p9 = pnand %p4286_p7, %p4669_p12  ;;  %p4295_p11 = por %p4294_p6, %p4293_p2 }
  0x33   : > { %p4289_p1 = pneg %p4288_p9 }
  0x35   : > { %p4296_p13 = pnand %p4295_p11, %p4289_p1 }
  0x37   : > { %4299 = shalt.err (!%p4296_p13)
}
  0x38   : > { %s6168_s25 = smov 128   ;;  %s6170_s26 = smov 8  }
  0x39   : > { %4126 = dma.hbm_to_vmem [thread:$0]  (!%p4653_p10), %s6282_s2, 2048, %s4647_s19, [#allocation7], %s6168_s25, %s6168_s25, %s6170_s26  }
  0x3a   : > { %s6284_s4 = sld [smem:[#allocation86_spill]] }
  0x40   : > { %s4300_s16 = scalar_lea.hbm %s6284_s4, 18432 }
  0x41   : > { %p4301_p1 = scmp.ne.s32.totalorder %s6284_s4, %s4300_s16  ;;  %p4307_p0 = scmp.lt.u32.totalorder %s4300_s16, %s6284_s4 }
  0x43   : > { %p4303_p2 = pnand %p4301_p1, %p4669_p12 }
  0x45   : > { %p4304_p6 = pneg %p4303_p2 }
  0x47   : > { %p4309_p3 = pnand %p4307_p0, %p4304_p6 }
  0x49   : > { %4312 = shalt.err (!%p4309_p3)
}
  0x4a   : > { %s4313_s19 = scalar_lea.vmem %s4657_s22, 18432  ;;  %p4321_p11 = scmp.lt.s32.totalorder %s4657_s22, %s4657_s22 }
  0x4b   : > { %p4314_p5 = scmp.ne.s32.totalorder %s4657_s22, %s4313_s19  ;;  %p4322_p13 = scmp.lt.s32.totalorder %s4313_s19, %s4313_s19 }
  0x4d   : > { %p4316_p7 = pnand %p4314_p5, %p4669_p12  ;;  %p4323_p1 = por %p4322_p13, %p4321_p11 }
  0x4f   : > { %p4317_p9 = pneg %p4316_p7 }
  0x51   : > { %p4324_p2 = pnand %p4323_p1, %p4317_p9 }
  0x53   : > { %4327 = shalt.err (!%p4324_p2)
}
  0x54   : > { %4129 = dma.hbm_to_vmem [thread:$0]  (!%p4653_p10), %s6284_s4, 18432, %s4657_s22, [#allocation10], %s6168_s25, %s6168_s25, %s6170_s26  }
  0x55   : > { %s6285_s6 = sld [smem:[#allocation88_spill]] }
  0x5b   : > { %s4328_s14 = scalar_lea.hbm %s6285_s6, 2048 }
  0x5c   : > { %p4329_p6 = scmp.ne.s32.totalorder %s6285_s6, %s4328_s14  ;;  %p4335_p5 = scmp.lt.u32.totalorder %s4328_s14, %s6285_s6 }
  0x5e   : > { %p4331_p0 = pnand %p4329_p6, %p4669_p12 }
  0x60   : > { %p4332_p3 = pneg %p4331_p0 }
  0x62   : > { %p4337_p7 = pnand %p4335_p5, %p4332_p3 }
  0x64   : > { %4340 = shalt.err (!%p4337_p7)
}
  0x65   : > { %s4341_s19 = scalar_lea.vmem %s306_s24, 2048  ;;  %p4349_p1 = scmp.lt.s32.totalorder %s306_s24, %s306_s24 }
  0x66   : > { %p4342_p9 = scmp.ne.s32.totalorder %s306_s24, %s4341_s19  ;;  %p4350_p2 = scmp.lt.s32.totalorder %s4341_s19, %s4341_s19 }
  0x68   : > { %p4344_p11 = pnand %p4342_p9, %p4669_p12  ;;  %p4351_p4 = por %p4350_p2, %p4349_p1 }
  0x6a   : > { %p4345_p13 = pneg %p4344_p11 }
  0x6c   : > { %p4352_p8 = pnand %p4351_p4, %p4345_p13 }
  0x6e   : > { %4355 = shalt.err (!%p4352_p8)
}
  0x6f   : > { %4132 = dma.hbm_to_vmem [thread:$0]  (!%p4653_p10), %s6285_s6, 2048, %s306_s24, [#allocation10], %s6168_s25, %s6168_s25, %s6170_s26  }
  0x70   : > { %s37_s27 = sadd.s32 1, %s4518_s10  ;;  %s40_s20 = sadd.s32 1, %s4522_s11 }
  0x71   : > { %p38_p4 = scmp.ge.s32.totalorder %s37_s27, 2  ;;  %s2961_s7 = sshll.u32 %s4522_s11, 1 }
  0x72   : > { %s51_s8 = sadd.s32 1, %s4506_s29  ;;  %s4749_s9 = sadd.s32 %s4518_s10, %s2961_s7 }
  0x73   : > { %s6599_s27 = smov (%p38_p4, %s37_s27), 0  ;;  %s6601_s20 = smov (!%p38_p4, %s40_s20), %s4522_s11 }
  0x74   : > { %6286 = sst [smem:[#allocation21_spill]] %s6599_s27  ;;  %p58_p8 = scmp.ne.s32.totalorder %s4506_s29, %s4502_s28 }
  0x75   : > { %p42_p12 = scmp.ge.s32.totalorder %s6601_s20, 2  ;;  %p59_p6 = scmp.eq.s32.totalorder %s4526_s12, 0 }
  0x76   : > { %p6287_p0 = scmp.eq.s32.totalorder %s4624_s13, 3  ;;  %p4147_p3 = scmp.lt.s32.totalorder %s4526_s12, 4 }
  0x77   : > { %s6603_s20 = smov (%p42_p12, %s6601_s20), 0  ;;  %p4763_p5 = por %p59_p6, %p58_p8 }
  0x78   : > { %p4756_p10 = por %p6287_p0, %p58_p8  ;;  %6289 = sst [smem:[#allocation22_spill]] %s6603_s20 }
  0x79   : > { %s4768_s18 = sand.u32 1, %s4506_s29   ;;  %s2962_s21 = sshll.u32 %s6603_s20, 1 }
  0x7a   : > { %s47_s23 = sadd.s32 %s2962_s21, %s6599_s27  ;;  %s2972_s16 = sshll.u32 %s4768_s18, 7 }
  0x7b   : > { %s48_s19 = ssub.s32 %s4749_s9, %s47_s23  ;;  %s2996_s22 = sshll.u32 %s4749_s9, 11 }
  0x7c   : > { %p49_p7 = scmp.eq.s32.totalorder %s48_s19, 0  ;;  %s6291_s0 = sld [smem:[#allocation84_spill]] }
  0x7d   : > { %s326_s26 = scalar_lea.vmem [#allocation3], %s2972_s16  ;;  %p4789_p9 = pnand %p4147_p3, %p4763_p5 }
  0x7e   : > { %s335_s2 = sshll.u32 %s326_s26, 4  ;;  %s2976_s19 = sshll.u32 %s4768_s18, 5  ;;  %s4783_s2 = int_to_ptr.vmem [resolvable:$true] %s335_s2 }
  0x7f   : > { %s4781_s4 = scalar_select %p49_p7, %s4506_s29, %s51_s8  }
  0x80   : > { %p4358_p13 = pneg %p4789_p9 }
  0x82   : > { %s4778_s25 = scalar_lea.hbm %s6291_s0, %s2996_s22  ;;  %s323_s22 = scalar_lea.sflag [#allocation4], %s4768_s18 }
  0x83   : > { %s4356_s5 = scalar_lea.hbm %s4778_s25, 2048  ;;  %s4361_s14 = scalar_lea.hbm %s6291_s0, 8192 }
  0x84   : > { %p4357_p11 = scmp.ne.s32.totalorder %s4778_s25, %s4356_s5  ;;  %p4362_p4 = scmp.lt.u32.totalorder %s4778_s25, %s6291_s0 }
  0x85   : > { %p4363_p8 = scmp.lt.u32.totalorder %s4361_s14, %s4356_s5  ;;  %p4365_p6 = scmp.lt.u32.totalorder %s4356_s5, %s4778_s25 }
  0x86   : > { %p4359_p1 = pnand %p4358_p13, %p4357_p11 }
  0x87   : > { %p4364_p12 = por %p4363_p8, %p4362_p4 }
  0x88   : > { %p4360_p2 = pneg %p4359_p1 }
  0x89   : > { %p4366_p0 = por %p4365_p6, %p4364_p12 }
  0x8b   : > { %p4367_p3 = pnand %p4366_p0, %p4360_p2 }
  0x8d   : > { %4370 = shalt.err (!%p4367_p3)
}
  0x8e   : > { %s4371_s23 = scalar_lea.vmem %s4783_s2, 2048  ;;  %s4533_s26 = smov [#allocation3]  }
  0x8f   : > { %p4372_p5 = scmp.ne.s32.totalorder %s4783_s2, %s4371_s23  ;;  %s4376_s8 = sshll.u32 %s4533_s26, 4  ;;  %s4377_s8 = int_to_ptr.vmem [resolvable:$false] %s4376_s8 }
  0x90   : > { %s4378_s16 = scalar_lea.vmem %s4377_s8, 4096  ;;  %p4379_p1 = scmp.lt.s32.totalorder %s4783_s2, %s4377_s8 }
  0x91   : > { %p4374_p7 = pnand %p4372_p5, %p4358_p13  ;;  %p4380_p4 = scmp.lt.s32.totalorder %s4378_s16, %s4371_s23 }
  0x93   : > { %p4375_p11 = pneg %p4374_p7  ;;  %p4381_p8 = por %p4380_p4, %p4379_p1 }
  0x95   : > { %p4382_p12 = pnand %p4381_p8, %p4375_p11 }
  0x97   : > { %4385 = shalt.err (!%p4382_p12)
}
  0x98   : > { %s6293_s5 = smov 8   ;;  %s6294_s14 = smov 128  }
  0x99   : > { %4136 = dma.hbm_to_vmem [thread:$0]  (!%p4789_p9), %s4778_s25, 2048, %s4783_s2, %s323_s22, %s6294_s14, %s6294_s14, %s6293_s5  }
  0x9a   : > { %s2997_s7 = sshll.u32 %s4749_s9, 9  ;;  %s349_s16 = scalar_lea.vmem [#allocation6], %s2976_s19 }
  0x9b   : > { %s4830_s8 = scalar_lea.hbm %s6154_s1, %s2997_s7  ;;  %s358_s0 = sshll.u32 %s349_s16, 4  ;;  %s4834_s0 = int_to_ptr.vmem [resolvable:$true] %s358_s0 }
  0x9c   : > { %s6295_s6 = sand.u32 1, %s4526_s12   ;;  %s4386_s27 = scalar_lea.hbm %s4830_s8, 512 }
  0x9d   : > { %s4838_s20 = scalar_lea.sflag [#allocation7], %s6295_s6  ;;  %p4387_p2 = scmp.ne.s32.totalorder %s4830_s8, %s4386_s27 }
  0x9e   : > { %s4391_s9 = scalar_lea.hbm %s6154_s1, 2048  ;;  %p4392_p3 = scmp.lt.u32.totalorder %s4830_s8, %s6154_s1 }
  0x9f   : > { %p4389_p6 = pnand %p4387_p2, %p4358_p13  ;;  %p4393_p5 = scmp.lt.u32.totalorder %s4391_s9, %s4386_s27 }
  0xa0   : > { %p4395_p11 = scmp.lt.u32.totalorder %s4386_s27, %s4830_s8 }
  0xa1   : > { %p4390_p0 = pneg %p4389_p6  ;;  %p4394_p7 = por %p4393_p5, %p4392_p3 }
  0xa3   : > { %p4396_p1 = por %p4395_p11, %p4394_p7 }
  0xa5   : > { %p4397_p4 = pnand %p4396_p1, %p4390_p0 }
  0xa7   : > { %4400 = shalt.err (!%p4397_p4)
}
  0xa8   : > { %s4401_s6 = scalar_lea.vmem %s4834_s0, 512  ;;  %s4534_s19 = smov [#allocation6]  }
  0xa9   : > { %p4402_p8 = scmp.ne.s32.totalorder %s4834_s0, %s4401_s6  ;;  %s4406_s7 = sshll.u32 %s4534_s19, 4  ;;  %s4407_s7 = int_to_ptr.vmem [resolvable:$false] %s4406_s7 }
  0xaa   : > { %s4408_s26 = scalar_lea.vmem %s4407_s7, 1024  ;;  %p4409_p6 = scmp.lt.s32.totalorder %s4834_s0, %s4407_s7 }
  0xab   : > { %p4404_p12 = pnand %p4402_p8, %p4358_p13  ;;  %p4410_p3 = scmp.lt.s32.totalorder %s4408_s26, %s4401_s6 }
  0xad   : > { %p4405_p2 = pneg %p4404_p12  ;;  %p4411_p5 = por %p4410_p3, %p4409_p6 }
  0xaf   : > { %p4412_p7 = pnand %p4411_p5, %p4405_p2 }
  0xb1   : > { %4415 = shalt.err (!%p4412_p7)
}
  0xb2   : > { %4139 = dma.hbm_to_vmem [thread:$0]  (!%p4789_p9), %s4830_s8, 512, %s4834_s0, %s4838_s20, %s6294_s14, %s6294_s14, %s6293_s5  }
  0xb3   : > { %p6296_p13 = scmp.ne.s32.totalorder %s6280_s17, 0 }
  0xb5   : > { %370 = sbr.rel (%p6296_p13) target bundleno = 1095 (0x447), region = 52 }
  0xbc   : > { %s4870_s27 = sand.u32 1, %s4502_s28   ;;  %p6297_p0 = scmp.ne.s32.totalorder %s6277_s15, 0 }
  0xbd   : > { %s2981_s23 = sshll.u32 %s4870_s27, 7  ;;  %s373_s16 = scalar_lea.sflag [#allocation4], %s4870_s27 }
  0xbe   : > { %s4876_s21 = scalar_lea.vmem [#allocation3], %s2981_s23 }
  0xbf   : > { %4477 = dma.done.wait (%p6297_p0), %s373_s16, 2048  }
  0xc0   : > { %4479 = vsyncadd (%p6297_p0), %s373_s16, 4294965248  ;;  %s381_s0 = sand.u32 1, %s4624_s13   ;;  %s2982_s17 = sshll.u32 %s4870_s27, 5 }
  0xc1   : > { %s382_s20 = scalar_lea.sflag [#allocation7], %s381_s0  ;;  %s4884_s5 = scalar_lea.vmem [#allocation6], %s2982_s17 }
  0xc2   : > { %4481 = dma.done.wait (%p6297_p0), %s382_s20, 512  }
  0xc3   : > { %4483 = vsyncadd (%p6297_p0), %s382_s20, 4294966784  ;;  %p6298_p9 = scmp.eq.s32.totalorder %s4624_s13, 0 }
  0xc5   : > { %4485 = dma.done.wait (%p6298_p9), [#allocation7], 2048   ;;  %p6299_p11 = pmov %p6298_p9 }
  0xc6   : > { %p6300_p1 = pmov %p6298_p9 }
  0xc7   : > { %4487 = vsyncadd (%p6299_p11), [#allocation7], 4294965248 }
  0xc8   : > { %4489 = dma.done.wait (%p6300_p1), [#allocation10], 20480   ;;  %p6301_p4 = pmov %p6300_p1 }
  0xc9   : > { %v457_v0 = vld [vmem:[#allocation8] sm:$0xff]  ;;  %v458_v1 = vld [vmem:[#allocation8 + $0x8] sm:$0xff]  ;;  %v459_v2 = vld [vmem:[#allocation8 + $0x10] sm:$0xff]  ;;  %p734_p8 = scmp.gt.s32.totalorder %s4510_s30, 0  ;;  %p740_p12 = scmp.lt.s32.totalorder %s4510_s30, 1  ;;  %vm6219_vm1 = vcmask 1046528  }
  0xca   : > { %4491 = vsyncadd (%p6301_p4), [#allocation10], 4294946816  ;;  %v3737_v3 = vpack.c.bf16 %v458_v1, %v457_v0  ;;  %v460_v4 = vld [vmem:[#allocation8 + $0x18] sm:$0xff]  ;;  %v461_v6 = vld [vmem:[#allocation8 + $0x20] sm:$0xff]  ;;  %vm1132_vm2 = vcmask 1040384   ;;  %s6582_s9 = sld [smem:[#allocation87_spill]] }
  0xcb   : > { %v3741_v5 = vpack.c.bf16 %v460_v4, %v459_v2  ;;  %v462_v7 = vld [vmem:[#allocation8 + $0x28] sm:$0xff]  ;;  %v441_v9 = vld [vmem:[%s4876_s21] sm:$0xff]  ;;  %v463_v11 = vld [vmem:[#allocation8 + $0x30] sm:$0xff]  ;;  %s4927_s13 = scalar_select %p734_p8, 1, 0 }
  0xcc   : > { %3738 = vmatprep.subr.bf16.mxu0 %v3737_v3  ;;  %3770 = vmatprep.subr.bf16.mxu1 %v3737_v3  ;;  %v3745_v8 = vpack.c.bf16 %v462_v7, %v461_v6  ;;  %v641_v10 = vld [vmem:[%s4884_s5] sm:$0xff]  ;;  %v464_v12 = vld [vmem:[#allocation8 + $0x38] sm:$0xff]  ;;  %v466_v15 = vld [vmem:[#allocation8 + $0x48] sm:$0xff]  ;;  %s4966_s15 = scalar_select %p740_p12, 1, 0 }
  0xcd   : > { %3740 = vmatpush3.bf16.msra.mxu0 %v3737_v3  ;;  %3772 = vmatpush3.bf16.msra.mxu1 %v3737_v3  ;;  %v3749_v13 = vpack.c.bf16 %v464_v12, %v463_v11  ;;  %v465_v14 = vld [vmem:[#allocation8 + $0x40] sm:$0xff]  ;;  %v467_v17 = vld [vmem:[#allocation8 + $0x50] sm:$0xff]  ;;  %v468_v18 = vld [vmem:[#allocation8 + $0x58] sm:$0xff]  ;;  %s6583_s6 = sld [smem:[#allocation89_spill]]  ;;  %s6049_s19 = scalar_lea.vmem [#allocation12], %s2981_s23 }
  0xce   : > { %3742 = vmatprep.subr.bf16.mxu0 %v3741_v5  ;;  %3774 = vmatprep.subr.bf16.mxu1 %v3741_v5  ;;  %v3753_v16 = vpack.c.bf16 %v466_v15, %v465_v14  ;;  %v3757_v19 = vpack.c.bf16 %v468_v18, %v467_v17  ;;  %v469_v20 = vld [vmem:[#allocation8 + $0x60] sm:$0xff]  ;;  %v470_v21 = vld [vmem:[#allocation8 + $0x68] sm:$0xff]  ;;  %v471_v23 = vld [vmem:[#allocation8 + $0x70] sm:$0xff]  ;;  %s6584_s7 = sld [smem:[#allocation19_spill]]  ;;  %s2818_s0 = sshll.u32 %s6049_s19, 4  ;;  %s6097_s0 = int_to_ptr.vmem [resolvable:$true] %s2818_s0 }
  0xcf   : > { %3451 = vmatprep.mubr.f32.mxu0 %v441_v9  ;;  %3507 = vmatprep.mubr.f32.mxu1 %v641_v10  ;;  %v3761_v22 = vpack.c.bf16 %v470_v21, %v469_v20  ;;  %v472_v24 = vld [vmem:[#allocation8 + $0x78] sm:$0xff]  ;;  %v1517_v26 = vld [vmem:[#allocation9 + $0x200] sm:$0xff]  ;;  %v1518_v27 = vld [vmem:[#allocation9 + $0x208] sm:$0xff]  ;;  %s6585_s20 = sld [smem:[#allocation90_spill]] }
  0xd0   : > { %v3765_v25 = vpack.c.bf16 %v472_v24, %v471_v23  ;;  %v1533_v28 = vld [vmem:[#allocation9 + $0x280] sm:$0xff]  ;;  %v1534_v29 = vld [vmem:[#allocation9 + $0x288] sm:$0xff]  ;;  %v3801_v30 = vpack.c.bf16 %v1518_v27, %v1517_v26  ;;  %v1519_v34 = vld [vmem:[#allocation9 + $0x210] sm:$0xff] }
  0xd1   : > { %3744 = vmatpush3.bf16.msra.mxu0 %v3741_v5  ;;  %3776 = vmatpush3.bf16.msra.mxu1 %v3741_v5  ;;  %v3833_v31 = vpack.c.bf16 %v1534_v29, %v1533_v28  ;;  %v1501_v32 = vld [vmem:[#allocation9 + $0x180] sm:$0xff]  ;;  %v1502_v33 = vld [vmem:[#allocation9 + $0x188] sm:$0xff]  ;;  %v1520_v35 = vld [vmem:[#allocation9 + $0x218] sm:$0xff] }
  0xd2   : > { %3746 = vmatprep.subr.bf16.mxu0 %v3745_v8  ;;  %3778 = vmatprep.subr.bf16.mxu1 %v3745_v8  ;;  %v442_v36 = vld [vmem:[%s4876_s21 + $0x8] sm:$0xff]  ;;  %v443_v38 = vld [vmem:[%s4876_s21 + $0x10] sm:$0xff]  ;;  %v3803_v40 = vpack.c.bf16 %v1502_v33, %v1501_v32  ;;  %v3805_v41 = vpack.c.bf16 %v1520_v35, %v1519_v34  ;;  %v1504_v43 = vld [vmem:[#allocation9 + $0x198] sm:$0xff] }
  0xd3   : > { %v642_v37 = vld [vmem:[%s4884_s5 + $0x8] sm:$0xff]  ;;  %v643_v39 = vld [vmem:[%s4884_s5 + $0x10] sm:$0xff]  ;;  %v444_v44 = vld [vmem:[%s4876_s21 + $0x18] sm:$0xff] }
  0xd4   : > { %v1503_v42 = vld [vmem:[#allocation9 + $0x190] sm:$0xff]  ;;  %v644_v45 = vld [vmem:[%s4884_s5 + $0x18] sm:$0xff]  ;;  %v445_v46 = vld [vmem:[%s4876_s21 + $0x20] sm:$0xff]  ;;  %s2991_s26 = sshll.u32 %s6584_s7, 1 }
  0xd5   : > { %3748 = vmatpush3.bf16.msra.mxu0 %v3745_v8  ;;  %3780 = vmatpush3.bf16.msra.mxu1 %v3745_v8  ;;  %v3807_v47 = vpack.c.bf16 %v1504_v43, %v1503_v42  ;;  %v446_v48 = vld [vmem:[%s4876_s21 + $0x28] sm:$0xff]  ;;  %v447_v49 = vld [vmem:[%s4876_s21 + $0x30] sm:$0xff]  ;;  %v448_v50 = vld [vmem:[%s4876_s21 + $0x38] sm:$0xff]  ;;  %s2811_s23 = sadd.s32 %s4510_s30, %s2991_s26 }
  0xd6   : > { %3750 = vmatprep.subr.bf16.mxu0 %v3749_v13  ;;  %3782 = vmatprep.subr.bf16.mxu1 %v3749_v13  ;;  %v449_v51 = vld [vmem:[%s4876_s21 + $0x40] sm:$0xff]  ;;  %v450_v52 = vld [vmem:[%s4876_s21 + $0x48] sm:$0xff]  ;;  %v451_v53 = vld [vmem:[%s4876_s21 + $0x50] sm:$0xff]  ;;  %s2998_s16 = sshll.u32 %s2811_s23, 11 }
  0xd7   : > { %v452_v54 = vld [vmem:[%s4876_s21 + $0x58] sm:$0xff]  ;;  %v453_v55 = vld [vmem:[%s4876_s21 + $0x60] sm:$0xff]  ;;  %v454_v56 = vld [vmem:[%s4876_s21 + $0x68] sm:$0xff]  ;;  %s6095_s5 = scalar_lea.hbm %s6585_s20, %s2998_s16 }
  0xd8   : > { %v455_v57 = vld [vmem:[%s4876_s21 + $0x70] sm:$0xff]  ;;  %v456_v58 = vld [vmem:[%s4876_s21 + $0x78] sm:$0xff]  ;;  %v1521_v61 = vld [vmem:[#allocation9 + $0x220] sm:$0xff] }
  0xd9   : > { %3752 = vmatpush3.bf16.msra.mxu0 %v3749_v13  ;;  %3784 = vmatpush3.bf16.msra.mxu1 %v3749_v13  ;;  %v1535_v59 = vld [vmem:[#allocation9 + $0x290] sm:$0xff]  ;;  %v1536_v60 = vld [vmem:[#allocation9 + $0x298] sm:$0xff]  ;;  %v1522_v63 = vld [vmem:[#allocation9 + $0x228] sm:$0xff] }
  0xda   : > { %3754 = vmatprep.subr.bf16.mxu0 %v3753_v16  ;;  %3786 = vmatprep.subr.bf16.mxu1 %v3753_v16  ;;  %v3837_v62 = vpack.c.bf16 %v1536_v60, %v1535_v59  ;;  %v1505_v0 = vld [vmem:[#allocation9 + $0x1a0] sm:$0xff]  ;;  %v1506_v1 = vld [vmem:[#allocation9 + $0x1a8] sm:$0xff]  ;;  %v3809_v2 = vpack.c.bf16 %v1522_v63, %v1521_v61  ;;  %v1523_v6 = vld [vmem:[#allocation9 + $0x230] sm:$0xff] }
  0xdb   : > { %v3811_v3 = vpack.c.bf16 %v1506_v1, %v1505_v0  ;;  %v1537_v4 = vld [vmem:[#allocation9 + $0x2a0] sm:$0xff]  ;;  %v1538_v5 = vld [vmem:[#allocation9 + $0x2a8] sm:$0xff]  ;;  %v1524_v8 = vld [vmem:[#allocation9 + $0x238] sm:$0xff] }
  0xdc   : > { %v3841_v7 = vpack.c.bf16 %v1538_v5, %v1537_v4  ;;  %v1507_v9 = vld [vmem:[#allocation9 + $0x1b0] sm:$0xff]  ;;  %v1508_v10 = vld [vmem:[#allocation9 + $0x1b8] sm:$0xff]  ;;  %v3813_v11 = vpack.c.bf16 %v1524_v8, %v1523_v6  ;;  %v1525_v15 = vld [vmem:[#allocation9 + $0x240] sm:$0xff] }
  0xdd   : > { %3756 = vmatpush3.bf16.msra.mxu0 %v3753_v16  ;;  %3788 = vmatpush3.bf16.msra.mxu1 %v3753_v16  ;;  %v3815_v12 = vpack.c.bf16 %v1508_v10, %v1507_v9  ;;  %v1539_v13 = vld [vmem:[#allocation9 + $0x2b0] sm:$0xff]  ;;  %v1540_v14 = vld [vmem:[#allocation9 + $0x2b8] sm:$0xff]  ;;  %v1526_v17 = vld [vmem:[#allocation9 + $0x248] sm:$0xff] }
  0xde   : > { %3758 = vmatprep.subr.bf16.mxu0 %v3757_v19  ;;  %3790 = vmatprep.subr.bf16.mxu1 %v3757_v19  ;;  %v3845_v16 = vpack.c.bf16 %v1540_v14, %v1539_v13  ;;  %v1509_v18 = vld [vmem:[#allocation9 + $0x1c0] sm:$0xff]  ;;  %v3817_v20 = vpack.c.bf16 %v1526_v17, %v1525_v15  ;;  %v1542_v23 = vld [vmem:[#allocation9 + $0x2c8] sm:$0xff]  ;;  %v1527_v24 = vld [vmem:[#allocation9 + $0x250] sm:$0xff]  ;;  %v736_v14 = vstv %s4927_s13  ;;  %s4416_s13 = scalar_lea.vmem %s6097_s0, 2048 }
  0xdf   : > { %v1528_v26 = vld [vmem:[#allocation9 + $0x258] sm:$0xff]  ;;  %v1511_v27 = vld [vmem:[#allocation9 + $0x1d0] sm:$0xff]  ;;  %v1529_v34 = vld [vmem:[#allocation9 + $0x260] sm:$0xff]  ;;  %vm5051_vm0 = vcmp.eq.s32.totalorder %v736_v14, 1  ;;  %p4417_p2 = scmp.ne.s32.totalorder %s6097_s0, %s4416_s13 }
  0xe0   : > { %v1512_v28 = vld [vmem:[#allocation9 + $0x1d8] sm:$0xff]  ;;  %v3821_v29 = vpack.c.bf16 %v1528_v26, %v1527_v24  ;;  %v1530_v35 = vld [vmem:[#allocation9 + $0x268] sm:$0xff]  ;;  %v1531_v42 = vld [vmem:[#allocation9 + $0x270] sm:$0xff] }
  0xe1   : > { %3760 = vmatpush3.bf16.msra.mxu0 %v3757_v19  ;;  %3792 = vmatpush3.bf16.msra.mxu1 %v3757_v19  ;;  %v1510_v19 = vld [vmem:[#allocation9 + $0x1c8] sm:$0xff]  ;;  %v1544_v32 = vld [vmem:[#allocation9 + $0x2d8] sm:$0xff]  ;;  %v4936_v0 = vld [vmem:[#allocation9] sm:$0xff]  ;;  %p4418_p6 = pnand %p4417_p2, %p4756_p10 }
  0xe2   : > { %3762 = vmatprep.subr.bf16.mxu0 %v3761_v22  ;;  %3794 = vmatprep.subr.bf16.mxu1 %v3761_v22  ;;  %v3819_v21 = vpack.c.bf16 %v1510_v19, %v1509_v18  ;;  %v4943_v4 = vld [vmem:[#allocation9 + $0x8] sm:$0xff]  ;;  %v4945_v5 = vld [vmem:[#allocation9 + $0x90] sm:$0xff]  ;;  %v4947_v6 = vld [vmem:[#allocation9 + $0x98] sm:$0xff] }
  0xe3   : > { %v4953_v9 = vld [vmem:[#allocation9 + $0x10] sm:$0xff]  ;;  %v4955_v10 = vld [vmem:[#allocation9 + $0x18] sm:$0xff]  ;;  %v4968_v15 = vld [vmem:[#allocation9 + $0xa8] sm:$0xff]  ;;  %p4419_p3 = pneg %p4418_p6 }
  0xe4   : > { %v4972_v17 = vld [vmem:[#allocation9 + $0x28] sm:$0xff]  ;;  %v4987_v24 = vld [vmem:[#allocation9 + $0x30] sm:$0xff]  ;;  %v5069_v14 = vld [vmem:[#allocation9 + $0x3a0] sm:$0xff] }
  0xe5   : > { %3764 = vmatpush3.bf16.msra.mxu0 %v3761_v22  ;;  %3796 = vmatpush3.bf16.msra.mxu1 %v3761_v22  ;;  %v1541_v22 = vld [vmem:[#allocation9 + $0x2c0] sm:$0xff]  ;;  %6304 = vst [vmem:[#allocation25_spill] sm:$0xff] %v4972_v17  ;;  %6307 = vst [vmem:[#allocation28_spill] sm:$0xff] %v4987_v24  ;;  %v5061_v13 = vld [vmem:[#allocation9 + $0x390] sm:$0xff]  ;;  %v6335_v24 = vmov 0  ;;  %v6342_v17 = vstv %s4966_s15  ;;  %s4535_s15 = smov [#allocation12]  }
  0xe6   : > { %3766 = vmatprep.subr.bf16.mxu0 %v3765_v25  ;;  %3798 = vmatprep.subr.bf16.mxu1 %v3765_v25  ;;  %v5071_v26 = vld [vmem:[#allocation9 + $0x3a8] sm:$0xff]  ;;  %v5096_v8 = vld [vmem:[#allocation9 + $0x3b8] sm:$0xff]  ;;  %vm5170_vm4 = vcmp.eq.s32.totalorder %v6342_v17, 1  ;;  %s4420_s14 = sshll.u32 %s4535_s15, 4  ;;  %s4421_s14 = int_to_ptr.vmem [resolvable:$false] %s4420_s14 }
  0xe7   : > { %s4422_s8 = scalar_lea.vmem %s4421_s14, 4096  ;;  %p4423_p5 = scmp.lt.s32.totalorder %s6097_s0, %s4421_s14 }
  0xe8   : > { %p4424_p7 = scmp.lt.s32.totalorder %s4422_s8, %s4416_s13 }
  0xe9   : > { %3768 = vmatpush3.bf16.msra.mxu0 %v3765_v25  ;;  %3800 = vmatpush3.bf16.msra.mxu1 %v3765_v25  ;;  %v3849_v25 = vpack.c.bf16 %v1542_v23, %v1541_v22  ;;  %v4982_v22 = vld [vmem:[#allocation9 + $0xb8] sm:$0xff] }
  0xea   : > { %3802 = vmatprep.subr.bf16.mxu0 %v3801_v30  ;;  %3834 = vmatprep.subr.bf16.mxu1 %v3833_v31  ;;  %v3823_v30 = vpack.c.bf16 %v1512_v28, %v1511_v27  ;;  %6306 = vst [vmem:[#allocation27_spill] sm:$0xff] %v4982_v22  ;;  %v5067_v27 = vld [vmem:[#allocation9 + $0x318] sm:$0xff]  ;;  %v5084_v28 = vld [vmem:[#allocation9 + $0x328] sm:$0xff]  ;;  %v5161_v22 = vld [vmem:[#allocation9 + $0x360] sm:$0xff]  ;;  %p4425_p13 = por %p4424_p7, %p4423_p5 }
  0xeb   : > { %6340 = vst [vmem:[#allocation56_spill] sm:$0xff] %v5161_v22 }
  0xec   : > { %3452 = vmatmul.mubr.f32.vlgmr.msra.gmra.mrb[0].mxu0 %v442_v36  ;;  %3508 = vmatmul.mubr.f32.vlgmr.msra.gmra.mrb[0].mxu1 %v642_v37  ;;  %v1513_v36 = vld [vmem:[#allocation9 + $0x1e0] sm:$0xff]  ;;  %v3825_v37 = vpack.c.bf16 %v1530_v35, %v1529_v34  ;;  %v5086_v34 = vld [vmem:[#allocation9 + $0x3b0] sm:$0xff]  ;;  %p4426_p0 = pnand %p4425_p13, %p4419_p3 }
  0xed   : > { %3454 = vmatprep.mubr.f32.mxu0 %v443_v38  ;;  %3510 = vmatprep.mubr.f32.mxu1 %v643_v39  ;;  %v1514_v38 = vld [vmem:[#allocation9 + $0x1e8] sm:$0xff]  ;;  %v5009_v35 = vld [vmem:[#allocation9 + $0x40] sm:$0xff] }
  0xee   : > { %3804 = vmatpush3.bf16.msra.mxu0 %v3803_v40  ;;  %3836 = vmatpush3.bf16.msra.mxu1 %v3833_v31  ;;  %v1543_v31 = vld [vmem:[#allocation9 + $0x2d0] sm:$0xff]  ;;  %v3827_v39 = vpack.c.bf16 %v1514_v38, %v1513_v36  ;;  %v1545_v40 = vld [vmem:[#allocation9 + $0x2e0] sm:$0xff]  ;;  %6311 = vst [vmem:[#allocation32_spill] sm:$0xff] %v5009_v35  ;;  %v5011_v36 = vld [vmem:[#allocation9 + $0x48] sm:$0xff] }
  0xef   : > { %3806 = vmatprep.subr.bf16.mxu0 %v3805_v41  ;;  %3838 = vmatprep.subr.bf16.mxu1 %v3837_v62  ;;  %v3853_v33 = vpack.c.bf16 %v1544_v32, %v1543_v31  ;;  %v1546_v41 = vld [vmem:[#allocation9 + $0x2e8] sm:$0xff]  ;;  %6312 = vst [vmem:[#allocation33_spill] sm:$0xff] %v5011_v36  ;;  %v5114_v35 = vld [vmem:[#allocation9 + $0x340] sm:$0xff] }
  0xf0   : > { %3455 = vmatmul.mubr.f32.gmra.mrb[2].mxu0 %v444_v44  ;;  %3511 = vmatmul.mubr.f32.gmra.mrb[2].mxu1 %v644_v45  ;;  %v3857_v43 = vpack.c.bf16 %v1546_v41, %v1545_v40  ;;  %v1532_v44 = vld [vmem:[#allocation9 + $0x278] sm:$0xff]  ;;  %v1515_v45 = vld [vmem:[#allocation9 + $0x1f0] sm:$0xff]  ;;  %v5001_v31 = vld [vmem:[#allocation9 + $0xc8] sm:$0xff]  ;;  %6329 = vst [vmem:[#allocation48_spill] sm:$0xff] %v5114_v35 }
  0xf1   : > { %3457 = vmatprep.mubr.f32.mxu0 %v445_v46  ;;  %v1516_v46 = vld [vmem:[#allocation9 + $0x1f8] sm:$0xff]  ;;  %6310 = vst [vmem:[#allocation31_spill] sm:$0xff] %v5001_v31 }
  0xf2   : > { %3808 = vmatpush3.bf16.msra.mxu0 %v3807_v47  ;;  %3840 = vmatpush3.bf16.msra.mxu1 %v3837_v62  ;;  %v3829_v47 = vpack.c.bf16 %v1532_v44, %v1531_v42  ;;  %v5022_v41 = vld [vmem:[#allocation9 + $0xd8] sm:$0xff]  ;;  %v5082_v42 = vld [vmem:[#allocation9 + $0x320] sm:$0xff] }
  0xf3   : > { %3810 = vmatprep.subr.bf16.mxu0 %v3809_v2  ;;  %3842 = vmatprep.subr.bf16.mxu1 %v3841_v7  ;;  %6314 = vst [vmem:[#allocation35_spill] sm:$0xff] %v5022_v41  ;;  %v5027_v44 = vld [vmem:[#allocation9 + $0x58] sm:$0xff]  ;;  %v5112_v41 = vld [vmem:[#allocation9 + $0x3c8] sm:$0xff] }
  0xf4   : > { %3458 = vmatmul.mubr.f32.gmra.mrb[4].mxu0 %v446_v48  ;;  %v3831_v48 = vpack.c.bf16 %v1516_v46, %v1515_v45  ;;  %6316 = vst [vmem:[#allocation37_spill] sm:$0xff] %v5027_v44  ;;  %6328 = vst [vmem:[#allocation47_spill] sm:$0xff] %v5112_v41  ;;  %v5129_v44 = vld [vmem:[#allocation2 + $0x200] sm:$0x1] }
  0xf5   : > { %3460 = vmatprep.mubr.f32.mxu0 %v447_v49  ;;  %v1547_v49 = vld [vmem:[#allocation9 + $0x2f0] sm:$0xff]  ;;  %6333 = vst [vmem:[#allocation52_spill] sm:$0xff] %v5129_v44 }
  0xf6   : > { %3812 = vmatpush3.bf16.msra.mxu0 %v3811_v3  ;;  %3844 = vmatpush3.bf16.msra.mxu1 %v3841_v7  ;;  %v5178_v41 = vld [vmem:[#allocation9 + $0x3f0] sm:$0xff] }
  0xf7   : > { %3814 = vmatprep.subr.bf16.mxu0 %v3813_v11  ;;  %3846 = vmatprep.subr.bf16.mxu1 %v3845_v16  ;;  %v4957_v11 = vld [vmem:[#allocation9 + $0xa0] sm:$0xff]  ;;  %6345 = vst [vmem:[#allocation58_spill] sm:$0xff] %v5178_v41 }
  0xf8   : > { %3461 = vmatmul.mubr.f32.gmra.mrb[6].mxu0 %v448_v50  ;;  %v1548_v50 = vld [vmem:[#allocation9 + $0x2f8] sm:$0xff] }
  0xf9   : > { %3463 = vmatprep.mubr.f32.mxu0 %v449_v51  ;;  %v3861_v51 = vpack.c.bf16 %v1548_v50, %v1547_v49  ;;  %v5040_v50 = vld [vmem:[#allocation9 + $0xe0] sm:$0xff]  ;;  %v5100_v49 = vld [vmem:[#allocation9 + $0x338] sm:$0xff] }
  0xfa   : > { %3816 = vmatpush3.bf16.msra.mxu0 %v3815_v12  ;;  %3848 = vmatpush3.bf16.msra.mxu1 %v3845_v16  ;;  %v4970_v16 = vld [vmem:[#allocation9 + $0x20] sm:$0xff]  ;;  %6318 = vst [vmem:[#allocation39_spill] sm:$0xff] %v5040_v50  ;;  %v5145_v50 = vld [vmem:[#allocation9 + $0x3d8] sm:$0xff] }
  0xfb   : > { %3818 = vmatprep.subr.bf16.mxu0 %v3817_v20  ;;  %3850 = vmatprep.subr.bf16.mxu1 %v3849_v25  ;;  %6303 = vst [vmem:[#allocation24_spill] sm:$0xff] %v4970_v16  ;;  %v5091_v20 = vld [vmem:[%s6156_s3] ss:$0 sm:$0xff]  ;;  %6338 = vst [vmem:[#allocation54_spill] sm:$0xff] %v5145_v50 }
  0xfc   : > { %3464 = vmatmul.mubr.f32.gmra.mrb[8].mxu0 %v450_v52  ;;  %v1463_v52 = vld [vmem:[#allocation9 + $0x80] sm:$0xff] }
  0xfd   : > { %3466 = vmatprep.mubr.f32.mxu0 %v451_v53  ;;  %v1464_v53 = vld [vmem:[#allocation9 + $0x88] sm:$0xff] }
  0xfe   : > { %3820 = vmatpush3.bf16.msra.mxu0 %v3819_v21  ;;  %3852 = vmatpush3.bf16.msra.mxu1 %v3849_v25  ;;  %v4980_v21 = vld [vmem:[#allocation9 + $0xb0] sm:$0xff] }
  0xff   : > { %3822 = vmatprep.subr.bf16.mxu0 %v3821_v29  ;;  %3854 = vmatprep.subr.bf16.mxu1 %v3853_v33  ;;  %6305 = vst [vmem:[#allocation26_spill] sm:$0xff] %v4980_v21  ;;  %v4997_v29 = vld [vmem:[#allocation9 + $0x38] sm:$0xff]  ;;  %v5157_v21 = vld [vmem:[#allocation9 + $0x3e0] sm:$0xff] }
 0x100   : > { %3467 = vmatmul.mubr.f32.gmra.mrb[10].mxu0 %v452_v54  ;;  %v3865_v54 = vpack.c.bf16 %v1464_v53, %v1463_v52  ;;  %6308 = vst [vmem:[#allocation29_spill] sm:$0xff] %v4997_v29  ;;  %v5045_v53 = vld [vmem:[#allocation9 + $0x300] sm:$0xff]  ;;  %v5098_v52 = vld [vmem:[#allocation9 + $0x330] sm:$0xff]  ;;  %6339 = vst [vmem:[#allocation55_spill] sm:$0xff] %v5157_v21  ;;  %v6351_v21 = vmov 0 }
 0x101   : > { %3469 = vmatprep.mubr.f32.mxu0 %v453_v55  ;;  %v2193_v55 = vld [vmem:[#allocation9 + $0x380] sm:$0xff]  ;;  %6325 = vst [vmem:[#allocation44_spill] sm:$0xff] %v5098_v52  ;;  %v5191_v52 = vld [vmem:[#allocation9 + $0x378] sm:$0xff] }
 0x102   : > { %3824 = vmatpush3.bf16.msra.mxu0 %v3823_v30  ;;  %3856 = vmatpush3.bf16.msra.mxu1 %v3853_v33  ;;  %v4999_v30 = vld [vmem:[#allocation9 + $0xc0] sm:$0xff]  ;;  %v5065_v33 = vld [vmem:[#allocation9 + $0x310] sm:$0xff]  ;;  %6349 = vst [vmem:[#allocation62_spill] sm:$0xff] %v5191_v52 }
 0x103   : > { %3826 = vmatprep.subr.bf16.mxu0 %v3825_v37  ;;  %3858 = vmatprep.subr.bf16.mxu1 %v3857_v43  ;;  %6309 = vst [vmem:[#allocation30_spill] sm:$0xff] %v4999_v30  ;;  %v5013_v37 = vld [vmem:[#allocation9 + $0xd0] sm:$0xff] }
 0x104   : > { %3470 = vmatmul.mubr.f32.gmra.mrb[12].mxu0 %v454_v56  ;;  %v2194_v56 = vld [vmem:[#allocation9 + $0x388] sm:$0xff]  ;;  %6313 = vst [vmem:[#allocation34_spill] sm:$0xff] %v5013_v37  ;;  %v5110_v37 = vld [vmem:[#allocation9 + $0x3c0] sm:$0xff] }
 0x105   : > { %3472 = vmatprep.mubr.f32.mxu0 %v455_v57  ;;  %v3929_v57 = vpack.c.bf16 %v2194_v56, %v2193_v55  ;;  %v5049_v55 = vld [vmem:[#allocation2 + $0x8] sm:$0x80]  ;;  %v6320_v56 = vmov 0  ;;  %6327 = vst [vmem:[#allocation46_spill] sm:$0xff] %v5110_v37  ;;  %v5176_v37 = vld [vmem:[#allocation9 + $0x368] sm:$0xff] }
 0x106   : > { %3828 = vmatpush3.bf16.msra.mxu0 %v3827_v39  ;;  %3860 = vmatpush3.bf16.msra.mxu1 %v3857_v43  ;;  %v5025_v43 = vld [vmem:[#allocation9 + $0x50] sm:$0xff]  ;;  %v6321_v56 = vsel %vm5051_vm0, 4294967295, %v6320_v56 }
 0x107   : > { %3830 = vmatprep.subr.bf16.mxu0 %v3829_v47  ;;  %3862 = vmatprep.subr.bf16.mxu1 %v3861_v51  ;;  %6315 = vst [vmem:[#allocation36_spill] sm:$0xff] %v5025_v43  ;;  %6322 = vst [vmem:[#allocation41_spill] sm:$0xff] %v6321_v56  ;;  %v5063_v47 = vld [vmem:[#allocation9 + $0x398] sm:$0xff]  ;;  %v5159_v43 = vld [vmem:[#allocation9 + $0x3e8] sm:$0xff] }
 0x108   : > { %3473 = vmatmul.mubr.f32.gmra.mrb[14].mxu0 %v456_v58  ;;  %v766_v58 = vlaneseq }
 0x10a   : > { %3832 = vmatpush3.bf16.msra.mxu0 %v3831_v48  ;;  %3864 = vmatpush3.bf16.msra.mxu1 %v3861_v51  ;;  %v4918_v59 = vshrl.u32 %v766_v58, 7  ;;  %v5042_v51 = vld [vmem:[#allocation9 + $0xe8] sm:$0xff]  ;;  %v5126_v58 = vld [vmem:[#allocation9 + $0x3d0] sm:$0xff] }
 0x10b   : > { %3866 = vmatprep.subr.bf16.mxu1 %v3865_v54  ;;  %3930 = vmatprep.subr.bf16.mxu0 %v3929_v57  ;;  %6319 = vst [vmem:[#allocation40_spill] sm:$0xff] %v5042_v51  ;;  %v5047_v54 = vld [vmem:[#allocation9 + $0x308] sm:$0xff]  ;;  %6332 = vst [vmem:[#allocation51_spill] sm:$0xff] %v5126_v58 }
 0x10c   : > { %v4922_v60 = vadd.s32 16, %v4918_v59  ;;  %v4925_v61 = vadd.s32 24, %v4918_v59  ;;  %v4930_v62 = vadd.s32 32, %v4918_v59  ;;  %v4933_v63 = vadd.s32 8, %v4918_v59  ;;  %v5124_v57 = vld [vmem:[#allocation9 + $0x348] sm:$0xff] }
 0x10d   : > { %v4939_v1 = vadd.s32 40, %v4918_v59  ;;  %v4950_v7 = vadd.s32 48, %v4918_v59  ;;  %v4960_v12 = vadd.s32 56, %v4918_v59  ;;  %v4975_v18 = vadd.s32 64, %v4918_v59  ;;  %6331 = vst [vmem:[#allocation50_spill] sm:$0xff] %v5124_v57 }
 0x10e   : > { %6302 = vst [vmem:[#allocation23_spill] sm:$0xff] %v4933_v63  ;;  %v4985_v23 = vadd.s32 72, %v4918_v59  ;;  %v4990_v25 = vadd.s32 80, %v4918_v59  ;;  %v5004_v32 = vadd.s32 88, %v4918_v59  ;;  %v5016_v38 = vadd.s32 104, %v4918_v59  ;;  %v5180_v63 = vld [vmem:[#allocation9 + $0x3f8] sm:$0xff] }
 0x10f   : > { %v5019_v39 = vadd.s32 96, %v4918_v59  ;;  %v5030_v45 = vadd.s32 136, %v4918_v59  ;;  %v5033_v46 = vadd.s32 112, %v4918_v59  ;;  %v5059_v48 = vadd.s32 120, %v4918_v59  ;;  %6346 = vst [vmem:[#allocation59_spill] sm:$0xff] %v5180_v63 }
 0x110   : > { %v5074_v19 = vadd.s32 128, %v4918_v59  ;;  %v5104_v40 = vadd.s32 144, %v4918_v59  ;;  %v5117_v3 = vadd.s32 152, %v4918_v59  ;;  %v6334_v31 = vand.u32 15, %v4922_v60  ;;  %v5147_v60 = vld [vmem:[#allocation9 + $0x350] sm:$0xff] }
 0x111   : > { %6317 = vst [vmem:[#allocation38_spill] sm:$0xff] %v5030_v45  ;;  %6323 = vst [vmem:[#allocation42_spill] sm:$0xff] %v5059_v48  ;;  %v5189_v45 = vld [vmem:[#allocation9 + $0x370] sm:$0xff]  ;;  %v6350_v17 = vand.u32 15, %v4925_v61  ;;  %v6355_v61 = vmov 0 }
 0x112   : > { %6324 = vst [vmem:[#allocation43_spill] sm:$0xff] %v5074_v19  ;;  %6326 = vst [vmem:[#allocation45_spill] sm:$0xff] %v5104_v40  ;;  %vm5133_vm3 = vcmp.ne.s32.totalorder %v6334_v31, 0  ;;  %v5149_v31 = vld [vmem:[#allocation9 + $0x358] sm:$0xff] }
 0x113   : > { %6330 = vst [vmem:[#allocation49_spill] sm:$0xff] %v5117_v3  ;;  %v6336_v24 = vsel %vm5133_vm3, 4294967295, %v6335_v24  ;;  %6348 = vst [vmem:[#allocation61_spill] sm:$0xff] %v5189_v45  ;;  %vm5218_vm5 = vcmp.ne.s32.totalorder %v6350_v17, 15  ;;  %v6364_v45 = vmov 0 }
 0x114   : > { %6337 = vst [vmem:[#allocation53_spill] sm:$0xff] %v6336_v24  ;;  %v6352_v21 = vsel %vm5218_vm5, 4294967295, %v6351_v21 }
 0x115   : > { %6353 = vst [vmem:[#allocation63_spill] sm:$0xff] %v6352_v21 }
 0x1bf   : > { %v3453_v51 = vpop.f32.mrb[0].mxu0  ;;  %v3509_v29 = vpop.f32.mrb[0].mxu1 }
 0x1c0   : > { %v552_v19 = vadd.f32 %v3453_v51, %v5091_v20  ;;  %v5166_v48 = vadd.f32 %v3509_v29, %v5091_v20  ;;  %v546_v36 = vpop.f32.mrb[1].mxu0  ;;  %v711_v16 = vpop.f32.mrb[1].mxu1 }
 0x1c1   : > { %v547_v29 = vadd.f32 %v5091_v20, %v546_v36  ;;  %v5185_v40 = vadd.f32 %v5091_v20, %v711_v16 }
 0x1c2   : > { %6341 = vst [vmem:[#allocation57_spill] sm:$0xff] %v5166_v48  ;;  %v5194_v35 = vmax.f32 %v552_v19, 0.0  ;;  %v6205_v57 = vmax.f32 %v5166_v48, 0.0 }
 0x1c3   : > { %6347 = vst [vmem:[#allocation60_spill] sm:$0xff] %v5185_v40  ;;  %v5201_v36 = vmax.f32 %v547_v29, 0.0  ;;  %v3456_v3 = vpop.f32.mrb[2].mxu0  ;;  %v3512_v58 = vpop.f32.mrb[2].mxu1  ;;  %v6357_v50 = vmax.f32 %v5185_v40, 0.0 }
 0x1c4   : > { %v5213_v51 = vsel %vm5051_vm0, %v6205_v57, 0.0  ;;  %v562_v29 = vadd.f32 %v3456_v3, %v5091_v20  ;;  %v556_v16 = vpop.f32.mrb[3].mxu0  ;;  %v721_v44 = vpop.f32.mrb[3].mxu1  ;;  %v6354_v3 = vand.u32 15, %v4930_v62  ;;  %v727_v48 = vadd.f32 %v3512_v58, %v5091_v20 }
 0x1c5   : > { %v1138_v57 = vrot.slane %v5201_v36, 7  ;;  %1613 = vmatprep.mubr.f32.mxu0 %v5201_v36  ;;  %v557_v19 = vadd.f32 %v5091_v20, %v556_v16  ;;  %v5242_v2 = vsel %vm5051_vm0, %v6357_v50, 0.0  ;;  %v6358_v62 = vrot.slane %v5194_v35, 1 }
 0x1c6   : > { %vm5231_vm6 = vcmp.ne.s32.totalorder %v6354_v3, 0  ;;  %v5235_v17 = vmax.f32 %v562_v29, 0.0  ;;  %746 = vst [vmem:[#allocation2 + $0x20] sm:$0xff] %v5242_v2  ;;  %v6359_v29 = vrot.slane %v5201_v36, 1  ;;  %v6361_v16 = vrot.slane %v5213_v51, 7 }
 0x1c7   : > { %v6356_v61 = vsel %vm5231_vm6, 4294967295, %v6355_v61  ;;  %v3459_v52 = vpop.f32.mrb[4].mxu0  ;;  %v722_v50 = vadd.f32 %v5091_v20, %v721_v44  ;;  %v6363_v58 = vand.u32 15, %v4939_v1  ;;  %v5268_v41 = vmax.f32 %v557_v19, 0.0 }
 0x1c8   : > { %v5252_v3 = vsel %vm6219_vm1, %v6359_v29, %v6358_v62  ;;  %v5257_v56 = vsel %vm1132_vm2, %v6361_v16, %v1138_v57  ;;  %751 = vst [vmem:[#allocation2 + $0x98] sm:$0xff] %v5235_v17  ;;  %v572_v62 = vadd.f32 %v3459_v52, %v5091_v20  ;;  %v566_v29 = vpop.f32.mrb[5].mxu0  ;;  %v733_v1 = vmax.f32 %v727_v48, 0.0 }
 0x1c9   : > { %6360 = vst [vmem:[#allocation64_spill] sm:$0xff] %v5252_v3  ;;  %6362 = vst [vmem:[#allocation65_spill] sm:$0xff] %v5257_v56  ;;  %vm5262_vm7 = vcmp.ne.s32.totalorder %v6363_v58, 15  ;;  %3545 = vmatprep.mubr.f32.mxu1 %v5252_v3  ;;  %v567_v44 = vadd.f32 %v5091_v20, %v566_v29  ;;  %v732_v58 = vmax.f32 %v722_v50, 0.0  ;;  %v1307_v63 = vrot.slane %v5235_v17, 1  ;;  %4223 = vmatmul.mubr.msk.f32.vlgmr.msra.gmra.mrb[16].mxu0 %vm5133_vm3, %v5257_v56 }
 0x1ca   : > { %v6365_v45 = vsel %vm5262_vm7, 4294967295, %v6364_v45  ;;  %6367 = vst [vmem:[#allocation67_spill] sm:$0xff] %v5268_v41  ;;  %750 = vst [vmem:[#allocation2 + $0x80] sm:$0xff] %v5268_v41  ;;  %v1305_v22 = vrot.slane %v5268_v41, 1  ;;  %v5277_v40 = vmax.f32 %v572_v62, 0.0  ;;  %v6369_v52 = vrot.slane %v5194_v35, 7  ;;  %1618 = vmatprep.mubr.f32.mxu0 %v5194_v35 }
 0x1cb   : > { %6366 = vst [vmem:[#allocation66_spill] sm:$0xff] %v6365_v45  ;;  %v6370_v48 = vand.u32 15, %v4960_v12  ;;  %v6371_v50 = vmov 0  ;;  %v1142_v29 = vrot.slane %v5268_v41, 7  ;;  %v5294_v16 = vmax.f32 %v567_v44, 0.0  ;;  %v3462_v62 = vpop.f32.mrb[6].mxu0 }
 0x1cc   : > { %6368 = vst [vmem:[#allocation68_spill] sm:$0xff] %v5277_v40  ;;  %v5285_v19 = vsel %vm1132_vm2, %v1138_v57, %v6369_v52  ;;  %v5298_v3 = vsel %vm5170_vm4, %v733_v1, 0.0  ;;  %v5302_v24 = vsel %vm5170_vm4, %v732_v58, 0.0  ;;  %v6375_v12 = vand.u32 15, %v4950_v7  ;;  %753 = vst [vmem:[#allocation2 + $0xc8] sm:$0xff] %v5277_v40  ;;  %v576_v52 = vpop.f32.mrb[7].mxu0 }
 0x1cd   : > { %vm5289_vm8 = vcmp.ne.s32.totalorder %v6370_v48, 15  ;;  %6374 = vst [vmem:[#allocation70_spill] sm:$0xff] %v5294_v16  ;;  %v6376_v57 = vmov 0  ;;  %v6379_v44 = vpack.c.bf16 %v5047_v54, %v5045_v53  ;;  %v1311_v30 = vrot.slane %v5277_v40, 1  ;;  %765 = vst [vmem:[#allocation2 + $0x1e8] sm:$0xff] %v5298_v3  ;;  %1619 = vmatmul.mubr.f32.gmra.mrb[18].mxu0 %v5285_v19 }
 0x1ce   : > { %v6372_v50 = vsel %vm5289_vm8, 4294967295, %v6371_v50  ;;  %vm5307_vm9 = vcmp.ne.s32.totalorder %v6375_v12, 0  ;;  %v582_v58 = vadd.f32 %v3462_v62, %v5091_v20  ;;  %764 = vst [vmem:[#allocation2 + $0x1d0] sm:$0xff] %v5302_v24  ;;  %v6380_v7 = vand.u32 15, %v4975_v18  ;;  %752 = vst [vmem:[#allocation2 + $0xb0] sm:$0xff] %v5294_v16  ;;  %1623 = vmatprep.mubr.f32.mxu0 %v5268_v41 }
 0x1cf   : > { %6373 = vst [vmem:[#allocation69_spill] sm:$0xff] %v6372_v50  ;;  %v6377_v57 = vsel %vm5307_vm9, 4294967295, %v6376_v57  ;;  %3932 = vmatpush3.bf16.msra.mxu0 %v6379_v44  ;;  %v6383_v53 = vrot.slane %v5242_v2, 7  ;;  %v6384_v54 = vrot.slane %v5049_v55, 7  ;;  %v6385_v62 = vpack.c.bf16 %v5063_v47, %v5061_v13  ;;  %v5349_v13 = vld [vmem:[#allocation2 + $0x20] sm:$0xfe] }
 0x1d0   : > { %6378 = vst [vmem:[#allocation71_spill] sm:$0xff] %v6377_v57  ;;  %vm5322_vm10 = vcmp.ne.s32.totalorder %v6380_v7, 0  ;;  %v1309_v18 = vrot.slane %v5294_v16, 1  ;;  %v577_v7 = vadd.f32 %v5091_v20, %v576_v52  ;;  %v6386_v56 = vand.u32 15, %v4985_v23  ;;  %v6446_v50 = vld [vmem:[#allocation25_spill] sm:$0xff]  ;;  %v1487_v44 = vld [vmem:[#allocation9 + $0x140] sm:$0xff] }
 0x1d1   : > { %v5331_v12 = vsel %vm1132_vm2, %v6384_v54, %v6383_v53  ;;  %3934 = vmatprep.subr.bf16.mxu0 %v6385_v62  ;;  %v6387_v55 = vmov 0  ;;  %v5347_v53 = vmax.f32 %v582_v58, 0.0  ;;  %v6390_v54 = vrot.slane %v5194_v35, 1  ;;  %v6484_v57 = vld [vmem:[#allocation49_spill] sm:$0xff] }
 0x1d2   : > { %vm5343_vm11 = vcmp.ne.s32.totalorder %v6386_v56, 15  ;;  %v5359_v62 = vsel %vm6219_vm1, %v1305_v22, %v1307_v63  ;;  %v5361_v23 = vmax.f32 %v577_v7, 0.0  ;;  %v3465_v56 = vpop.f32.mrb[8].mxu0  ;;  %v6393_v1 = vrot.slane %v5194_v35, 7 }
 0x1d3   : > { %v6388_v55 = vsel %vm5343_vm11, 4294967295, %v6387_v55  ;;  %v5356_v52 = vsel %vm6219_vm1, %v6390_v54, %v1305_v22  ;;  %6392 = vst [vmem:[#allocation74_spill] sm:$0xff] %v5359_v62  ;;  %1383 = vst [vmem:[#allocation2 + $0x88] sm:$0xff] %v5359_v62  ;;  %v6394_v54 = vand.u32 15, %v4918_v59  ;;  %v6397_v22 = vpack.c.bf16 %v5067_v27, %v5065_v33 }
 0x1d4   : > { %6389 = vst [vmem:[#allocation72_spill] sm:$0xff] %v6388_v55  ;;  %6391 = vst [vmem:[#allocation73_spill] sm:$0xff] %v5356_v52  ;;  %v5369_v47 = vsel %vm1132_vm2, %v6393_v1, %v1142_v29  ;;  %v1315_v58 = vrot.slane %v5347_v53, 1  ;;  %v592_v41 = vadd.f32 %v3465_v56, %v5091_v20  ;;  %v586_v1 = vpop.f32.mrb[9].mxu0  ;;  %4224 = vmatmul.mubr.msk.f32.vlgmr.msra.gmra.mrb[4].mxu1 %vm5218_vm5, %v5356_v52  ;;  %v6398_v59 = vand.u32 15, %v4990_v25  ;;  %v6489_v55 = vld [vmem:[#allocation29_spill] sm:$0xff] }
 0x1d5   : > { %vm5373_vm12 = vcmp.ne.s32.totalorder %v6394_v54, 0  ;;  %3936 = vmatpush3.bf16.msra.mxu0 %v6397_v22  ;;  %755 = vst [vmem:[#allocation2 + $0xf8] sm:$0xff] %v5347_v53  ;;  %v6401_v27 = vpack.c.bf16 %v5071_v26, %v5069_v14  ;;  %754 = vst [vmem:[#allocation2 + $0xe0] sm:$0xff] %v5361_v23  ;;  %v6222_v33 = vrot.slane %v5361_v23, 7  ;;  %v1313_v56 = vrot.slane %v5361_v23, 1  ;;  %3548 = vmatprep.mubr.f32.mxu1 %v5359_v62 }
 0x1d6   : > { %vm5389_vm13 = vcmp.ne.s32.totalorder %v6398_v59, 0  ;;  %v587_v22 = vadd.f32 %v5091_v20, %v586_v1  ;;  %v6402_v7 = vpack.c.bf16 %v4943_v4, %v4936_v0  ;;  %v5405_v25 = vsel %vm6219_vm1, %v1307_v63, %v1309_v18  ;;  %4225 = vmatmul.mubr.msk.f32.gmra.mrb[20].mxu0 %vm5231_vm6, %v5369_v47 }
 0x1d7   : > { %3938 = vmatprep.subr.bf16.mxu0 %v6401_v27  ;;  %6403 = vst [vmem:[#allocation75_spill] sm:$0xff] %v5405_v25  ;;  %v6404_v26 = vand.u32 15, %v5004_v32  ;;  %v6405_v14 = vmov 0  ;;  %v5413_v59 = vmax.f32 %v592_v41, 0.0  ;;  %v6408_v1 = vpack.c.bf16 %v4947_v6, %v4945_v5  ;;  %v3468_v5 = vpop.f32.mrb[10].mxu0  ;;  %1628 = vmatprep.mubr.f32.mxu0 %v5235_v17 }
 0x1d8   : > { %3868 = vmatpush3.bf16.msra.mxu1 %v6402_v7  ;;  %v1364_v63 = vsel %vm5262_vm7, %v5405_v25, 0.0  ;;  %v5425_v0 = vsel %vm6219_vm1, %v1309_v18, %v1311_v30  ;;  %v6410_v4 = vrot.slane %v5235_v17, 7  ;;  %v5432_v41 = vmax.f32 %v587_v22, 0.0  ;;  %v5434_v6 = vld [vmem:[#allocation2 + $0x1e8] sm:$0x7f] }
 0x1d9   : > { %vm5409_vm14 = vcmp.ne.s32.totalorder %v6404_v26, 15  ;;  %3870 = vmatprep.subr.bf16.mxu1 %v6408_v1  ;;  %6409 = vst [vmem:[#allocation77_spill] sm:$0xff] %v5425_v0  ;;  %1384 = vst [vmem:[#allocation2 + $0xa0] sm:$0xff] %v1364_v63  ;;  %v5438_v7 = vsel %vm6219_vm1, %v1311_v30, %v1313_v56  ;;  %v5441_v27 = vsel %vm6219_vm1, %v1313_v56, %v1315_v58  ;;  %v6413_v18 = vrot.slane %v5294_v16, 7  ;;  %v6556_v1 = vld [vmem:[#allocation64_spill] sm:$0xff] }
 0x1da   : > { %v6406_v14 = vsel %vm5409_vm14, 4294967295, %v6405_v14  ;;  %v5430_v32 = vsel %vm1132_vm2, %v1142_v29, %v6410_v4  ;;  %6411 = vst [vmem:[#allocation78_spill] sm:$0xff] %v5438_v7  ;;  %6412 = vst [vmem:[#allocation79_spill] sm:$0xff] %v5441_v27  ;;  %v6414_v26 = vmov %v6410_v4  ;;  %v6416_v22 = vand.u32 15, %v5019_v39  ;;  %4226 = vmatmul.mubr.msk.f32.gmra.mrb[6].mxu1 %vm5262_vm7, %v5405_v25  ;;  %v2573_v25 = vld [vmem:[#allocation11 + $0x18] sm:$0xff] }
 0x1db   : > { %6407 = vst [vmem:[#allocation76_spill] sm:$0xff] %v6406_v14  ;;  %v5448_v29 = vsel %vm1132_vm2, %v6414_v26, %v6413_v18  ;;  %v6419_v30 = vpack.c.bf16 %v5084_v28, %v5082_v42  ;;  %757 = vst [vmem:[#allocation2 + $0x128] sm:$0xff] %v5413_v59  ;;  %v1319_v63 = vrot.slane %v5413_v59, 1  ;;  %v602_v4 = vadd.f32 %v3468_v5, %v5091_v20  ;;  %v596_v18 = vpop.f32.mrb[11].mxu0  ;;  %v6508_v14 = vld [vmem:[#allocation34_spill] sm:$0xff] }
 0x1dc   : > { %6415 = vst [vmem:[#allocation80_spill] sm:$0xff] %v5448_v29  ;;  %vm5452_vm15 = vcmp.ne.s32.totalorder %v6416_v22, 0  ;;  %v6420_v39 = vpack.c.bf16 %v5096_v8, %v5086_v34  ;;  %756 = vst [vmem:[#allocation2 + $0x110] sm:$0xff] %v5432_v41  ;;  %v1154_v28 = vrot.slane %v5432_v41, 7  ;;  %v1317_v42 = vrot.slane %v5432_v41, 1  ;;  %3551 = vmatprep.mubr.f32.mxu1 %v5425_v0  ;;  %1629 = vmatmul.mubr.f32.gmra.mrb[22].mxu0 %v5430_v32  ;;  %v2217_v34 = vld [vmem:[#allocation9 + $0x440] sm:$0xff] }
 0x1dd   : > { %3940 = vmatpush3.bf16.msra.mxu0 %v6419_v30  ;;  %v597_v22 = vadd.f32 %v5091_v20, %v596_v18  ;;  %v6421_v5 = vpack.c.bf16 %v4955_v10, %v4953_v9  ;;  %v6422_v30 = vand.u32 15, %v5016_v38  ;;  %v6423_v26 = vmov 0  ;;  %1633 = vmatprep.mubr.f32.mxu0 %v5294_v16 }
 0x1de   : > { %3942 = vmatprep.subr.bf16.mxu0 %v6420_v39  ;;  %v6426_v8 = vand.u32 15, %v5033_v46  ;;  %v5490_v39 = vmax.f32 %v602_v4, 0.0  ;;  %v6429_v9 = vpack.c.bf16 %v4968_v15, %v4957_v11  ;;  %v6430_v10 = vrot.slane %v5277_v40, 7  ;;  %v3471_v11 = vpop.f32.mrb[12].mxu0  ;;  %4227 = vmatmul.mubr.msk.f32.gmra.mrb[8].mxu1 %vm5289_vm8, %v5438_v7  ;;  %v6447_v7 = vld [vmem:[#allocation24_spill] sm:$0xff] }
 0x1df   : > { %3872 = vmatpush3.bf16.msra.mxu1 %v6421_v5  ;;  %vm5480_vm4 = vcmp.ne.s32.totalorder %v6422_v30, 15  ;;  %v6431_v38 = vrot.slane %v5294_v16, 7  ;;  %v5510_v5 = vmax.f32 %v597_v22, 0.0  ;;  %vm6433_vm7 = vcmask 1046528   ;;  %3554 = vmatprep.mubr.f32.mxu1 %v5441_v27 }
 0x1e0   : > { %v6424_v26 = vsel %vm5480_vm4, 4294967295, %v6423_v26  ;;  %vm5486_vm1 = vcmp.ne.s32.totalorder %v6426_v8, 0  ;;  %3874 = vmatprep.subr.bf16.mxu1 %v6429_v9  ;;  %v6432_v46 = vmov %v6430_v10  ;;  %v5514_v15 = vsel %vm6433_vm7, %v1315_v58, %v1317_v42  ;;  %vm6435_vm5 = vmmov %vm6433_vm7  ;;  %v6437_v8 = vld [vmem:[#allocation44_spill] sm:$0xff]  ;;  %759 = vst [vmem:[#allocation2 + $0x158] sm:$0xff] %v5490_v39  ;;  %v6439_v58 = vld [vmem:[#allocation38_spill] sm:$0xff]  ;;  %4228 = vmatmul.mubr.msk.f32.gmra.mrb[24].mxu0 %vm5307_vm9, %v5448_v29 }
 0x1e1   : > { %6425 = vst [vmem:[#allocation81_spill] sm:$0xff] %v6424_v26  ;;  %v5501_v18 = vsel %vm1132_vm2, %v6431_v38, %v6430_v10  ;;  %v5508_v4 = vsel %vm1132_vm2, %v6432_v46, %v6222_v33  ;;  %6434 = vst [vmem:[#allocation82_spill] sm:$0xff] %v5514_v15  ;;  %v5517_v30 = vsel %vm6435_vm5, %v1317_v42, %v1319_v63  ;;  %v1160_v10 = vrot.slane %v5490_v39, 7  ;;  %v606_v46 = vpop.f32.mrb[13].mxu0 }
 0x1e2   : > { %6436 = vst [vmem:[#allocation83_spill] sm:$0xff] %v5517_v30  ;;  %v6438_v9 = vpack.c.bf16 %v5100_v49, %v6437_v8  ;;  %v1323_v22 = vrot.slane %v5490_v39, 1  ;;  %v612_v38 = vadd.f32 %v3471_v11, %v5091_v20  ;;  %v6440_v42 = vand.u32 15, %v6439_v58  ;;  %v6443_v49 = vld [vmem:[#allocation47_spill] sm:$0xff]  ;;  %v6444_v8 = vld [vmem:[#allocation46_spill] sm:$0xff]  ;;  %758 = vst [vmem:[#allocation2 + $0x140] sm:$0xff] %v5510_v5  ;;  %1638 = vmatprep.mubr.f32.mxu0 %v5277_v40 }
 0x1e3   : > { %v1158_v33 = vrot.slane %v5510_v5, 7  ;;  %v1321_v11 = vrot.slane %v5510_v5, 1  ;;  %v607_v0 = vadd.f32 %v5091_v20, %v606_v46  ;;  %v6448_v45 = vpack.c.bf16 %v6446_v50, %v6447_v7  ;;  %v6455_v46 = vld [vmem:[#allocation43_spill] sm:$0xff]  ;;  %4229 = vmatmul.mubr.msk.f32.gmra.mrb[10].mxu1 %vm5343_vm11, %v5514_v15  ;;  %v6490_v15 = vld [vmem:[#allocation28_spill] sm:$0xff]  ;;  %v2151_v48 = vld [vmem:[#allocation2 + $0x128] sm:$0xff] }
 0x1e4   : > { %3944 = vmatpush3.bf16.msra.mxu0 %v6438_v9  ;;  %vm5531_vm5 = vcmp.ne.s32.totalorder %v6440_v42, 15  ;;  %v6445_v9 = vpack.c.bf16 %v6443_v49, %v6444_v8  ;;  %v6449_v58 = vrot.slane %v5347_v53, 7  ;;  %v6450_v42 = vrot.slane %v5361_v23, 7  ;;  %v6451_v8 = vld [vmem:[#allocation42_spill] sm:$0xff]  ;;  %3557 = vmatprep.mubr.f32.mxu1 %v5517_v30  ;;  %v6524_v30 = vld [vmem:[#allocation36_spill] sm:$0xff] }
 0x1e5   : > { %3876 = vmatpush3.bf16.msra.mxu1 %v6448_v45  ;;  %v6456_v62 = vand.u32 15, %v6455_v46  ;;  %v6457_v50 = vmov 0  ;;  %v6459_v45 = vld [vmem:[#allocation23_spill] sm:$0xff]  ;;  %v6461_v27 = vmov 0  ;;  %v6471_v52 = vmov 0  ;;  %1639 = vmatmul.mubr.f32.gmra.mrb[26].mxu0 %v5501_v18 }
 0x1e6   : > { %3946 = vmatprep.subr.bf16.mxu0 %v6445_v9  ;;  %v5551_v49 = vsel %vm1132_vm2, %v6450_v42, %v6449_v58  ;;  %v6452_v9 = vand.u32 15, %v6451_v8  ;;  %v6460_v7 = vand.u32 15, %v6459_v45  ;;  %v5571_v58 = vmax.f32 %v612_v38, 0.0  ;;  %v6464_v42 = vld [vmem:[#allocation27_spill] sm:$0xff]  ;;  %v6465_v8 = vld [vmem:[#allocation26_spill] sm:$0xff]  ;;  %v6469_v38 = vld [vmem:[#allocation45_spill] sm:$0xff]  ;;  %1643 = vmatprep.mubr.f32.mxu0 %v5361_v23 }
 0x1e7   : > { %vm5561_vm8 = vcmp.ne.s32.totalorder %v6456_v62, 0  ;;  %v6467_v62 = vrot.slane %v5347_v53, 7  ;;  %v6468_v45 = vrot.slane %v5413_v59, 7  ;;  %v6470_v21 = vand.u32 15, %v6469_v38  ;;  %v2157_v54 = vld [vmem:[#allocation2 + $0x158] sm:$0xff] }
 0x1e8   : > { %vm5555_vm7 = vcmp.ne.s32.totalorder %v6452_v9, 15  ;;  %v6458_v50 = vsel %vm5561_vm8, 4294967295, %v6457_v50  ;;  %vm5567_vm6 = vcmp.ne.s32.totalorder %v6460_v7, 15  ;;  %v6466_v9 = vpack.c.bf16 %v6464_v42, %v6465_v8  ;;  %v3474_v8 = vpop.f32.mrb[14].mxu0  ;;  %761 = vst [vmem:[#allocation2 + $0x188] sm:$0xff] %v5571_v58 }
 0x1e9   : > { %v6462_v27 = vsel %vm5567_vm6, 4294967295, %v6461_v27  ;;  %v5582_v46 = vsel %vm1132_vm2, %v6467_v62, %v1154_v28  ;;  %v5587_v7 = vsel %vm1132_vm2, %v1154_v28, %v6468_v45  ;;  %vm5591_vm6 = vcmp.ne.s32.totalorder %v6470_v21, 0  ;;  %v6479_v28 = vld [vmem:[#allocation48_spill] sm:$0xff]  ;;  %4231 = vmatmul.mubr.msk.f32.gmra.mrb[28].mxu0 %vm5322_vm10, %v5508_v4 }
 0x1ea   : > { %6463 = vst [vmem:[#allocation44_spill] sm:$0xff] %v6462_v27  ;;  %3878 = vmatprep.subr.bf16.mxu1 %v6466_v9  ;;  %v6472_v52 = vsel %vm5591_vm6, 4294967295, %v6471_v52  ;;  %v5595_v42 = vmax.f32 %v607_v0, 0.0  ;;  %vm6474_vm9 = vcmask 1046528   ;;  %v6478_v27 = vld [vmem:[#allocation50_spill] sm:$0xff]  ;;  %v1164_v21 = vrot.slane %v5571_v58, 7  ;;  %1648 = vmatprep.mubr.f32.mxu0 %v5347_v53 }
 0x1eb   : > { %6473 = vst [vmem:[#allocation38_spill] sm:$0xff] %v6472_v52  ;;  %v5599_v9 = vsel %vm6474_vm9, %v1319_v63, %v1321_v11  ;;  %vm6476_vm8 = vmmov %vm6474_vm9  ;;  %v6480_v45 = vpack.c.bf16 %v6478_v27, %v6479_v28  ;;  %v1327_v0 = vrot.slane %v5571_v58, 1  ;;  %v622_v38 = vadd.f32 %v3474_v8, %v5091_v20  ;;  %v616_v52 = vpop.f32.mrb[15].mxu0  ;;  %v6481_v63 = vld [vmem:[#allocation54_spill] sm:$0xff] }
 0x1ec   : > { %6475 = vst [vmem:[#allocation47_spill] sm:$0xff] %v5599_v9  ;;  %v5602_v62 = vsel %vm6476_vm8, %v1321_v11, %v1323_v22  ;;  %v6482_v11 = vld [vmem:[#allocation51_spill] sm:$0xff]  ;;  %v6485_v27 = vand.u32 15, %v6484_v57  ;;  %v6486_v28 = vmov 0  ;;  %760 = vst [vmem:[#allocation2 + $0x170] sm:$0xff] %v5595_v42  ;;  %v1325_v8 = vrot.slane %v5595_v42, 1  ;;  %4230 = vmatmul.mubr.msk.f32.gmra.mrb[12].mxu1 %vm5409_vm14, %v5599_v9 }
 0x1ed   : > { %6477 = vst [vmem:[#allocation46_spill] sm:$0xff] %v5602_v62  ;;  %3948 = vmatpush3.bf16.msra.mxu0 %v6480_v45  ;;  %v6483_v40 = vpack.c.bf16 %v6481_v63, %v6482_v11  ;;  %v1162_v45 = vrot.slane %v5595_v42, 7  ;;  %v617_v29 = vadd.f32 %v5091_v20, %v616_v52  ;;  %v6491_v16 = vpack.c.bf16 %v6489_v55, %v6490_v15  ;;  %v6493_v11 = vld [vmem:[#allocation31_spill] sm:$0xff] }
 0x1ee   : > { %vm5619_vm8 = vcmp.ne.s32.totalorder %v6485_v27, 15  ;;  %v5636_v63 = vmax.f32 %v622_v38, 0.0  ;;  %v6494_v27 = vld [vmem:[#allocation30_spill] sm:$0xff]  ;;  %v6496_v20 = vrot.slane %v5213_v51, 7  ;;  %v6497_v55 = vrot.slane %v5242_v2, 7  ;;  %3560 = vmatprep.mubr.f32.mxu1 %v5602_v62  ;;  %1649 = vmatmul.mubr.f32.gmra.mrb[30].mxu0 %v5551_v49 }
 0x1ef   : > { %3950 = vmatprep.subr.bf16.mxu0 %v6483_v40  ;;  %v6487_v28 = vsel %vm5619_vm8, 4294967295, %v6486_v28  ;;  %3880 = vmatpush3.bf16.msra.mxu1 %v6491_v16  ;;  %v6492_v40 = vrot.slane %v5413_v59, 7  ;;  %v5650_v52 = vsel %vm1132_vm2, %v1158_v33, %v1160_v10  ;;  %v5652_v15 = vmax.f32 %v617_v29, 0.0  ;;  %vm6498_vm8 = vmmov %vm6474_vm9  ;;  %v1478_v62 = vld [vmem:[#allocation9 + $0xf8] sm:$0xff] }
 0x1f0   : > { %6488 = vst [vmem:[#allocation25_spill] sm:$0xff] %v6487_v28  ;;  %v6495_v28 = vpack.c.bf16 %v6493_v11, %v6494_v27  ;;  %v5647_v16 = vsel %vm1132_vm2, %v6497_v55, %v6496_v20  ;;  %v5656_v38 = vsel %vm6474_vm9, %v1323_v22, %v1325_v8  ;;  %v6499_v2 = vpack.c.bf16 %v5149_v31, %v5147_v60  ;;  %v6500_v22 = vld [vmem:[#allocation55_spill] sm:$0xff]  ;;  %v6502_v60 = vld [vmem:[#allocation33_spill] sm:$0xff]  ;;  %v6503_v31 = vld [vmem:[#allocation32_spill] sm:$0xff] }
 0x1f1   : > { %v5634_v57 = vsel %vm1132_vm2, %v6492_v40, %v1158_v33  ;;  %v5662_v40 = vsel %vm1132_vm2, %v1160_v10, %v1162_v45  ;;  %763 = vst [vmem:[#allocation2 + $0x1b8] sm:$0xff] %v5636_v63  ;;  %v1168_v33 = vrot.slane %v5636_v63, 7  ;;  %v1331_v29 = vrot.slane %v5636_v63, 1  ;;  %vm6511_vm9 = vmmov %vm6498_vm8  ;;  %4232 = vmatmul.mubr.msk.f32.gmra.mrb[14].mxu1 %vm5480_vm4, %v5656_v38  ;;  %1653 = vmatprep.mubr.f32.mxu0 %v5432_v41 }
 0x1f2   : > { %3882 = vmatprep.subr.bf16.mxu1 %v6495_v28  ;;  %v5659_v28 = vsel %vm6498_vm8, %v1325_v8, %v1327_v0  ;;  %3952 = vmatpush3.bf16.msra.mxu0 %v6499_v2  ;;  %v6501_v8 = vpack.c.bf16 %v5159_v43, %v6500_v22  ;;  %v1166_v10 = vrot.slane %v5652_v15, 7  ;;  %v1329_v11 = vrot.slane %v5652_v15, 1  ;;  %vm6516_vm14 = vmmov %vm6498_vm8 }
 0x1f3   : > { %v6504_v27 = vpack.c.bf16 %v6502_v60, %v6503_v31  ;;  %v5683_v20 = vsel %vm1132_vm2, %v1162_v45, %v1164_v21  ;;  %v6505_v55 = vrot.slane %v5213_v51, 1  ;;  %v6506_v2 = vrot.slane %v5349_v13, 1  ;;  %v1459_v60 = vld [vmem:[#allocation9 + $0x60] sm:$0xff]  ;;  %v1460_v45 = vld [vmem:[#allocation9 + $0x68] sm:$0xff]  ;;  %vm6517_vm6 = vmmov %vm6498_vm8  ;;  %3563 = vmatprep.mubr.f32.mxu1 %v5659_v28  ;;  %4234 = vmatmul.mubr.msk.f32.gmra.mrb[32].mxu0 %vm5389_vm13, %v5582_v46 }
 0x1f4   : > { %3954 = vmatprep.subr.bf16.mxu0 %v6501_v8  ;;  %v1335_v22 = vrot.slane %v5298_v3, 1  ;;  %v6507_v8 = vld [vmem:[#allocation35_spill] sm:$0xff]  ;;  %v6510_v31 = vrot.slane %v5302_v24, 1  ;;  %v6512_v13 = vrot.slane %v5201_v36, 1  ;;  %v5724_v51 = vsel %vm1132_vm2, %v1164_v21, %v1166_v10  ;;  %1658 = vmatprep.mubr.f32.mxu0 %v5413_v59 }
 0x1f5   : > { %3884 = vmatpush3.bf16.msra.mxu1 %v6504_v27  ;;  %v5690_v43 = vsel %vm6498_vm8, %v6506_v2, %v6505_v55  ;;  %v6509_v9 = vpack.c.bf16 %v6507_v8, %v6508_v14  ;;  %v6514_v14 = vrot.slane %v5302_v24, 7  ;;  %v5718_v2 = vsel %vm6516_vm14, %v1327_v0, %v1329_v11  ;;  %v6520_v0 = vld [vmem:[#allocation59_spill] sm:$0xff]  ;;  %vm6534_vm14 = vmmov %vm6517_vm6 }
 0x1f6   : > { %v5702_v27 = vsel %vm6511_vm9, %v1331_v29, %v6510_v31  ;;  %v5709_v3 = vsel %vm6498_vm8, %v6505_v55, %v6512_v13  ;;  %v5721_v8 = vsel %vm6517_vm6, %v1329_v11, %v1331_v29  ;;  %v1477_v31 = vld [vmem:[#allocation9 + $0xf0] sm:$0xff]  ;;  %v6518_v13 = vld [vmem:[#allocation56_spill] sm:$0xff]  ;;  %v3891_v21 = vpack.c.bf16 %v1460_v45, %v1459_v60  ;;  %4233 = vmatmul.mubr.msk.f32.gmra.mrb[16].mxu1 %vm5555_vm7, %v5718_v2 }
 0x1f7   : > { %3886 = vmatprep.subr.bf16.mxu1 %v6509_v9  ;;  %6513 = vst [vmem:[#allocation24_spill] sm:$0xff] %v5709_v3  ;;  %v5714_v9 = vsel %vm1132_vm2, %v1168_v33, %v6514_v14  ;;  %v6519_v55 = vpack.c.bf16 %v5176_v37, %v6518_v13  ;;  %v5733_v14 = vsel %vm1132_vm2, %v1166_v10, %v1168_v33  ;;  %v6523_v11 = vld [vmem:[#allocation37_spill] sm:$0xff]  ;;  %v6526_v37 = vrot.slane %v5434_v6, 7  ;;  %v6528_v33 = vld [vmem:[#allocation40_spill] sm:$0xff]  ;;  %v6529_v10 = vld [vmem:[#allocation39_spill] sm:$0xff] }
 0x1f8   : > { %6515 = vst [vmem:[#allocation42_spill] sm:$0xff] %v5714_v9  ;;  %v6521_v9 = vld [vmem:[#allocation58_spill] sm:$0xff]  ;;  %v6525_v3 = vpack.c.bf16 %v6523_v11, %v6524_v30  ;;  %v6527_v13 = vrot.slane %v5302_v24, 7  ;;  %v6530_v26 = vpack.c.bf16 %v6528_v33, %v6529_v10  ;;  %v6532_v6 = vld [vmem:[#allocation52_spill] sm:$0xff]  ;;  %v1479_v11 = vld [vmem:[#allocation9 + $0x100] sm:$0xff]  ;;  %3566 = vmatprep.mubr.f32.mxu1 %v5721_v8  ;;  %1659 = vmatmul.mubr.f32.gmra.mrb[34].mxu0 %v5587_v7 }
 0x1f9   : > { %3956 = vmatpush3.bf16.msra.mxu0 %v6519_v55  ;;  %v6522_v29 = vpack.c.bf16 %v6520_v0, %v6521_v9  ;;  %v3893_v9 = vpack.c.bf16 %v1478_v62, %v1477_v31  ;;  %v1461_v0 = vld [vmem:[#allocation9 + $0x70] sm:$0xff]  ;;  %v1462_v30 = vld [vmem:[#allocation9 + $0x78] sm:$0xff]  ;;  %v6533_v45 = vrot.slane %v6532_v6, 1  ;;  %v6538_v10 = vld [vmem:[#allocation60_spill] sm:$0xff]  ;;  %1663 = vmatprep.mubr.f32.mxu0 %v5510_v5 }
 0x1fa   : > { %3888 = vmatpush3.bf16.msra.mxu1 %v6525_v3  ;;  %v5747_v55 = vsel %vm1132_vm2, %v6527_v13, %v6526_v37  ;;  %v6531_v3 = vrot.slane %v5302_v24, 1  ;;  %v1480_v37 = vld [vmem:[#allocation9 + $0x108] sm:$0xff]  ;;  %v6536_v13 = vld [vmem:[#allocation61_spill] sm:$0xff]  ;;  %v3895_v24 = vpack.c.bf16 %v1462_v30, %v1461_v0  ;;  %v1482_v31 = vld [vmem:[#allocation9 + $0x118] sm:$0xff]  ;;  %vm6547_vm2 = vnez %v6458_v50 }
 0x1fb   : > { %3958 = vmatprep.subr.bf16.mxu0 %v6522_v29  ;;  %3890 = vmatprep.subr.bf16.mxu1 %v6530_v26  ;;  %v5761_v29 = vsel %vm6534_vm14, %v1335_v22, %v6533_v45  ;;  %v6535_v26 = vld [vmem:[#allocation62_spill] sm:$0xff]  ;;  %v3897_v62 = vpack.c.bf16 %v1480_v37, %v1479_v11  ;;  %v1483_v0 = vld [vmem:[#allocation9 + $0x120] sm:$0xff]  ;;  %v1484_v30 = vld [vmem:[#allocation9 + $0x128] sm:$0xff] }
 0x1fc   : > { %v5756_v60 = vsel %vm6517_vm6, %v6531_v3, %v1335_v22  ;;  %v6537_v33 = vpack.c.bf16 %v6535_v26, %v6536_v13  ;;  %v1481_v22 = vld [vmem:[#allocation9 + $0x110] sm:$0xff]  ;;  %4235 = vmatmul.mubr.msk.f32.gmra.mrb[18].mxu1 %vm5531_vm5, %v5702_v27  ;;  %4239 = vmatmul.mubr.msk.f32.gmra.mrb[36].mxu0 %vm5452_vm15, %v5634_v57  ;;  %v3905_v11 = vpack.c.bf16 %v1484_v30, %v1483_v0  ;;  %v1486_v26 = vld [vmem:[#allocation9 + $0x138] sm:$0xff]  ;;  %v1488_v13 = vld [vmem:[#allocation9 + $0x148] sm:$0xff] }
 0x1fd   : > { %v6541_v6 = vld [vmem:[#allocation57_spill] sm:$0xff]  ;;  %1668 = vmatprep.mubr.f32.mxu0 %v5490_v39  ;;  %v1494_v3 = vld [vmem:[#allocation9 + $0x178] sm:$0xff]  ;;  %v2209_v30 = vld [vmem:[#allocation9 + $0x400] sm:$0xff] }
 0x1fe   : > { %3960 = vmatpush3.bf16.msra.mxu0 %v6537_v33  ;;  %3892 = vmatpush3.bf16.msra.mxu1 %v3891_v21  ;;  %v6539_v21 = vmax.f32 %v6538_v10, 0.0  ;;  %v6542_v45 = vmax.f32 %v6541_v6, 0.0  ;;  %v1485_v37 = vld [vmem:[#allocation9 + $0x130] sm:$0xff]  ;;  %v1492_v10 = vld [vmem:[#allocation9 + $0x168] sm:$0xff]  ;;  %v2221_v50 = vld [vmem:[#allocation9 + $0x460] sm:$0xff] }
 0x1ff   : > { %3894 = vmatprep.subr.bf16.mxu1 %v3893_v9  ;;  %v3901_v9 = vpack.c.bf16 %v1482_v31, %v1481_v22  ;;  %v6543_v33 = vld [vmem:[#allocation65_spill] sm:$0xff]  ;;  %v6545_v22 = vld [vmem:[#allocation67_spill] sm:$0xff]  ;;  %v2210_v6 = vld [vmem:[#allocation9 + $0x408] sm:$0xff] }
 0x200   : > { %4236 = vmatprep.mubr.msk.f32.mxu1 %vm5051_vm0, %v6539_v21  ;;  %1669 = vmatmul.mubr.f32.gmra.mrb[38].mxu0 %v5650_v52  ;;  %v1491_v31 = vld [vmem:[#allocation9 + $0x160] sm:$0xff]  ;;  %v1493_v21 = vld [vmem:[#allocation9 + $0x170] sm:$0xff] }
 0x201   : > { %1673 = vmatprep.mubr.f32.mxu0 %v5595_v42  ;;  %v2130_v0 = vld [vmem:[#allocation2 + $0x80] sm:$0xff] }
 0x202   : > { %3896 = vmatpush3.bf16.msra.mxu1 %v3895_v24  ;;  %v6562_v24 = vld [vmem:[#allocation66_spill] sm:$0xff] }
 0x203   : > { %3898 = vmatprep.subr.bf16.mxu1 %v3897_v62 }
 0x204   : > { %4241 = vmatmul.mubr.msk.f32.gmra.mrb[40].mxu0 %vm5486_vm1, %v5662_v40 }
 0x205   : > { %4237 = vmatmul.mubr.msk.f32.vlgmr.msra.gmra.mrb[20].mxu1 %vm5373_vm12, %v5331_v12  ;;  %v3909_v12 = vpack.c.bf16 %v1486_v26, %v1485_v37  ;;  %1678 = vmatprep.mubr.f32.mxu0 %v5571_v58  ;;  %v2133_v37 = vld [vmem:[#allocation2 + $0x98] sm:$0xff]  ;;  %v3961_v26 = vpack.c.bf16 %v2210_v6, %v2209_v30  ;;  %v2175_v30 = vld [vmem:[#allocation2 + $0x1e8] sm:$0xff] }
 0x206   : > { %3900 = vmatpush3.bf16.msra.mxu1 %v3897_v62  ;;  %4238 = vmatprep.mubr.msk.f32.mxu1 %vm5051_vm0, %v6542_v45  ;;  %v1490_v62 = vld [vmem:[#allocation9 + $0x158] sm:$0xff]  ;;  %vm6546_vm0 = vnez %v6356_v61  ;;  %v6549_v45 = vld [vmem:[#allocation80_spill] sm:$0xff] }
 0x207   : > { %3902 = vmatprep.subr.bf16.mxu1 %v3901_v9  ;;  %v2139_v61 = vld [vmem:[#allocation2 + $0xc8] sm:$0xff] }
 0x208   : > { %1679 = vmatmul.mubr.f32.gmra.mrb[42].mxu0 %v5683_v20 }
 0x209   : > { %1909 = vmatmul.mubr.f32.gmra.mrb[22].mxu1 %v5647_v16  ;;  %v1489_v16 = vld [vmem:[#allocation9 + $0x150] sm:$0xff]  ;;  %1683 = vmatprep.mubr.f32.mxu0 %v5652_v15 }
 0x20a   : > { %1913 = vmatprep.mubr.f32.mxu1 %v5201_v36  ;;  %3904 = vmatpush3.bf16.msra.mxu1 %v3901_v9  ;;  %v3913_v36 = vpack.c.bf16 %v1488_v13, %v1487_v44  ;;  %v6548_v9 = vld [vmem:[#allocation70_spill] sm:$0xff] }
 0x20b   : > { %3906 = vmatprep.subr.bf16.mxu1 %v3905_v11  ;;  %v6560_v44 = vld [vmem:[#allocation74_spill] sm:$0xff] }
 0x20c   : > { %4243 = vmatmul.mubr.msk.f32.gmra.mrb[44].mxu0 %vm6547_vm2, %v5724_v51 }
 0x20d   : > { %4240 = vmatmul.mubr.msk.f32.gmra.mrb[24].mxu1 %vm5133_vm3, %v6543_v33  ;;  %1688 = vmatprep.mubr.f32.mxu0 %v5636_v63  ;;  %v6552_v63 = vld [vmem:[#allocation68_spill] sm:$0xff]  ;;  %v6561_v33 = vld [vmem:[#allocation75_spill] sm:$0xff] }
 0x20e   : > { %1918 = vmatprep.mubr.f32.mxu1 %v5194_v35  ;;  %3908 = vmatpush3.bf16.msra.mxu1 %v3905_v11  ;;  %v3917_v35 = vpack.c.bf16 %v1490_v62, %v1489_v16  ;;  %v6550_v11 = vld [vmem:[#allocation71_spill] sm:$0xff]  ;;  %v2169_v16 = vld [vmem:[#allocation2 + $0x1b8] sm:$0xff] }
 0x20f   : > { %3910 = vmatprep.subr.bf16.mxu1 %v3909_v12  ;;  %vm6551_vm3 = vnez %v6550_v11  ;;  %v6575_v11 = vld [vmem:[#allocation47_spill] sm:$0xff] }
 0x210   : > { %1689 = vmatmul.mubr.f32.gmra.mrb[46].mxu0 %v5733_v14 }
 0x211   : > { %1919 = vmatmul.mubr.f32.gmra.mrb[26].mxu1 %v5285_v19  ;;  %v3921_v19 = vpack.c.bf16 %v1492_v10, %v1491_v31  ;;  %2289 = vmatprep.mubr.f32.mxu0 %v2130_v0  ;;  %v6568_v31 = vld [vmem:[#allocation79_spill] sm:$0xff]  ;;  %v6572_v0 = vld [vmem:[#allocation42_spill] sm:$0xff] }
 0x212   : > { %1923 = vmatprep.mubr.f32.mxu1 %v6545_v22  ;;  %3912 = vmatpush3.bf16.msra.mxu1 %v3909_v12  ;;  %v2136_v12 = vld [vmem:[#allocation2 + $0xb0] sm:$0xff]  ;;  %v2220_v22 = vld [vmem:[#allocation9 + $0x458] sm:$0xff] }
 0x213   : > { %3914 = vmatprep.subr.bf16.mxu1 %v3913_v36  ;;  %v2172_v10 = vld [vmem:[#allocation2 + $0x1d0] sm:$0xff] }
 0x214   : > { %4245 = vmatmul.mubr.msk.f32.vlgmr.msra.gmra.mrb[48].mxu0 %vm6546_vm0, %v5369_v47 }
 0x215   : > { %4242 = vmatmul.mubr.msk.f32.gmra.mrb[28].mxu1 %vm6546_vm0, %v5369_v47  ;;  %2294 = vmatprep.mubr.f32.mxu0 %v2133_v37  ;;  %v2142_v47 = vld [vmem:[#allocation2 + $0xe0] sm:$0xff]  ;;  %v6578_v37 = vld [vmem:[#allocation46_spill] sm:$0xff] }
 0x216   : > { %1928 = vmatprep.mubr.f32.mxu1 %v5235_v17  ;;  %3916 = vmatpush3.bf16.msra.mxu1 %v3913_v36  ;;  %v3925_v17 = vpack.c.bf16 %v1494_v3, %v1493_v21  ;;  %v6564_v36 = vld [vmem:[#allocation77_spill] sm:$0xff]  ;;  %v6569_v21 = vld [vmem:[#allocation82_spill] sm:$0xff] }
 0x217   : > { %3918 = vmatprep.subr.bf16.mxu1 %v3917_v35 }
 0x218   : > { %2295 = vmatmul.mubr.f32.gmra.mrb[50].mxu0 %v5430_v32 }
 0x219   : > { %1929 = vmatmul.mubr.f32.gmra.mrb[30].mxu1 %v5430_v32  ;;  %2299 = vmatprep.mubr.f32.mxu0 %v2136_v12  ;;  %v2211_v32 = vld [vmem:[#allocation9 + $0x410] sm:$0xff] }
 0x21a   : > { %1933 = vmatprep.mubr.f32.mxu1 %v6548_v9  ;;  %3920 = vmatpush3.bf16.msra.mxu1 %v3917_v35  ;;  %v6566_v35 = vld [vmem:[#allocation69_spill] sm:$0xff]  ;;  %v6571_v9 = vld [vmem:[#allocation83_spill] sm:$0xff] }
 0x21b   : > { %3922 = vmatprep.subr.bf16.mxu1 %v3921_v19 }
 0x21c   : > { %4247 = vmatmul.mubr.msk.f32.gmra.mrb[52].mxu0 %vm6551_vm3, %v6549_v45 }
 0x21d   : > { %4244 = vmatmul.mubr.msk.f32.gmra.mrb[32].mxu1 %vm6551_vm3, %v6549_v45  ;;  %2304 = vmatprep.mubr.f32.mxu0 %v2139_v61  ;;  %v2224_v45 = vld [vmem:[#allocation9 + $0x478] sm:$0xff] }
 0x21e   : > { %1938 = vmatprep.mubr.f32.mxu1 %v6552_v63  ;;  %3924 = vmatpush3.bf16.msra.mxu1 %v3921_v19  ;;  %v6576_v63 = vld [vmem:[#allocation76_spill] sm:$0xff]  ;;  %v2131_v61 = vld [vmem:[#allocation2 + $0x88] sm:$0xff] }
 0x21f   : > { %3926 = vmatprep.subr.bf16.mxu1 %v3925_v17  ;;  %vm6577_vm9 = vnez %v6576_v63 }
 0x220   : > { %2305 = vmatmul.mubr.f32.gmra.mrb[54].mxu0 %v5501_v18 }
 0x221   : > { %1939 = vmatmul.mubr.f32.gmra.mrb[34].mxu1 %v5501_v18  ;;  %2309 = vmatprep.mubr.f32.mxu0 %v2142_v47  ;;  %v2134_v47 = vld [vmem:[#allocation2 + $0xa0] sm:$0xff] }
 0x222   : > { %1943 = vmatprep.mubr.f32.mxu1 %v5361_v23  ;;  %3928 = vmatpush3.bf16.msra.mxu1 %v3925_v17  ;;  %v2148_v23 = vld [vmem:[#allocation2 + $0x110] sm:$0xff]  ;;  %v6573_v17 = vld [vmem:[#allocation38_spill] sm:$0xff] }
 0x223   : > { %3962 = vmatprep.subr.bf16.mxu1 %v3961_v26 }
 0x224   : > { %4249 = vmatmul.mubr.msk.f32.gmra.mrb[56].mxu0 %vm5322_vm10, %v5508_v4 }
 0x225   : > { %4246 = vmatmul.mubr.msk.f32.gmra.mrb[36].mxu1 %vm5322_vm10, %v5508_v4  ;;  %v2213_v4 = vld [vmem:[#allocation9 + $0x420] sm:$0xff] }
 0x226   : > { %1948 = vmatprep.mubr.f32.mxu1 %v5347_v53  ;;  %v2145_v53 = vld [vmem:[#allocation2 + $0xf8] sm:$0xff] }
 0x227   : > { %2314 = vmatprep.mubr.f32.mxu0 %v2145_v53  ;;  %v2571_v53 = vld [vmem:[#allocation11 + $0x8] sm:$0xff] }
 0x228   : > { %2315 = vmatmul.mubr.f32.gmra.mrb[58].mxu0 %v5551_v49 }
 0x229   : > { %1949 = vmatmul.mubr.f32.gmra.mrb[38].mxu1 %v5551_v49  ;;  %2319 = vmatprep.mubr.f32.mxu0 %v2148_v23  ;;  %v6553_v49 = vld [vmem:[#allocation24_spill] sm:$0xff]  ;;  %v6580_v23 = vld [vmem:[#allocation25_spill] sm:$0xff] }
 0x22a   : > { %1953 = vmatprep.mubr.f32.mxu1 %v5432_v41  ;;  %v2212_v41 = vld [vmem:[#allocation9 + $0x418] sm:$0xff] }
 0x22b   : > { %v3965_v18 = vpack.c.bf16 %v2212_v41, %v2211_v32  ;;  %v2580_v41 = vld [vmem:[#allocation11 + $0x50] sm:$0xff] }
 0x22c   : > { %4251 = vmatmul.mubr.msk.f32.gmra.mrb[60].mxu0 %vm5389_vm13, %v5582_v46 }
 0x22d   : > { %4248 = vmatmul.mubr.msk.f32.gmra.mrb[40].mxu1 %vm5389_vm13, %v5582_v46  ;;  %2324 = vmatprep.mubr.f32.mxu0 %v2151_v48  ;;  %v2163_v46 = vld [vmem:[#allocation2 + $0x188] sm:$0xff]  ;;  %vm6567_vm13 = vnez %v6566_v35  ;;  %v2575_v48 = vld [vmem:[#allocation11 + $0x28] sm:$0xff] }
 0x22e   : > { %1958 = vmatprep.mubr.f32.mxu1 %v5413_v59  ;;  %v2154_v59 = vld [vmem:[#allocation2 + $0x140] sm:$0xff] }
 0x230   : > { %2325 = vmatmul.mubr.f32.gmra.mrb[62].mxu0 %v5587_v7 }
 0x231   : > { %1959 = vmatmul.mubr.f32.gmra.mrb[42].mxu1 %v5587_v7  ;;  %2329 = vmatprep.mubr.f32.mxu0 %v2154_v59 }
 0x232   : > { %1963 = vmatprep.mubr.f32.mxu1 %v5510_v5  ;;  %v2214_v5 = vld [vmem:[#allocation9 + $0x428] sm:$0xff] }
 0x233   : > { %v3969_v7 = vpack.c.bf16 %v2214_v5, %v2213_v4  ;;  %v2582_v4 = vld [vmem:[#allocation11 + $0x60] sm:$0xff]  ;;  %v2583_v5 = vld [vmem:[#allocation11 + $0x68] sm:$0xff] }
 0x234   : > { %4253 = vmatmul.mubr.msk.f32.gmra.mrb[64].mxu0 %vm5452_vm15, %v5634_v57 }
 0x235   : > { %4250 = vmatmul.mubr.msk.f32.gmra.mrb[44].mxu1 %vm5452_vm15, %v5634_v57  ;;  %2334 = vmatprep.mubr.f32.mxu0 %v2157_v54  ;;  %v2216_v57 = vld [vmem:[#allocation9 + $0x438] sm:$0xff]  ;;  %vm6574_vm15 = vnez %v6573_v17  ;;  %v2578_v54 = vld [vmem:[#allocation11 + $0x40] sm:$0xff] }
 0x236   : > { %1968 = vmatprep.mubr.f32.mxu1 %v5490_v39  ;;  %v2160_v39 = vld [vmem:[#allocation2 + $0x170] sm:$0xff] }
 0x238   : > { %2335 = vmatmul.mubr.f32.gmra.mrb[66].mxu0 %v5650_v52 }
 0x239   : > { %1969 = vmatmul.mubr.f32.gmra.mrb[46].mxu1 %v5650_v52  ;;  %2339 = vmatprep.mubr.f32.mxu0 %v2160_v39  ;;  %v6557_v52 = vld [vmem:[#allocation73_spill] sm:$0xff]  ;;  %v2581_v39 = vld [vmem:[#allocation11 + $0x58] sm:$0xff] }
 0x23a   : > { %1973 = vmatprep.mubr.f32.mxu1 %v5595_v42  ;;  %v2215_v42 = vld [vmem:[#allocation9 + $0x430] sm:$0xff] }
 0x23b   : > { %v3973_v13 = vpack.c.bf16 %v2216_v57, %v2215_v42 }
 0x23c   : > { %4255 = vmatmul.mubr.msk.f32.gmra.mrb[68].mxu0 %vm5486_vm1, %v5662_v40 }
 0x23d   : > { %4252 = vmatmul.mubr.msk.f32.gmra.mrb[48].mxu1 %vm5486_vm1, %v5662_v40  ;;  %2344 = vmatprep.mubr.f32.mxu0 %v2163_v46  ;;  %v2218_v40 = vld [vmem:[#allocation9 + $0x448] sm:$0xff]  ;;  %vm6563_vm1 = vnez %v6562_v24 }
 0x23e   : > { %1978 = vmatprep.mubr.f32.mxu1 %v5571_v58  ;;  %v6554_v58 = vld [vmem:[#allocation44_spill] sm:$0xff]  ;;  %v3977_v62 = vpack.c.bf16 %v2218_v40, %v2217_v34  ;;  %v2585_v34 = vld [vmem:[#allocation11 + $0x78] sm:$0xff] }
 0x23f   : > { %vm6555_vm10 = vnez %v6554_v58 }
 0x240   : > { %2345 = vmatmul.mubr.f32.gmra.mrb[70].mxu0 %v5683_v20 }
 0x241   : > { %1979 = vmatmul.mubr.f32.gmra.mrb[50].mxu1 %v5683_v20  ;;  %2349 = vmatprep.mubr.f32.mxu0 %v5652_v15  ;;  %v2219_v20 = vld [vmem:[#allocation9 + $0x450] sm:$0xff]  ;;  %v6565_v15 = vld [vmem:[#allocation78_spill] sm:$0xff] }
 0x242   : > { %3601 = vmatprep.mubr.f32.mxu1 %v5690_v43  ;;  %v6558_v43 = vld [vmem:[#allocation63_spill] sm:$0xff]  ;;  %v3981_v19 = vpack.c.bf16 %v2220_v22, %v2219_v20 }
 0x243   : > { %vm6559_vm12 = vnez %v6558_v43 }
 0x244   : > { %4258 = vmatmul.mubr.msk.f32.gmra.mrb[72].mxu0 %vm6547_vm2, %v5724_v51  ;;  %v2222_v51 = vld [vmem:[#allocation9 + $0x468] sm:$0xff] }
 0x245   : > { %4254 = vmatmul.mubr.msk.f32.vlgmr.msra.gmra.mrb[4].mxu1 %vm6555_vm10, %v6553_v49  ;;  %2354 = vmatprep.mubr.f32.mxu0 %v2169_v16  ;;  %v3985_v6 = vpack.c.bf16 %v2222_v51, %v2221_v50  ;;  %v4017_v49 = vpack.c.bf16 %v2583_v5, %v2582_v4 }
 0x246   : > { %3964 = vmatpush3.bf16.msra.mxu1 %v3961_v26  ;;  %3604 = vmatprep.mubr.f32.mxu1 %v6556_v1 }
 0x247   : > { %3966 = vmatprep.subr.bf16.mxu1 %v3965_v18 }
 0x248   : > { %2355 = vmatmul.mubr.f32.gmra.mrb[74].mxu0 %v5733_v14  ;;  %v2223_v14 = vld [vmem:[#allocation9 + $0x470] sm:$0xff] }
 0x249   : > { %4256 = vmatmul.mubr.msk.f32.gmra.mrb[6].mxu1 %vm6559_vm12, %v6557_v52  ;;  %2359 = vmatprep.mubr.f32.mxu0 %v2172_v10  ;;  %v3989_v26 = vpack.c.bf16 %v2224_v45, %v2223_v14 }
 0x24a   : > { %3968 = vmatpush3.bf16.msra.mxu1 %v3965_v18  ;;  %3607 = vmatprep.mubr.f32.mxu1 %v6560_v44  ;;  %v4013_v18 = vpack.c.bf16 %v2581_v39, %v2580_v41 }
 0x24b   : > { %3970 = vmatprep.subr.bf16.mxu1 %v3969_v7 }
 0x24c   : > { %4261 = vmatmul.mubr.msk.f32.gmra.mrb[76].mxu0 %vm6574_vm15, %v6572_v0 }
 0x24d   : > { %4257 = vmatmul.mubr.msk.f32.gmra.mrb[8].mxu1 %vm6563_vm1, %v6561_v33  ;;  %2364 = vmatprep.mubr.f32.mxu0 %v2175_v30 }
 0x24e   : > { %3972 = vmatpush3.bf16.msra.mxu1 %v3969_v7  ;;  %3610 = vmatprep.mubr.f32.mxu1 %v6564_v36 }
 0x24f   : > { %3974 = vmatprep.subr.bf16.mxu1 %v3973_v13 }
 0x250   : > { %2365 = vmatmul.mubr.f32.gmra.mrb[78].mxu0 %v5747_v55  ;;  %v2570_v55 = vld [vmem:[#allocation11] sm:$0xff] }
 0x251   : > { %4259 = vmatmul.mubr.msk.f32.gmra.mrb[10].mxu1 %vm6567_vm13, %v6565_v15 }
 0x252   : > { %3976 = vmatpush3.bf16.msra.mxu1 %v3973_v13  ;;  %3613 = vmatprep.mubr.f32.mxu1 %v6568_v31  ;;  %v2584_v13 = vld [vmem:[#allocation11 + $0x70] sm:$0xff] }
 0x253   : > { %3978 = vmatprep.subr.bf16.mxu1 %v3977_v62  ;;  %v4021_v33 = vpack.c.bf16 %v2585_v34, %v2584_v13 }
 0x255   : > { %4260 = vmatmul.mubr.msk.f32.gmra.mrb[12].mxu1 %vm5343_vm11, %v6569_v21 }
 0x256   : > { %3980 = vmatpush3.bf16.msra.mxu1 %v3977_v62  ;;  %3616 = vmatprep.mubr.f32.mxu1 %v6571_v9 }
 0x257   : > { %3982 = vmatprep.subr.bf16.mxu1 %v3981_v19 }
 0x259   : > { %4262 = vmatmul.mubr.msk.f32.gmra.mrb[14].mxu1 %vm6577_vm9, %v6575_v11 }
 0x25a   : > { %3984 = vmatpush3.bf16.msra.mxu1 %v3981_v19  ;;  %3619 = vmatprep.mubr.f32.mxu1 %v6578_v37 }
 0x25b   : > { %3986 = vmatprep.subr.bf16.mxu1 %v3985_v6 }
 0x25d   : > { %4263 = vmatmul.mubr.msk.f32.gmra.mrb[16].mxu1 %vm5480_vm4, %v5656_v38 }
 0x25e   : > { %3988 = vmatpush3.bf16.msra.mxu1 %v3985_v6  ;;  %3622 = vmatprep.mubr.f32.mxu1 %v5659_v28 }
 0x25f   : > { %3990 = vmatprep.subr.bf16.mxu1 %v3989_v26 }
 0x261   : > { %4264 = vmatmul.mubr.msk.f32.gmra.mrb[18].mxu1 %vm5555_vm7, %v5718_v2 }
 0x262   : > { %3992 = vmatpush3.bf16.msra.mxu1 %v3989_v26  ;;  %3657 = vmatprep.mubr.f32.mxu1 %v2131_v61 }
 0x265   : > { %3658 = vmatmul.mubr.f32.vlgmr.msra.gmra.mrb[4].mxu1 %v2134_v47 }
 0x266   : > { %3660 = vmatprep.mubr.f32.mxu1 %v6564_v36 }
 0x269   : > { %4265 = vmatmul.mubr.msk.f32.gmra.mrb[6].mxu1 %vm6567_vm13, %v6565_v15 }
 0x26a   : > { %3663 = vmatprep.mubr.f32.mxu1 %v6568_v31 }
 0x26d   : > { %4266 = vmatmul.mubr.msk.f32.gmra.mrb[8].mxu1 %vm5343_vm11, %v6569_v21  ;;  %vm6581_vm11 = vnez %v6580_v23 }
 0x26e   : > { %3666 = vmatprep.mubr.f32.mxu1 %v6571_v9 }
 0x271   : > { %4267 = vmatmul.mubr.msk.f32.gmra.mrb[10].mxu1 %vm6577_vm9, %v6575_v11 }
 0x272   : > { %3669 = vmatprep.mubr.f32.mxu1 %v6578_v37 }
 0x275   : > { %4268 = vmatmul.mubr.msk.f32.gmra.mrb[12].mxu1 %vm5480_vm4, %v5656_v38  ;;  %v3993_v38 = vpack.c.bf16 %v2571_v53, %v2570_v55 }
 0x276   : > { %3672 = vmatprep.mubr.f32.mxu1 %v5659_v28  ;;  %v2572_v28 = vld [vmem:[#allocation11 + $0x10] sm:$0xff] }
 0x277   : > { %3994 = vmatprep.subr.bf16.mxu0 %v3993_v38 }
 0x278   : > { %3996 = vmatpush3.bf16.msra.mxu0 %v3993_v38 }
 0x279   : > { %4269 = vmatmul.mubr.msk.f32.gmra.mrb[14].mxu1 %vm5555_vm7, %v5718_v2  ;;  %v3997_v2 = vpack.c.bf16 %v2573_v25, %v2572_v28 }
 0x27a   : > { %3675 = vmatprep.mubr.f32.mxu1 %v5721_v8  ;;  %v2574_v8 = vld [vmem:[#allocation11 + $0x20] sm:$0xff] }
 0x27b   : > { %3998 = vmatprep.subr.bf16.mxu0 %v3997_v2  ;;  %v4001_v56 = vpack.c.bf16 %v2575_v48, %v2574_v8 }
 0x27c   : > { %4000 = vmatpush3.bf16.msra.mxu0 %v3997_v2 }
 0x27d   : > { %4270 = vmatmul.mubr.msk.f32.gmra.mrb[16].mxu1 %vm5531_vm5, %v5702_v27  ;;  %4002 = vmatprep.subr.bf16.mxu0 %v4001_v56  ;;  %v2576_v27 = vld [vmem:[#allocation11 + $0x30] sm:$0xff] }
 0x27e   : > { %3678 = vmatprep.mubr.f32.mxu1 %v5756_v60  ;;  %v2577_v60 = vld [vmem:[#allocation11 + $0x38] sm:$0xff] }
 0x27f   : > { %v4005_v59 = vpack.c.bf16 %v2577_v60, %v2576_v27 }
 0x280   : > { %4004 = vmatpush3.bf16.msra.mxu0 %v4001_v56 }
 0x281   : > { %4271 = vmatmul.mubr.msk.f32.gmra.mrb[18].mxu1 %vm6581_vm11, %v5761_v29  ;;  %4006 = vmatprep.subr.bf16.mxu0 %v4005_v59  ;;  %v2579_v29 = vld [vmem:[#allocation11 + $0x48] sm:$0xff] }
 0x282   : > { %v4009_v32 = vpack.c.bf16 %v2579_v29, %v2578_v54 }
 0x284   : > { %4008 = vmatpush3.bf16.msra.mxu0 %v4005_v59 }
 0x285   : > { %4010 = vmatprep.subr.bf16.mxu0 %v4009_v32 }
 0x288   : > { %4012 = vmatpush3.bf16.msra.mxu0 %v4009_v32 }
 0x289   : > { %4014 = vmatprep.subr.bf16.mxu0 %v4013_v18 }
 0x28c   : > { %4016 = vmatpush3.bf16.msra.mxu0 %v4013_v18 }
 0x28d   : > { %4018 = vmatprep.subr.bf16.mxu0 %v4017_v49 }
 0x290   : > { %4020 = vmatpush3.bf16.msra.mxu0 %v4017_v49 }
 0x291   : > { %4022 = vmatprep.subr.bf16.mxu0 %v4021_v33 }
 0x294   : > { %4024 = vmatpush3.bf16.msra.mxu0 %v4021_v33 }
 0x29c   : > { %v3083_v58 = vpop.f32.mrb[16].mxu0 }
 0x29d   : > { %v3084_v1 = vpop.f32.mrb[17].mxu0 }
 0x29e   : > { %v3085_v46 = vadd.f32 %v3084_v1, %v3083_v58 }
 0x2a0   : > { %v3086_v7 = vpop.f32.mrb[18].mxu0 }
 0x2a1   : > { %v3087_v42 = vpop.f32.mrb[19].mxu0 }
 0x2a2   : > { %v3088_v57 = vadd.f32 %v3087_v42, %v3086_v7 }
 0x2a9   : > { %v3089_v52 = vpop.f32.mrb[20].mxu0 }
 0x2aa   : > { %v3090_v43 = vpop.f32.mrb[21].mxu0 }
 0x2ab   : > { %v3091_v44 = vadd.f32 %v3090_v43, %v3089_v52 }
 0x2af   : > { %v3092_v40 = vpop.f32.mrb[22].mxu0 }
 0x2b0   : > { %v3093_v24 = vpop.f32.mrb[23].mxu0 }
 0x2b1   : > { %v3094_v36 = vadd.f32 %v3093_v24, %v3092_v40 }
 0x2b3   : > { %v3095_v16 = vpop.f32.mrb[24].mxu0 }
 0x2b4   : > { %v3096_v62 = vpop.f32.mrb[25].mxu0 }
 0x2b5   : > { %v3097_v20 = vadd.f32 %v3096_v62, %v3095_v16 }
 0x2b8   : > { %v3098_v22 = vpop.f32.mrb[26].mxu0 }
 0x2b9   : > { %v3099_v15 = vpop.f32.mrb[27].mxu0 }
 0x2ba   : > { %v3100_v35 = vadd.f32 %v3099_v15, %v3098_v22 }
 0x2bc   : > { %v3101_v31 = vpop.f32.mrb[28].mxu0 }
 0x2bd   : > { %v3102_v10 = vpop.f32.mrb[29].mxu0 }
 0x2be   : > { %v3103_v19 = vadd.f32 %v3102_v10, %v3101_v31 }
 0x2c1   : > { %v3104_v50 = vpop.f32.mrb[30].mxu0 }
 0x2c2   : > { %v3105_v51 = vpop.f32.mrb[31].mxu0 }
 0x2c3   : > { %v3106_v21 = vadd.f32 %v3105_v51, %v3104_v50 }
 0x2c6   : > { %v3107_v3 = vpop.f32.mrb[32].mxu0 }
 0x2c7   : > { %v3108_v9 = vpop.f32.mrb[33].mxu0 }
 0x2c8   : > { %v5944_v0 = vadd.f32 %v3108_v9, %v3107_v3 }
 0x2cb   : > { %v3110_v17 = vpop.f32.mrb[34].mxu0 }
 0x2cc   : > { %v3111_v30 = vpop.f32.mrb[35].mxu0 }
 0x2cd   : > { %v5946_v14 = vadd.f32 %v3111_v30, %v3110_v17 }
 0x2cf   : > { %v3113_v63 = vpop.f32.mrb[36].mxu0 }
 0x2d0   : > { %v3114_v37 = vpop.f32.mrb[37].mxu0 }
 0x2d1   : > { %v5948_v61 = vadd.f32 %v3114_v37, %v3113_v63 }
 0x2d3   : > { %v3116_v53 = vpop.f32.mrb[38].mxu0 }
 0x2d4   : > { %v3117_v23 = vpop.f32.mrb[39].mxu0 }
 0x2d5   : > { %v5950_v25 = vadd.f32 %v3117_v23, %v3116_v53 }
 0x2d7   : > { %v3119_v48 = vpop.f32.mrb[40].mxu0 }
 0x2d8   : > { %v3195_v6 = vpop.f32.mrb[20].mxu1  ;;  %v3120_v56 = vpop.f32.mrb[41].mxu0 }
 0x2d9   : > { %v3196_v45 = vpop.f32.mrb[21].mxu1  ;;  %v5952_v59 = vadd.f32 %v3120_v56, %v3119_v48 }
 0x2da   : > { %v3197_v11 = vadd.f32 %v3196_v45, %v3195_v6 }
 0x2db   : > { %v3122_v32 = vpop.f32.mrb[42].mxu0 }
 0x2dc   : > { %v4028_v26 = vadd.f32 %v3197_v11, %v3085_v46  ;;  %v3198_v12 = vpop.f32.mrb[22].mxu1  ;;  %v3123_v41 = vpop.f32.mrb[43].mxu0 }
 0x2dd   : > { %v3199_v47 = vpop.f32.mrb[23].mxu1  ;;  %v5954_v4 = vadd.f32 %v3123_v41, %v3122_v32 }
 0x2de   : > { %v3200_v55 = vadd.f32 %v3199_v47, %v3198_v12 }
 0x2df   : > { %v3125_v58 = vpop.f32.mrb[44].mxu0 }
 0x2e0   : > { %v4025_v38 = vadd.f32 %v3200_v55, %v3088_v57  ;;  %v3201_v28 = vpop.f32.mrb[24].mxu1  ;;  %v3126_v1 = vpop.f32.mrb[45].mxu0 }
 0x2e1   : > { %v3202_v2 = vpop.f32.mrb[25].mxu1  ;;  %v5956_v42 = vadd.f32 %v3126_v1, %v3125_v58 }
 0x2e2   : > { %v3203_v8 = vadd.f32 %v3202_v2, %v3201_v28 }
 0x2e3   : > { %v3128_v43 = vpop.f32.mrb[46].mxu0 }
 0x2e4   : > { %v4034_v27 = vadd.f32 %v3203_v8, %v3091_v44  ;;  %v3204_v60 = vpop.f32.mrb[26].mxu1  ;;  %v3129_v44 = vpop.f32.mrb[47].mxu0 }
 0x2e5   : > { %v3205_v54 = vpop.f32.mrb[27].mxu1  ;;  %v5958_v40 = vadd.f32 %v3129_v44, %v3128_v43 }
 0x2e6   : > { %v3206_v29 = vadd.f32 %v3205_v54, %v3204_v60 }
 0x2e8   : > { %v4031_v39 = vadd.f32 %v3206_v29, %v3094_v36  ;;  %v3207_v18 = vpop.f32.mrb[28].mxu1  ;;  %v3307_v36 = vpop.f32.mrb[48].mxu0 }
 0x2e9   : > { %v3208_v5 = vpop.f32.mrb[29].mxu1  ;;  %v3308_v16 = vpop.f32.mrb[49].mxu0 }
 0x2ea   : > { %v3209_v49 = vadd.f32 %v3208_v5, %v3207_v18  ;;  %v3309_v15 = vadd.f32 %v3308_v16, %v3307_v36 }
 0x2eb   : > { %v3310_v10 = vpop.f32.mrb[50].mxu0 }
 0x2ec   : > { %v4040_v46 = vadd.f32 %v3209_v49, %v3097_v20  ;;  %v3210_v7 = vpop.f32.mrb[30].mxu1  ;;  %v5960_v50 = vadd.f32 %v4028_v26, %v3309_v15  ;;  %v3311_v51 = vpop.f32.mrb[51].mxu0 }
 0x2ed   : > { %v3211_v57 = vpop.f32.mrb[31].mxu1  ;;  %v3312_v17 = vadd.f32 %v3311_v51, %v3310_v10 }
 0x2ee   : > { %v3212_v52 = vadd.f32 %v3211_v57, %v3210_v7 }
 0x2ef   : > { %v3313_v6 = vpop.f32.mrb[52].mxu0  ;;  %v5962_v45 = vadd.f32 %v4025_v38, %v3312_v17 }
 0x2f0   : > { %v4037_v13 = vadd.f32 %v3212_v52, %v3100_v35  ;;  %v3213_v34 = vpop.f32.mrb[32].mxu1  ;;  %v3314_v11 = vpop.f32.mrb[53].mxu0 }
 0x2f1   : > { %v3214_v33 = vpop.f32.mrb[33].mxu1  ;;  %v3315_v37 = vadd.f32 %v3314_v11, %v3313_v6 }
 0x2f2   : > { %v3215_v24 = vadd.f32 %v3214_v33, %v3213_v34 }
 0x2f3   : > { %v3316_v55 = vpop.f32.mrb[54].mxu0  ;;  %v5965_v53 = vadd.f32 %v4034_v27, %v3315_v37 }
 0x2f4   : > { %v4046_v62 = vadd.f32 %v3215_v24, %v3103_v19  ;;  %v3216_v22 = vpop.f32.mrb[34].mxu1  ;;  %v3317_v26 = vpop.f32.mrb[55].mxu0 }
 0x2f5   : > { %v3217_v31 = vpop.f32.mrb[35].mxu1  ;;  %v3318_v28 = vadd.f32 %v3317_v26, %v3316_v55 }
 0x2f6   : > { %v3218_v20 = vadd.f32 %v3217_v31, %v3216_v22 }
 0x2f7   : > { %v3319_v48 = vpop.f32.mrb[56].mxu0  ;;  %v5968_v38 = vadd.f32 %v4031_v39, %v3318_v28 }
 0x2f8   : > { %v4043_v3 = vadd.f32 %v3218_v20, %v3106_v21  ;;  %v3219_v9 = vpop.f32.mrb[36].mxu1  ;;  %v3320_v56 = vpop.f32.mrb[57].mxu0 }
 0x2f9   : > { %v3220_v35 = vpop.f32.mrb[37].mxu1  ;;  %v3321_v54 = vadd.f32 %v3320_v56, %v3319_v48 }
 0x2fa   : > { %v3221_v30 = vadd.f32 %v3220_v35, %v3219_v9 }
 0x2fb   : > { %v3322_v41 = vpop.f32.mrb[58].mxu0  ;;  %v5971_v27 = vadd.f32 %v4040_v46, %v3321_v54 }
 0x2fc   : > { %v4052_v63 = vadd.f32 %v3221_v30, %v5944_v0  ;;  %v3222_v19 = vpop.f32.mrb[38].mxu1  ;;  %v3323_v18 = vpop.f32.mrb[59].mxu0 }
 0x2fd   : > { %v3223_v12 = vpop.f32.mrb[39].mxu1  ;;  %v3324_v49 = vadd.f32 %v3323_v18, %v3322_v41 }
 0x2fe   : > { %v3224_v47 = vadd.f32 %v3223_v12, %v3222_v19 }
 0x2ff   : > { %v3325_v7 = vpop.f32.mrb[60].mxu0  ;;  %v5974_v39 = vadd.f32 %v4037_v13, %v3324_v49 }
 0x300   : > { %v4049_v21 = vadd.f32 %v3224_v47, %v5946_v14  ;;  %v3225_v23 = vpop.f32.mrb[40].mxu1  ;;  %v3326_v57 = vpop.f32.mrb[61].mxu0 }
 0x301   : > { %v3226_v2 = vpop.f32.mrb[41].mxu1  ;;  %v3327_v43 = vadd.f32 %v3326_v57, %v3325_v7 }
 0x302   : > { %v3227_v8 = vadd.f32 %v3226_v2, %v3225_v23 }
 0x303   : > { %v3328_v33 = vpop.f32.mrb[62].mxu0  ;;  %v5977_v46 = vadd.f32 %v4046_v62, %v3327_v43 }
 0x304   : > { %v4058_v0 = vadd.f32 %v3227_v8, %v5948_v61  ;;  %v3228_v60 = vpop.f32.mrb[42].mxu1  ;;  %v3329_v24 = vpop.f32.mrb[63].mxu0 }
 0x305   : > { %v3229_v29 = vpop.f32.mrb[43].mxu1  ;;  %v3330_v16 = vadd.f32 %v3329_v24, %v3328_v33 }
 0x306   : > { %v3230_v32 = vadd.f32 %v3229_v29, %v3228_v60 }
 0x307   : > { %v3331_v31 = vpop.f32.mrb[64].mxu0  ;;  %v5980_v13 = vadd.f32 %v4043_v3, %v3330_v16 }
 0x308   : > { %v4055_v14 = vadd.f32 %v3230_v32, %v5950_v25  ;;  %v3231_v5 = vpop.f32.mrb[44].mxu1  ;;  %v3332_v20 = vpop.f32.mrb[65].mxu0 }
 0x309   : > { %v3232_v58 = vpop.f32.mrb[45].mxu1  ;;  %v3333_v51 = vadd.f32 %v3332_v20, %v3331_v31 }
 0x30a   : > { %v3233_v1 = vadd.f32 %v3232_v58, %v3231_v5  ;;  %v6001_v5 = vld [vmem:[%s6582_s9] ss:$0 sm:$0xff] }
 0x30b   : > { %v3334_v35 = vpop.f32.mrb[66].mxu0  ;;  %v5983_v62 = vadd.f32 %v4052_v63, %v3333_v51 }
 0x30c   : > { %v4064_v61 = vadd.f32 %v3233_v1, %v5952_v59  ;;  %v3234_v52 = vpop.f32.mrb[46].mxu1  ;;  %v3335_v30 = vpop.f32.mrb[67].mxu0 }
 0x30d   : > { %v3235_v44 = vpop.f32.mrb[47].mxu1  ;;  %v3336_v6 = vadd.f32 %v3335_v30, %v3334_v35 }
 0x30e   : > { %v3236_v34 = vadd.f32 %v3235_v44, %v3234_v52 }
 0x30f   : > { %v3337_v11 = vpop.f32.mrb[68].mxu0  ;;  %v4050_v19 = vadd.f32 %v4049_v21, %v3336_v6 }
 0x310   : > { %v4061_v25 = vadd.f32 %v3236_v34, %v5954_v4  ;;  %v3237_v36 = vpop.f32.mrb[48].mxu1  ;;  %v3338_v37 = vpop.f32.mrb[69].mxu0 }
 0x311   : > { %v3238_v22 = vpop.f32.mrb[49].mxu1  ;;  %v3339_v12 = vadd.f32 %v3338_v37, %v3337_v11 }
 0x312   : > { %v3239_v15 = vadd.f32 %v3238_v22, %v3237_v36 }
 0x313   : > { %v3340_v3 = vpop.f32.mrb[70].mxu0  ;;  %v5986_v47 = vadd.f32 %v4058_v0, %v3339_v12 }
 0x314   : > { %v4070_v59 = vadd.f32 %v3239_v15, %v5956_v42  ;;  %v3240_v10 = vpop.f32.mrb[50].mxu1  ;;  %v3341_v55 = vpop.f32.mrb[71].mxu0 }
 0x315   : > { %v3241_v9 = vpop.f32.mrb[51].mxu1  ;;  %v3342_v42 = vadd.f32 %v3341_v55, %v3340_v3 }
 0x316   : > { %v3242_v17 = vadd.f32 %v3241_v9, %v3240_v10 }
 0x317   : > { %v3343_v26 = vpop.f32.mrb[72].mxu0  ;;  %v5988_v23 = vadd.f32 %v4055_v14, %v3342_v42 }
 0x318   : > { %v4067_v4 = vadd.f32 %v3242_v17, %v5958_v40  ;;  %v3344_v28 = vpop.f32.mrb[73].mxu0 }
 0x319   : > { %v3345_v2 = vadd.f32 %v3344_v28, %v3343_v26 }
 0x31b   : > { %v3346_v63 = vpop.f32.mrb[74].mxu0  ;;  %v5990_v8 = vadd.f32 %v4064_v61, %v3345_v2 }
 0x31c   : > { %v3347_v48 = vpop.f32.mrb[75].mxu0 }
 0x31d   : > { %v3348_v40 = vadd.f32 %v3347_v48, %v3346_v63 }
 0x31f   : > { %v3349_v56 = vpop.f32.mrb[76].mxu0  ;;  %v5992_v60 = vadd.f32 %v4061_v25, %v3348_v40 }
 0x320   : > { %v3350_v21 = vpop.f32.mrb[77].mxu0 }
 0x321   : > { %v3351_v54 = vadd.f32 %v3350_v21, %v3349_v56 }
 0x323   : > { %v3352_v29 = vpop.f32.mrb[78].mxu0  ;;  %v5994_v0 = vadd.f32 %v4070_v59, %v3351_v54 }
 0x324   : > { %v3353_v32 = vpop.f32.mrb[79].mxu0 }
 0x325   : > { %v3354_v41 = vadd.f32 %v3353_v32, %v3352_v29 }
 0x327   : > { %v5996_v18 = vadd.f32 %v4067_v4, %v3354_v41 }
 0x338   : > { %v3659_v14 = vpop.f32.mrb[4].mxu1 }
 0x339   : > { %v4027_v49 = vadd.f32 %v5962_v45, %v3659_v14  ;;  %v2436_v58 = vpop.f32.mrb[5].mxu1 }
 0x33a   : > { %v4030_v1 = vadd.f32 %v5960_v50, %v2436_v58 }
 0x33b   : > { %v2539_v7 = vadd.f32 %v4027_v49, %v6001_v5 }
 0x33c   : > { %v2538_v57 = vadd.f32 %v4030_v1, %v6001_v5  ;;  %v3662_v61 = vpop.f32.mrb[6].mxu1 }
 0x33d   : > { %v4033_v52 = vadd.f32 %v5968_v38, %v3662_v61  ;;  %v2446_v43 = vpop.f32.mrb[7].mxu1  ;;  %v2555_v33 = vmax.f32 %v2539_v7, 0.0 }
 0x33e   : > { %v2554_v44 = vmax.f32 %v2538_v57, 0.0  ;;  %v4036_v34 = vadd.f32 %v5965_v53, %v2446_v43 }
 0x33f   : > { %v2541_v24 = vadd.f32 %v4033_v52, %v6001_v5 }
 0x340   : > { %v2540_v25 = vadd.f32 %v4036_v34, %v6001_v5  ;;  %v3665_v45 = vpop.f32.mrb[8].mxu1  ;;  %3713 = vmatprep.mubr.f32.mxu0 %v2554_v44  ;;  %v2741_v34 = vld [vmem:[%s4876_s21 + $0x18] sm:$0xff] }
 0x341   : > { %v4039_v50 = vadd.f32 %v5974_v39, %v3665_v45  ;;  %v2456_v36 = vpop.f32.mrb[9].mxu1  ;;  %3714 = vmatmul.mubr.f32.vlgmr.msra.gmra.mrb[80].mxu0 %v2555_v33  ;;  %v2557_v15 = vmax.f32 %v2541_v24, 0.0  ;;  %v2740_v45 = vld [vmem:[%s4876_s21 + $0x10] sm:$0xff] }
 0x342   : > { %v2556_v16 = vmax.f32 %v2540_v25, 0.0  ;;  %v4042_v22 = vadd.f32 %v5971_v27, %v2456_v36 }
 0x343   : > { %v2543_v38 = vadd.f32 %v4039_v50, %v6001_v5 }
 0x344   : > { %v2542_v31 = vadd.f32 %v4042_v22, %v6001_v5  ;;  %v3668_v53 = vpop.f32.mrb[10].mxu1  ;;  %3716 = vmatprep.mubr.f32.mxu0 %v2556_v16 }
 0x345   : > { %v4045_v20 = vadd.f32 %v5980_v13, %v3668_v53  ;;  %v2466_v59 = vpop.f32.mrb[11].mxu1  ;;  %3717 = vmatmul.mubr.f32.gmra.mrb[82].mxu0 %v2557_v15  ;;  %v2559_v39 = vmax.f32 %v2543_v38, 0.0  ;;  %v2743_v38 = vld [vmem:[%s4876_s21 + $0x28] sm:$0xff] }
 0x346   : > { %v2558_v10 = vmax.f32 %v2542_v31, 0.0  ;;  %v4048_v51 = vadd.f32 %v5977_v46, %v2466_v59  ;;  %v2742_v59 = vld [vmem:[%s4876_s21 + $0x20] sm:$0xff] }
 0x347   : > { %v2545_v9 = vadd.f32 %v4045_v20, %v6001_v5 }
 0x348   : > { %v2544_v17 = vadd.f32 %v4048_v51, %v6001_v5  ;;  %v3671_v27 = vpop.f32.mrb[12].mxu1  ;;  %3719 = vmatprep.mubr.f32.mxu0 %v2558_v10 }
 0x349   : > { %v4051_v35 = vadd.f32 %v4050_v19, %v3671_v27  ;;  %v2476_v30 = vpop.f32.mrb[13].mxu1  ;;  %3720 = vmatmul.mubr.f32.gmra.mrb[84].mxu0 %v2559_v39  ;;  %v2561_v11 = vmax.f32 %v2545_v9, 0.0  ;;  %v2745_v27 = vld [vmem:[%s4876_s21 + $0x38] sm:$0xff] }
 0x34a   : > { %v2560_v4 = vmax.f32 %v2544_v17, 0.0  ;;  %v4054_v6 = vadd.f32 %v5983_v62, %v2476_v30 }
 0x34b   : > { %v2547_v13 = vadd.f32 %v4051_v35, %v6001_v5 }
 0x34c   : > { %v2546_v37 = vadd.f32 %v4054_v6, %v6001_v5  ;;  %v3674_v12 = vpop.f32.mrb[14].mxu1  ;;  %3722 = vmatprep.mubr.f32.mxu0 %v2560_v4  ;;  %v2744_v6 = vld [vmem:[%s4876_s21 + $0x30] sm:$0xff] }
 0x34d   : > { %v4057_v46 = vadd.f32 %v5988_v23, %v3674_v12  ;;  %v2486_v3 = vpop.f32.mrb[15].mxu1  ;;  %3723 = vmatmul.mubr.f32.gmra.mrb[86].mxu0 %v2561_v11  ;;  %v2563_v19 = vmax.f32 %v2547_v13, 0.0 }
 0x34e   : > { %v2562_v55 = vmax.f32 %v2546_v37, 0.0  ;;  %v4060_v42 = vadd.f32 %v5986_v47, %v2486_v3  ;;  %v2747_v3 = vld [vmem:[%s4876_s21 + $0x48] sm:$0xff] }
 0x34f   : > { %v2549_v26 = vadd.f32 %v4057_v46, %v6001_v5 }
 0x350   : > { %v2548_v28 = vadd.f32 %v4060_v42, %v6001_v5  ;;  %v3677_v62 = vpop.f32.mrb[16].mxu1  ;;  %3725 = vmatprep.mubr.f32.mxu0 %v2562_v55 }
 0x351   : > { %v4063_v2 = vadd.f32 %v5992_v60, %v3677_v62  ;;  %v2496_v63 = vpop.f32.mrb[17].mxu1  ;;  %3726 = vmatmul.mubr.f32.gmra.mrb[88].mxu0 %v2563_v19  ;;  %v2565_v23 = vmax.f32 %v2549_v26, 0.0  ;;  %v2746_v26 = vld [vmem:[%s4876_s21 + $0x40] sm:$0xff] }
 0x352   : > { %v2564_v48 = vmax.f32 %v2548_v28, 0.0  ;;  %v4066_v40 = vadd.f32 %v5990_v8, %v2496_v63 }
 0x353   : > { %v2551_v56 = vadd.f32 %v4063_v2, %v6001_v5 }
 0x354   : > { %v2550_v21 = vadd.f32 %v4066_v40, %v6001_v5  ;;  %v3680_v47 = vpop.f32.mrb[18].mxu1  ;;  %3728 = vmatprep.mubr.f32.mxu0 %v2564_v48  ;;  %v2749_v40 = vld [vmem:[%s4876_s21 + $0x58] sm:$0xff] }
 0x355   : > { %v4069_v54 = vadd.f32 %v5996_v18, %v3680_v47  ;;  %v2506_v29 = vpop.f32.mrb[19].mxu1  ;;  %3729 = vmatmul.mubr.f32.gmra.mrb[90].mxu0 %v2565_v23  ;;  %v2567_v41 = vmax.f32 %v2551_v56, 0.0  ;;  %v6037_v18 = vld [vmem:[%s6583_s6] ss:$0 sm:$0xff] }
 0x356   : > { %v2566_v32 = vmax.f32 %v2550_v21, 0.0  ;;  %v4072_v60 = vadd.f32 %v5994_v0, %v2506_v29  ;;  %v2739_v0 = vld [vmem:[%s4876_s21 + $0x8] sm:$0xff]  ;;  %v2748_v47 = vld [vmem:[%s4876_s21 + $0x50] sm:$0xff] }
 0x357   : > { %v2553_v14 = vadd.f32 %v4069_v54, %v6001_v5 }
 0x358   : > { %v2552_v8 = vadd.f32 %v4072_v60, %v6001_v5  ;;  %3731 = vmatprep.mubr.f32.mxu0 %v2566_v32  ;;  %v2738_v5 = vld [vmem:[%s4876_s21] sm:$0xff] }
 0x359   : > { %3732 = vmatmul.mubr.f32.gmra.mrb[92].mxu0 %v2567_v41  ;;  %v2569_v58 = vmax.f32 %v2553_v14, 0.0  ;;  %v2751_v14 = vld [vmem:[%s4876_s21 + $0x68] sm:$0xff] }
 0x35a   : > { %v2568_v49 = vmax.f32 %v2552_v8, 0.0 }
 0x35c   : > { %3734 = vmatprep.mubr.f32.mxu0 %v2568_v49 }
 0x35d   : > { %3735 = vmatmul.mubr.f32.gmra.mrb[94].mxu0 %v2569_v58 }
 0x414   : > { %v3715_v1 = vpop.f32.mrb[80].mxu0 }
 0x415   : > { %v2665_v7 = vadd.f32 %v3715_v1, %v6037_v18  ;;  %v2659_v57 = vpop.f32.mrb[81].mxu0  ;;  %v2750_v1 = vld [vmem:[%s4876_s21 + $0x60] sm:$0xff] }
 0x416   : > { %v2660_v61 = vadd.f32 %v6037_v18, %v2659_v57 }
 0x417   : > { %v2755_v52 = vadd.f32 %v2739_v0, %v2665_v7 }
 0x418   : > { %v2754_v43 = vadd.f32 %v2738_v5, %v2660_v61  ;;  %v3718_v44 = vpop.f32.mrb[82].mxu0 }
 0x419   : > { %v2771_v33 = vmax.f32 %v2755_v52, 0.0  ;;  %v2675_v24 = vadd.f32 %v3718_v44, %v6037_v18  ;;  %v2669_v25 = vpop.f32.mrb[83].mxu0  ;;  %v2753_v52 = vld [vmem:[%s4876_s21 + $0x78] sm:$0xff] }
 0x41a   : > { %v2770_v50 = vmax.f32 %v2754_v43, 0.0  ;;  %v2670_v36 = vadd.f32 %v6037_v18, %v2669_v25 }
 0x41b   : > { %2787 = vst [vmem:[%s6049_s19 + $0x8] sm:$0xff] %v2771_v33  ;;  %v2757_v16 = vadd.f32 %v2741_v34, %v2675_v24  ;;  %v2752_v33 = vld [vmem:[%s4876_s21 + $0x70] sm:$0xff]  ;;  %s2803_s21 = scalar_lea.sflag [#allocation5], %s4870_s27 }
 0x41c   : > { %2786 = vst [vmem:[%s6049_s19] sm:$0xff] %v2770_v50  ;;  %v2756_v22 = vadd.f32 %v2740_v45, %v2670_v36  ;;  %v3721_v15 = vpop.f32.mrb[84].mxu0 }
 0x41d   : > { %v2773_v31 = vmax.f32 %v2757_v16, 0.0  ;;  %v2685_v53 = vadd.f32 %v3721_v15, %v6037_v18  ;;  %v2679_v20 = vpop.f32.mrb[85].mxu0 }
 0x41e   : > { %v2772_v10 = vmax.f32 %v2756_v22, 0.0  ;;  %v2680_v51 = vadd.f32 %v6037_v18, %v2679_v20 }
 0x41f   : > { %2789 = vst [vmem:[%s6049_s19 + $0x18] sm:$0xff] %v2773_v31  ;;  %v2759_v39 = vadd.f32 %v2743_v38, %v2685_v53 }
 0x420   : > { %2788 = vst [vmem:[%s6049_s19 + $0x10] sm:$0xff] %v2772_v10  ;;  %v2758_v9 = vadd.f32 %v2742_v59, %v2680_v51  ;;  %v3724_v17 = vpop.f32.mrb[86].mxu0 }
 0x421   : > { %v2775_v35 = vmax.f32 %v2759_v39, 0.0  ;;  %v2695_v30 = vadd.f32 %v3724_v17, %v6037_v18  ;;  %v2689_v4 = vpop.f32.mrb[87].mxu0 }
 0x422   : > { %v2774_v11 = vmax.f32 %v2758_v9, 0.0  ;;  %v2690_v13 = vadd.f32 %v6037_v18, %v2689_v4 }
 0x423   : > { %2791 = vst [vmem:[%s6049_s19 + $0x28] sm:$0xff] %v2775_v35  ;;  %v2761_v37 = vadd.f32 %v2745_v27, %v2695_v30 }
 0x424   : > { %2790 = vst [vmem:[%s6049_s19 + $0x20] sm:$0xff] %v2774_v11  ;;  %v2760_v12 = vadd.f32 %v2744_v6, %v2690_v13  ;;  %v3727_v46 = vpop.f32.mrb[88].mxu0 }
 0x425   : > { %v2777_v55 = vmax.f32 %v2761_v37, 0.0  ;;  %v2705_v42 = vadd.f32 %v3727_v46, %v6037_v18  ;;  %v2699_v19 = vpop.f32.mrb[89].mxu0 }
 0x426   : > { %v2776_v28 = vmax.f32 %v2760_v12, 0.0  ;;  %v2700_v62 = vadd.f32 %v6037_v18, %v2699_v19 }
 0x427   : > { %2793 = vst [vmem:[%s6049_s19 + $0x38] sm:$0xff] %v2777_v55  ;;  %v2763_v2 = vadd.f32 %v2747_v3, %v2705_v42 }
 0x428   : > { %2792 = vst [vmem:[%s6049_s19 + $0x30] sm:$0xff] %v2776_v28  ;;  %v2762_v63 = vadd.f32 %v2746_v26, %v2700_v62  ;;  %v3730_v48 = vpop.f32.mrb[90].mxu0 }
 0x429   : > { %v2779_v23 = vmax.f32 %v2763_v2, 0.0  ;;  %v2715_v56 = vadd.f32 %v3730_v48, %v6037_v18  ;;  %v2709_v21 = vpop.f32.mrb[91].mxu0 }
 0x42a   : > { %v2778_v54 = vmax.f32 %v2762_v63, 0.0  ;;  %v2710_v29 = vadd.f32 %v6037_v18, %v2709_v21 }
 0x42b   : > { %2795 = vst [vmem:[%s6049_s19 + $0x48] sm:$0xff] %v2779_v23  ;;  %v2765_v32 = vadd.f32 %v2749_v40, %v2715_v56 }
 0x42c   : > { %2794 = vst [vmem:[%s6049_s19 + $0x40] sm:$0xff] %v2778_v54  ;;  %v2764_v60 = vadd.f32 %v2748_v47, %v2710_v29  ;;  %v3733_v41 = vpop.f32.mrb[92].mxu0 }
 0x42d   : > { %v2781_v8 = vmax.f32 %v2765_v32, 0.0  ;;  %v2725_v49 = vadd.f32 %v3733_v41, %v6037_v18  ;;  %v2719_v58 = vpop.f32.mrb[93].mxu0 }
 0x42e   : > { %v2780_v0 = vmax.f32 %v2764_v60, 0.0  ;;  %v2720_v7 = vadd.f32 %v6037_v18, %v2719_v58 }
 0x42f   : > { %2797 = vst [vmem:[%s6049_s19 + $0x58] sm:$0xff] %v2781_v8  ;;  %v2767_v57 = vadd.f32 %v2751_v14, %v2725_v49 }
 0x430   : > { %2796 = vst [vmem:[%s6049_s19 + $0x50] sm:$0xff] %v2780_v0  ;;  %v2766_v5 = vadd.f32 %v2750_v1, %v2720_v7  ;;  %v3736_v61 = vpop.f32.mrb[94].mxu0 }
 0x431   : > { %v2783_v43 = vmax.f32 %v2767_v57, 0.0  ;;  %v2735_v44 = vadd.f32 %v3736_v61, %v6037_v18  ;;  %v2729_v34 = vpop.f32.mrb[95].mxu0 }
 0x432   : > { %v2782_v24 = vmax.f32 %v2766_v5, 0.0  ;;  %v2730_v25 = vadd.f32 %v6037_v18, %v2729_v34 }
 0x433   : > { %2799 = vst [vmem:[%s6049_s19 + $0x68] sm:$0xff] %v2783_v43  ;;  %v2769_v45 = vadd.f32 %v2753_v52, %v2735_v44 }
 0x434   : > { %2798 = vst [vmem:[%s6049_s19 + $0x60] sm:$0xff] %v2782_v24  ;;  %v2768_v50 = vadd.f32 %v2752_v33, %v2730_v25 }
 0x435   : > { %v2785_v36 = vmax.f32 %v2769_v45, 0.0 }
 0x436   : > { %v2784_v16 = vmax.f32 %v2768_v50, 0.0 }
 0x437   : > { %2801 = vst [vmem:[%s6049_s19 + $0x78] sm:$0xff] %v2785_v36 }
 0x438   : > { %2800 = vst [vmem:[%s6049_s19 + $0x70] sm:$0xff] %v2784_v16 }
 0x439   : > { %4429 = shalt.err (!%p4426_p0)
}
 0x43a   : > { %s4430_s2 = scalar_lea.hbm %s6095_s5, 2048  ;;  %s4434_s18 = scalar_lea.hbm %s6585_s20, 8192 }
 0x43b   : > { %p4431_p9 = scmp.ne.s32.totalorder %s6095_s5, %s4430_s2  ;;  %p4435_p4 = scmp.lt.u32.totalorder %s6095_s5, %s6585_s20 }
 0x43c   : > { %p4436_p8 = scmp.lt.u32.totalorder %s4434_s18, %s4430_s2  ;;  %p4438_p2 = scmp.lt.u32.totalorder %s4430_s2, %s6095_s5 }
 0x43d   : > { %p4432_p11 = pnand %p4431_p9, %p4756_p10 }
 0x43e   : > { %p4437_p12 = por %p4436_p8, %p4435_p4 }
 0x43f   : > { %p4433_p1 = pneg %p4432_p11 }
 0x440   : > { %p4439_p6 = por %p4438_p2, %p4437_p12 }
 0x442   : > { %p4440_p3 = pnand %p4439_p6, %p4433_p1 }
 0x444   : > { %4443 = shalt.err (!%p4440_p3)
}
 0x445   : > { %s4536_s19 = smov 128   ;;  %s4537_s7 = smov 8  }
 0x446   : > { %4121 = dma.vmem_to_hbm [thread:$0]  (%p4756_p10), %s6097_s0, 2048, %s6095_s5, %s2803_s21, %s4536_s19, %s4536_s19, %s4537_s7  }
 0x447 PF: > { %s6586_s26 = sld [smem:[#allocation18_spill]]  ;;  %s6587_s23 = sld [smem:[#allocation20_spill]] }
 0x448   : > { %p4151_p5 = scmp.ge.s32.totalorder %s4526_s12, 2 }
 0x44d   : > { %s2833_s16 = sand.u32 1, %s6586_s26   ;;  %p6588_p7 = scmp.ne.s32.totalorder %s6587_s23, 0 }
 0x44e   : > { %s2834_s30 = scalar_lea.sflag [#allocation5], %s2833_s16 }
 0x44f   : > { %p4141_p13 = pnand %p4151_p5, %p6588_p7 }
 0x451   : > { %4493 = dma.done.wait (!%p4141_p13), %s2834_s30, 2048  }
 0x452   : > { %4495 = vsyncadd (!%p4141_p13), %s2834_s30, 4294965248  ;;  %s28_s12 = sadd.s32 1, %s4526_s12   ;;  %s6589_s24 = sld [smem:[#allocation21_spill]] }
 0x453   : > { %p25_p0 = scmp.ge.s32.totalorder %s28_s12, 6   ;;  %s6590_s0 = sld [smem:[#allocation22_spill]] }
 0x454   : > { %s6591_s27 = smov %s4502_s28  ;;  %s6592_s28 = smov %s4506_s29 }
 0x455   : > { %s6593_s29 = smov %s4781_s4  ;;  %s6594_s30 = smov %s4518_s10 }
 0x456   : > { %s6595_s9 = smov %s4522_s11  ;;  %27 = sbr.rel (!%p25_p0) target bundleno = 18 (0x12), region = 122 }
 0x458   : > { %s6596_s10 = smov %s6589_s24 }
 0x459   : > { %s6597_s11 = smov %s6590_s0 }
 0x45d   :  { %2839 = vsyncpa [#allocation4], 1 }
 0x45e   :  { %2841 = vsyncpa [#allocation4 + $0x1], 1 }
 0x45f   :  { %2842 = vsyncpa [#allocation7], 1 }
 0x460   :  { %2844 = vsyncpa [#allocation7 + $0x1], 1 }
 0x461   :  { %2845 = vsyncpa [#allocation10], 1 }
 0x462   :  { %2846 = vsyncpa [#allocation5], 1 }
 0x463   :  { %2848 = vsyncpa [#allocation5 + $0x1], 1 }

// kernel: tpu_custom_call.1
= control target key start
LH: loop header
LB: loop body
LE: loop exit
PB: predicated region body
PF: predicated region fallthrough
CT: control target
= control target key end

     0   :  { %s6153_s0 = inlined_call_operand.hbm [shape: f32[4,128,128], index: 0, kind: input, shape index: {}]   ;;  %s6154_s1 = inlined_call_operand.hbm [shape: f32[4,32,128], index: 1, kind: input, shape index: {}]   ;;  %s6155_s2 = inlined_call_operand.hbm [shape: f32[128,128], index: 2, kind: input, shape index: {}]   ;;  %s6156_s3 = inlined_call_operand.vmem [shape: f32[1,128], index: 3, kind: input, shape index: {}]   ;;  %s6157_s4 = inlined_call_operand.hbm [shape: f32[1152,128], index: 4, kind: input, shape index: {}]   ;;  %s6158_s5 = inlined_call_operand.vmem [shape: f32[1,128], index: 5, kind: input, shape index: {}]   ;;  %s6159_s6 = inlined_call_operand.hbm [shape: f32[128,128], index: 6, kind: input, shape index: {}]   ;;  %s6160_s7 = inlined_call_operand.vmem [shape: f32[1,128], index: 7, kind: input, shape index: {}]   ;;  %s6161_s8 = inlined_call_operand.hbm [shape: f32[4,128,128], index: 8, kind: output, shape index: {}]  }
   0x1   :  { %6268 = sst [smem:[#allocation84_spill]] %s6153_s0 }
   0x2   :  { %6269 = sst [smem:[#allocation85_spill]] %s6155_s2 }
   0x3   :  { %6270 = sst [smem:[#allocation86_spill]] %s6157_s4 }
   0x4   :  { %6271 = sst [smem:[#allocation87_spill]] %s6158_s5 }
   0x5   :  { %6272 = sst [smem:[#allocation88_spill]] %s6159_s6 }
   0x6   :  { %6273 = sst [smem:[#allocation89_spill]] %s6160_s7 }
   0x7   :  { %6274 = sst [smem:[#allocation90_spill]] %s6161_s8 }
   0x8   :  { %13 = vsyncpa [#allocation4], 0 }
   0x9   :  { %15 = vsyncpa [#allocation4 + $0x1], 0 }
   0xa   :  { %16 = vsyncpa [#allocation7], 0 }
   0xb   :  { %18 = vsyncpa [#allocation7 + $0x1], 0 }
   0xc   :  { %19 = vsyncpa [#allocation10], 0 }
   0xd   :  { %20 = vsyncpa [#allocation5], 0 }
   0xe   :  { %22 = vsyncpa [#allocation5 + $0x1], 0  ;;  %s4583_s27 = smov 0   ;;  %s4585_s28 = smov 0  }
   0xf   :  { %s4587_s29 = smov 0   ;;  %s4589_s30 = smov 0  }
  0x10   :  { %s4591_s9 = smov 0   ;;  %s4593_s10 = smov 0  }
  0x11   :  { %s4595_s11 = smov 0   ;;  %s4597_s12 = smov 0  }
  0x12 LB: > { %6275 = sst [smem:[#allocation18_spill]] %s4498_s27  ;;  %s4624_s13 = sadd.s32 4294967295, %s4526_s12   ;;  %s4526_s12 = sphi %s4597_s12, %s28_s12   ;;  %s4522_s11 = sphi %s4595_s11, %s6597_s11   ;;  %s4518_s10 = sphi %s4593_s10, %s6596_s10   ;;  %s4514_s9 = sphi %s4591_s9, %s6595_s9   ;;  %s4510_s30 = sphi %s4589_s30, %s6594_s30   ;;  %s4506_s29 = sphi %s4587_s29, %s6593_s29   ;;  %s4502_s28 = sphi %s4585_s28, %s6592_s28   ;;  %s4498_s27 = sphi %s4583_s27, %s6591_s27  }
  0x13   : > { %6276 = sst [smem:[#allocation19_spill]] %s4514_s9  ;;  %s2960_s14 = sadd.s32 4294967294, %s4526_s12  }
  0x14   : > { %p64_p0 = scmp.ne.s32.totalorder %s4502_s28, %s4498_s27  ;;  %p6164_p1 = scmp.eq.s32.totalorder %s4624_s13, 0 }
  0x15   : > { %p254_p3 = scmp.eq.s32.totalorder %s2960_s14, 3  ;;  %p2967_p5 = scmp.ge.s32.totalorder %s4526_s12, 1 }
  0x16   : > { %p4633_p4 = por %p6164_p1, %p64_p0  ;;  %p261_p7 = scmp.lt.s32.totalorder %s4526_s12, 5 }
  0x17   : > { %p4638_p6 = por %p254_p3, %p64_p0  ;;  %s4528_s18 = smov [#allocation8]  }
  0x18   : > { %s6277_s15 = scalar_select %p4633_p4, 1, 0 }
  0x19   : > { %s6278_s16 = scalar_select %p4638_p6, 1, 0 }
  0x1a   : > { %p4643_p8 = pnand %p2967_p5, %p261_p7  ;;  %s273_s19 = sshll.u32 %s4528_s18, 4  ;;  %s4647_s19 = int_to_ptr.vmem [resolvable:$true] %s273_s19 }
  0x1b   : > { %6279 = sst [smem:[#allocation20_spill]] %s6278_s16  ;;  %s4529_s21 = smov [#allocation9]  }
  0x1c   : > { %s6280_s17 = scalar_select %p4643_p8, 1, 0 }
  0x1d   : > { %p4123_p9 = pneg %p4643_p8  ;;  %s289_s22 = sshll.u32 %s4529_s21, 4  ;;  %s4657_s22 = int_to_ptr.vmem [resolvable:$true] %s289_s22 }
  0x1e   : > { %s4530_s23 = smov [#allocation11]   ;;  %s6282_s2 = sld [smem:[#allocation85_spill]] }
  0x1f   : > { %p4653_p10 = pnand %p4123_p9, %p6164_p1  ;;  %s4659_s24 = sshll.u32 %s4530_s23, 4  ;;  %s306_s24 = int_to_ptr.vmem [resolvable:$true] %s4659_s24 }
  0x21   : > { %p4669_p12 = pneg %p4653_p10 }
  0x24   : > { %s4272_s14 = scalar_lea.hbm %s6282_s2, 2048 }
  0x25   : > { %p4273_p11 = scmp.ne.s32.totalorder %s6282_s2, %s4272_s14  ;;  %p4279_p3 = scmp.lt.u32.totalorder %s4272_s14, %s6282_s2 }
  0x27   : > { %p4275_p13 = pnand %p4669_p12, %p4273_p11 }
  0x29   : > { %p4276_p0 = pneg %p4275_p13 }
  0x2b   : > { %p4281_p5 = pnand %p4279_p3, %p4276_p0 }
  0x2d   : > { %4284 = shalt.err (!%p4281_p5)
}
  0x2e   : > { %s4285_s16 = scalar_lea.vmem %s4647_s19, 2048  ;;  %p4293_p2 = scmp.lt.s32.totalorder %s4647_s19, %s4647_s19 }
  0x2f   : > { %p4286_p7 = scmp.ne.s32.totalorder %s4647_s19, %s4285_s16  ;;  %p4294_p6 = scmp.lt.s32.totalorder %s4285_s16, %s4285_s16 }
  0x31   : > { %p4288_p9 = pnand %p4286_p7, %p4669_p12  ;;  %p4295_p11 = por %p4294_p6, %p4293_p2 }
  0x33   : > { %p4289_p1 = pneg %p4288_p9 }
  0x35   : > { %p4296_p13 = pnand %p4295_p11, %p4289_p1 }
  0x37   : > { %4299 = shalt.err (!%p4296_p13)
}
  0x38   : > { %s6168_s25 = smov 128   ;;  %s6170_s26 = smov 8  }
  0x39   : > { %4126 = dma.hbm_to_vmem [thread:$0]  (!%p4653_p10), %s6282_s2, 2048, %s4647_s19, [#allocation7], %s6168_s25, %s6168_s25, %s6170_s26  }
  0x3a   : > { %s6284_s4 = sld [smem:[#allocation86_spill]] }
  0x40   : > { %s4300_s16 = scalar_lea.hbm %s6284_s4, 18432 }
  0x41   : > { %p4301_p1 = scmp.ne.s32.totalorder %s6284_s4, %s4300_s16  ;;  %p4307_p0 = scmp.lt.u32.totalorder %s4300_s16, %s6284_s4 }
  0x43   : > { %p4303_p2 = pnand %p4301_p1, %p4669_p12 }
  0x45   : > { %p4304_p6 = pneg %p4303_p2 }
  0x47   : > { %p4309_p3 = pnand %p4307_p0, %p4304_p6 }
  0x49   : > { %4312 = shalt.err (!%p4309_p3)
}
  0x4a   : > { %s4313_s19 = scalar_lea.vmem %s4657_s22, 18432  ;;  %p4321_p11 = scmp.lt.s32.totalorder %s4657_s22, %s4657_s22 }
  0x4b   : > { %p4314_p5 = scmp.ne.s32.totalorder %s4657_s22, %s4313_s19  ;;  %p4322_p13 = scmp.lt.s32.totalorder %s4313_s19, %s4313_s19 }
  0x4d   : > { %p4316_p7 = pnand %p4314_p5, %p4669_p12  ;;  %p4323_p1 = por %p4322_p13, %p4321_p11 }
  0x4f   : > { %p4317_p9 = pneg %p4316_p7 }
  0x51   : > { %p4324_p2 = pnand %p4323_p1, %p4317_p9 }
  0x53   : > { %4327 = shalt.err (!%p4324_p2)
}
  0x54   : > { %4129 = dma.hbm_to_vmem [thread:$0]  (!%p4653_p10), %s6284_s4, 18432, %s4657_s22, [#allocation10], %s6168_s25, %s6168_s25, %s6170_s26  }
  0x55   : > { %s6285_s6 = sld [smem:[#allocation88_spill]] }
  0x5b   : > { %s4328_s14 = scalar_lea.hbm %s6285_s6, 2048 }
  0x5c   : > { %p4329_p6 = scmp.ne.s32.totalorder %s6285_s6, %s4328_s14  ;;  %p4335_p5 = scmp.lt.u32.totalorder %s4328_s14, %s6285_s6 }
  0x5e   : > { %p4331_p0 = pnand %p4329_p6, %p4669_p12 }
  0x60   : > { %p4332_p3 = pneg %p4331_p0 }
  0x62   : > { %p4337_p7 = pnand %p4335_p5, %p4332_p3 }
  0x64   : > { %4340 = shalt.err (!%p4337_p7)
}
  0x65   : > { %s4341_s19 = scalar_lea.vmem %s306_s24, 2048  ;;  %p4349_p1 = scmp.lt.s32.totalorder %s306_s24, %s306_s24 }
  0x66   : > { %p4342_p9 = scmp.ne.s32.totalorder %s306_s24, %s4341_s19  ;;  %p4350_p2 = scmp.lt.s32.totalorder %s4341_s19, %s4341_s19 }
  0x68   : > { %p4344_p11 = pnand %p4342_p9, %p4669_p12  ;;  %p4351_p4 = por %p4350_p2, %p4349_p1 }
  0x6a   : > { %p4345_p13 = pneg %p4344_p11 }
  0x6c   : > { %p4352_p8 = pnand %p4351_p4, %p4345_p13 }
  0x6e   : > { %4355 = shalt.err (!%p4352_p8)
}
  0x6f   : > { %4132 = dma.hbm_to_vmem [thread:$0]  (!%p4653_p10), %s6285_s6, 2048, %s306_s24, [#allocation10], %s6168_s25, %s6168_s25, %s6170_s26  }
  0x70   : > { %s37_s27 = sadd.s32 1, %s4518_s10  ;;  %s40_s20 = sadd.s32 1, %s4522_s11 }
  0x71   : > { %p38_p4 = scmp.ge.s32.totalorder %s37_s27, 2  ;;  %s2961_s7 = sshll.u32 %s4522_s11, 1 }
  0x72   : > { %s51_s8 = sadd.s32 1, %s4506_s29  ;;  %s4749_s9 = sadd.s32 %s4518_s10, %s2961_s7 }
  0x73   : > { %s6599_s27 = smov (%p38_p4, %s37_s27), 0  ;;  %s6601_s20 = smov (!%p38_p4, %s40_s20), %s4522_s11 }
  0x74   : > { %6286 = sst [smem:[#allocation21_spill]] %s6599_s27  ;;  %p58_p8 = scmp.ne.s32.totalorder %s4506_s29, %s4502_s28 }
  0x75   : > { %p42_p12 = scmp.ge.s32.totalorder %s6601_s20, 2  ;;  %p59_p6 = scmp.eq.s32.totalorder %s4526_s12, 0 }
  0x76   : > { %p6287_p0 = scmp.eq.s32.totalorder %s4624_s13, 3  ;;  %p4147_p3 = scmp.lt.s32.totalorder %s4526_s12, 4 }
  0x77   : > { %s6603_s20 = smov (%p42_p12, %s6601_s20), 0  ;;  %p4763_p5 = por %p59_p6, %p58_p8 }
  0x78   : > { %p4756_p10 = por %p6287_p0, %p58_p8  ;;  %6289 = sst [smem:[#allocation22_spill]] %s6603_s20 }
  0x79   : > { %s4768_s18 = sand.u32 1, %s4506_s29   ;;  %s2962_s21 = sshll.u32 %s6603_s20, 1 }
  0x7a   : > { %s47_s23 = sadd.s32 %s2962_s21, %s6599_s27  ;;  %s2972_s16 = sshll.u32 %s4768_s18, 7 }
  0x7b   : > { %s48_s19 = ssub.s32 %s4749_s9, %s47_s23  ;;  %s2996_s22 = sshll.u32 %s4749_s9, 11 }
  0x7c   : > { %p49_p7 = scmp.eq.s32.totalorder %s48_s19, 0  ;;  %s6291_s0 = sld [smem:[#allocation84_spill]] }
  0x7d   : > { %s326_s26 = scalar_lea.vmem [#allocation3], %s2972_s16  ;;  %p4789_p9 = pnand %p4147_p3, %p4763_p5 }
  0x7e   : > { %s335_s2 = sshll.u32 %s326_s26, 4  ;;  %s2976_s19 = sshll.u32 %s4768_s18, 5  ;;  %s4783_s2 = int_to_ptr.vmem [resolvable:$true] %s335_s2 }
  0x7f   : > { %s4781_s4 = scalar_select %p49_p7, %s4506_s29, %s51_s8  }
  0x80   : > { %p4358_p13 = pneg %p4789_p9 }
  0x82   : > { %s4778_s25 = scalar_lea.hbm %s6291_s0, %s2996_s22  ;;  %s323_s22 = scalar_lea.sflag [#allocation4], %s4768_s18 }
  0x83   : > { %s4356_s5 = scalar_lea.hbm %s4778_s25, 2048  ;;  %s4361_s14 = scalar_lea.hbm %s6291_s0, 8192 }
  0x84   : > { %p4357_p11 = scmp.ne.s32.totalorder %s4778_s25, %s4356_s5  ;;  %p4362_p4 = scmp.lt.u32.totalorder %s4778_s25, %s6291_s0 }
  0x85   : > { %p4363_p8 = scmp.lt.u32.totalorder %s4361_s14, %s4356_s5  ;;  %p4365_p6 = scmp.lt.u32.totalorder %s4356_s5, %s4778_s25 }
  0x86   : > { %p4359_p1 = pnand %p4358_p13, %p4357_p11 }
  0x87   : > { %p4364_p12 = por %p4363_p8, %p4362_p4 }
  0x88   : > { %p4360_p2 = pneg %p4359_p1 }
  0x89   : > { %p4366_p0 = por %p4365_p6, %p4364_p12 }
  0x8b   : > { %p4367_p3 = pnand %p4366_p0, %p4360_p2 }
  0x8d   : > { %4370 = shalt.err (!%p4367_p3)
}
  0x8e   : > { %s4371_s23 = scalar_lea.vmem %s4783_s2, 2048  ;;  %s4533_s26 = smov [#allocation3]  }
  0x8f   : > { %p4372_p5 = scmp.ne.s32.totalorder %s4783_s2, %s4371_s23  ;;  %s4376_s8 = sshll.u32 %s4533_s26, 4  ;;  %s4377_s8 = int_to_ptr.vmem [resolvable:$false] %s4376_s8 }
  0x90   : > { %s4378_s16 = scalar_lea.vmem %s4377_s8, 4096  ;;  %p4379_p1 = scmp.lt.s32.totalorder %s4783_s2, %s4377_s8 }
  0x91   : > { %p4374_p7 = pnand %p4372_p5, %p4358_p13  ;;  %p4380_p4 = scmp.lt.s32.totalorder %s4378_s16, %s4371_s23 }
  0x93   : > { %p4375_p11 = pneg %p4374_p7  ;;  %p4381_p8 = por %p4380_p4, %p4379_p1 }
  0x95   : > { %p4382_p12 = pnand %p4381_p8, %p4375_p11 }
  0x97   : > { %4385 = shalt.err (!%p4382_p12)
}
  0x98   : > { %s6293_s5 = smov 8   ;;  %s6294_s14 = smov 128  }
  0x99   : > { %4136 = dma.hbm_to_vmem [thread:$0]  (!%p4789_p9), %s4778_s25, 2048, %s4783_s2, %s323_s22, %s6294_s14, %s6294_s14, %s6293_s5  }
  0x9a   : > { %s2997_s7 = sshll.u32 %s4749_s9, 9  ;;  %s349_s16 = scalar_lea.vmem [#allocation6], %s2976_s19 }
  0x9b   : > { %s4830_s8 = scalar_lea.hbm %s6154_s1, %s2997_s7  ;;  %s358_s0 = sshll.u32 %s349_s16, 4  ;;  %s4834_s0 = int_to_ptr.vmem [resolvable:$true] %s358_s0 }
  0x9c   : > { %s6295_s6 = sand.u32 1, %s4526_s12   ;;  %s4386_s27 = scalar_lea.hbm %s4830_s8, 512 }
  0x9d   : > { %s4838_s20 = scalar_lea.sflag [#allocation7], %s6295_s6  ;;  %p4387_p2 = scmp.ne.s32.totalorder %s4830_s8, %s4386_s27 }
  0x9e   : > { %s4391_s9 = scalar_lea.hbm %s6154_s1, 2048  ;;  %p4392_p3 = scmp.lt.u32.totalorder %s4830_s8, %s6154_s1 }
  0x9f   : > { %p4389_p6 = pnand %p4387_p2, %p4358_p13  ;;  %p4393_p5 = scmp.lt.u32.totalorder %s4391_s9, %s4386_s27 }
  0xa0   : > { %p4395_p11 = scmp.lt.u32.totalorder %s4386_s27, %s4830_s8 }
  0xa1   : > { %p4390_p0 = pneg %p4389_p6  ;;  %p4394_p7 = por %p4393_p5, %p4392_p3 }
  0xa3   : > { %p4396_p1 = por %p4395_p11, %p4394_p7 }
  0xa5   : > { %p4397_p4 = pnand %p4396_p1, %p4390_p0 }
  0xa7   : > { %4400 = shalt.err (!%p4397_p4)
}
  0xa8   : > { %s4401_s6 = scalar_lea.vmem %s4834_s0, 512  ;;  %s4534_s19 = smov [#allocation6]  }
  0xa9   : > { %p4402_p8 = scmp.ne.s32.totalorder %s4834_s0, %s4401_s6  ;;  %s4406_s7 = sshll.u32 %s4534_s19, 4  ;;  %s4407_s7 = int_to_ptr.vmem [resolvable:$false] %s4406_s7 }
  0xaa   : > { %s4408_s26 = scalar_lea.vmem %s4407_s7, 1024  ;;  %p4409_p6 = scmp.lt.s32.totalorder %s4834_s0, %s4407_s7 }
  0xab   : > { %p4404_p12 = pnand %p4402_p8, %p4358_p13  ;;  %p4410_p3 = scmp.lt.s32.totalorder %s4408_s26, %s4401_s6 }
  0xad   : > { %p4405_p2 = pneg %p4404_p12  ;;  %p4411_p5 = por %p4410_p3, %p4409_p6 }
  0xaf   : > { %p4412_p7 = pnand %p4411_p5, %p4405_p2 }
  0xb1   : > { %4415 = shalt.err (!%p4412_p7)
}
  0xb2   : > { %4139 = dma.hbm_to_vmem [thread:$0]  (!%p4789_p9), %s4830_s8, 512, %s4834_s0, %s4838_s20, %s6294_s14, %s6294_s14, %s6293_s5  }
  0xb3   : > { %p6296_p13 = scmp.ne.s32.totalorder %s6280_s17, 0 }
  0xb5   : > { %370 = sbr.rel (%p6296_p13) target bundleno = 1095 (0x447), region = 52 }
  0xbc   : > { %s4870_s27 = sand.u32 1, %s4502_s28   ;;  %p6297_p0 = scmp.ne.s32.totalorder %s6277_s15, 0 }
  0xbd   : > { %s2981_s23 = sshll.u32 %s4870_s27, 7  ;;  %s373_s16 = scalar_lea.sflag [#allocation4], %s4870_s27 }
  0xbe   : > { %s4876_s21 = scalar_lea.vmem [#allocation3], %s2981_s23 }
  0xbf   : > { %4477 = dma.done.wait (%p6297_p0), %s373_s16, 2048  }
  0xc0   : > { %4479 = vsyncadd (%p6297_p0), %s373_s16, 4294965248  ;;  %s381_s0 = sand.u32 1, %s4624_s13   ;;  %s2982_s17 = sshll.u32 %s4870_s27, 5 }
  0xc1   : > { %s382_s20 = scalar_lea.sflag [#allocation7], %s381_s0  ;;  %s4884_s5 = scalar_lea.vmem [#allocation6], %s2982_s17 }
  0xc2   : > { %4481 = dma.done.wait (%p6297_p0), %s382_s20, 512  }
  0xc3   : > { %4483 = vsyncadd (%p6297_p0), %s382_s20, 4294966784  ;;  %p6298_p9 = scmp.eq.s32.totalorder %s4624_s13, 0 }
  0xc5   : > { %4485 = dma.done.wait (%p6298_p9), [#allocation7], 2048   ;;  %p6299_p11 = pmov %p6298_p9 }
  0xc6   : > { %p6300_p1 = pmov %p6298_p9 }
  0xc7   : > { %4487 = vsyncadd (%p6299_p11), [#allocation7], 4294965248 }
  0xc8   : > { %4489 = dma.done.wait (%p6300_p1), [#allocation10], 20480   ;;  %p6301_p4 = pmov %p6300_p1 }
  0xc9   : > { %v457_v0 = vld [vmem:[#allocation8] sm:$0xff]  ;;  %v458_v1 = vld [vmem:[#allocation8 + $0x8] sm:$0xff]  ;;  %v459_v2 = vld [vmem:[#allocation8 + $0x10] sm:$0xff]  ;;  %p734_p8 = scmp.gt.s32.totalorder %s4510_s30, 0  ;;  %p740_p12 = scmp.lt.s32.totalorder %s4510_s30, 1  ;;  %vm6219_vm1 = vcmask 1046528  }
  0xca   : > { %4491 = vsyncadd (%p6301_p4), [#allocation10], 4294946816  ;;  %v3737_v3 = vpack.c.bf16 %v458_v1, %v457_v0  ;;  %v460_v4 = vld [vmem:[#allocation8 + $0x18] sm:$0xff]  ;;  %v461_v6 = vld [vmem:[#allocation8 + $0x20] sm:$0xff]  ;;  %vm1132_vm2 = vcmask 1040384   ;;  %s6582_s9 = sld [smem:[#allocation87_spill]] }
  0xcb   : > { %v3741_v5 = vpack.c.bf16 %v460_v4, %v459_v2  ;;  %v462_v7 = vld [vmem:[#allocation8 + $0x28] sm:$0xff]  ;;  %v441_v9 = vld [vmem:[%s4876_s21] sm:$0xff]  ;;  %v463_v11 = vld [vmem:[#allocation8 + $0x30] sm:$0xff]  ;;  %s4927_s13 = scalar_select %p734_p8, 1, 0 }
  0xcc   : > { %3738 = vmatprep.subr.bf16.mxu0 %v3737_v3  ;;  %3770 = vmatprep.subr.bf16.mxu1 %v3737_v3  ;;  %v3745_v8 = vpack.c.bf16 %v462_v7, %v461_v6  ;;  %v641_v10 = vld [vmem:[%s4884_s5] sm:$0xff]  ;;  %v464_v12 = vld [vmem:[#allocation8 + $0x38] sm:$0xff]  ;;  %v466_v15 = vld [vmem:[#allocation8 + $0x48] sm:$0xff]  ;;  %s4966_s15 = scalar_select %p740_p12, 1, 0 }
  0xcd   : > { %3740 = vmatpush3.bf16.msra.mxu0 %v3737_v3  ;;  %3772 = vmatpush3.bf16.msra.mxu1 %v3737_v3  ;;  %v3749_v13 = vpack.c.bf16 %v464_v12, %v463_v11  ;;  %v465_v14 = vld [vmem:[#allocation8 + $0x40] sm:$0xff]  ;;  %v467_v17 = vld [vmem:[#allocation8 + $0x50] sm:$0xff]  ;;  %v468_v18 = vld [vmem:[#allocation8 + $0x58] sm:$0xff]  ;;  %s6583_s6 = sld [smem:[#allocation89_spill]]  ;;  %s6049_s19 = scalar_lea.vmem [#allocation12], %s2981_s23 }
  0xce   : > { %3742 = vmatprep.subr.bf16.mxu0 %v3741_v5  ;;  %3774 = vmatprep.subr.bf16.mxu1 %v3741_v5  ;;  %v3753_v16 = vpack.c.bf16 %v466_v15, %v465_v14  ;;  %v3757_v19 = vpack.c.bf16 %v468_v18, %v467_v17  ;;  %v469_v20 = vld [vmem:[#allocation8 + $0x60] sm:$0xff]  ;;  %v470_v21 = vld [vmem:[#allocation8 + $0x68] sm:$0xff]  ;;  %v471_v23 = vld [vmem:[#allocation8 + $0x70] sm:$0xff]  ;;  %s6584_s7 = sld [smem:[#allocation19_spill]]  ;;  %s2818_s0 = sshll.u32 %s6049_s19, 4  ;;  %s6097_s0 = int_to_ptr.vmem [resolvable:$true] %s2818_s0 }
  0xcf   : > { %3451 = vmatprep.mubr.f32.mxu0 %v441_v9  ;;  %3507 = vmatprep.mubr.f32.mxu1 %v641_v10  ;;  %v3761_v22 = vpack.c.bf16 %v470_v21, %v469_v20  ;;  %v472_v24 = vld [vmem:[#allocation8 + $0x78] sm:$0xff]  ;;  %v1517_v26 = vld [vmem:[#allocation9 + $0x200] sm:$0xff]  ;;  %v1518_v27 = vld [vmem:[#allocation9 + $0x208] sm:$0xff]  ;;  %s6585_s20 = sld [smem:[#allocation90_spill]] }
  0xd0   : > { %v3765_v25 = vpack.c.bf16 %v472_v24, %v471_v23  ;;  %v1533_v28 = vld [vmem:[#allocation9 + $0x280] sm:$0xff]  ;;  %v1534_v29 = vld [vmem:[#allocation9 + $0x288] sm:$0xff]  ;;  %v3801_v30 = vpack.c.bf16 %v1518_v27, %v1517_v26  ;;  %v1519_v34 = vld [vmem:[#allocation9 + $0x210] sm:$0xff] }
  0xd1   : > { %3744 = vmatpush3.bf16.msra.mxu0 %v3741_v5  ;;  %3776 = vmatpush3.bf16.msra.mxu1 %v3741_v5  ;;  %v3833_v31 = vpack.c.bf16 %v1534_v29, %v1533_v28  ;;  %v1501_v32 = vld [vmem:[#allocation9 + $0x180] sm:$0xff]  ;;  %v1502_v33 = vld [vmem:[#allocation9 + $0x188] sm:$0xff]  ;;  %v1520_v35 = vld [vmem:[#allocation9 + $0x218] sm:$0xff] }
  0xd2   : > { %3746 = vmatprep.subr.bf16.mxu0 %v3745_v8  ;;  %3778 = vmatprep.subr.bf16.mxu1 %v3745_v8  ;;  %v442_v36 = vld [vmem:[%s4876_s21 + $0x8] sm:$0xff]  ;;  %v443_v38 = vld [vmem:[%s4876_s21 + $0x10] sm:$0xff]  ;;  %v3803_v40 = vpack.c.bf16 %v1502_v33, %v1501_v32  ;;  %v3805_v41 = vpack.c.bf16 %v1520_v35, %v1519_v34  ;;  %v1504_v43 = vld [vmem:[#allocation9 + $0x198] sm:$0xff] }
  0xd3   : > { %v642_v37 = vld [vmem:[%s4884_s5 + $0x8] sm:$0xff]  ;;  %v643_v39 = vld [vmem:[%s4884_s5 + $0x10] sm:$0xff]  ;;  %v444_v44 = vld [vmem:[%s4876_s21 + $0x18] sm:$0xff] }
  0xd4   : > { %v1503_v42 = vld [vmem:[#allocation9 + $0x190] sm:$0xff]  ;;  %v644_v45 = vld [vmem:[%s4884_s5 + $0x18] sm:$0xff]  ;;  %v445_v46 = vld [vmem:[%s4876_s21 + $0x20] sm:$0xff]  ;;  %s2991_s26 = sshll.u32 %s6584_s7, 1 }
  0xd5   : > { %3748 = vmatpush3.bf16.msra.mxu0 %v3745_v8  ;;  %3780 = vmatpush3.bf16.msra.mxu1 %v3745_v8  ;;  %v3807_v47 = vpack.c.bf16 %v1504_v43, %v1503_v42  ;;  %v446_v48 = vld [vmem:[%s4876_s21 + $0x28] sm:$0xff]  ;;  %v447_v49 = vld [vmem:[%s4876_s21 + $0x30] sm:$0xff]  ;;  %v448_v50 = vld [vmem:[%s4876_s21 + $0x38] sm:$0xff]  ;;  %s2811_s23 = sadd.s32 %s4510_s30, %s2991_s26 }
  0xd6   : > { %3750 = vmatprep.subr.bf16.mxu0 %v3749_v13  ;;  %3782 = vmatprep.subr.bf16.mxu1 %v3749_v13  ;;  %v449_v51 = vld [vmem:[%s4876_s21 + $0x40] sm:$0xff]  ;;  %v450_v52 = vld [vmem:[%s4876_s21 + $0x48] sm:$0xff]  ;;  %v451_v53 = vld [vmem:[%s4876_s21 + $0x50] sm:$0xff]  ;;  %s2998_s16 = sshll.u32 %s2811_s23, 11 }
  0xd7   : > { %v452_v54 = vld [vmem:[%s4876_s21 + $0x58] sm:$0xff]  ;;  %v453_v55 = vld [vmem:[%s4876_s21 + $0x60] sm:$0xff]  ;;  %v454_v56 = vld [vmem:[%s4876_s21 + $0x68] sm:$0xff]  ;;  %s6095_s5 = scalar_lea.hbm %s6585_s20, %s2998_s16 }
  0xd8   : > { %v455_v57 = vld [vmem:[%s4876_s21 + $0x70] sm:$0xff]  ;;  %v456_v58 = vld [vmem:[%s4876_s21 + $0x78] sm:$0xff]  ;;  %v1521_v61 = vld [vmem:[#allocation9 + $0x220] sm:$0xff] }
  0xd9   : > { %3752 = vmatpush3.bf16.msra.mxu0 %v3749_v13  ;;  %3784 = vmatpush3.bf16.msra.mxu1 %v3749_v13  ;;  %v1535_v59 = vld [vmem:[#allocation9 + $0x290] sm:$0xff]  ;;  %v1536_v60 = vld [vmem:[#allocation9 + $0x298] sm:$0xff]  ;;  %v1522_v63 = vld [vmem:[#allocation9 + $0x228] sm:$0xff] }
  0xda   : > { %3754 = vmatprep.subr.bf16.mxu0 %v3753_v16  ;;  %3786 = vmatprep.subr.bf16.mxu1 %v3753_v16  ;;  %v3837_v62 = vpack.c.bf16 %v1536_v60, %v1535_v59  ;;  %v1505_v0 = vld [vmem:[#allocation9 + $0x1a0] sm:$0xff]  ;;  %v1506_v1 = vld [vmem:[#allocation9 + $0x1a8] sm:$0xff]  ;;  %v3809_v2 = vpack.c.bf16 %v1522_v63, %v1521_v61  ;;  %v1523_v6 = vld [vmem:[#allocation9 + $0x230] sm:$0xff] }
  0xdb   : > { %v3811_v3 = vpack.c.bf16 %v1506_v1, %v1505_v0  ;;  %v1537_v4 = vld [vmem:[#allocation9 + $0x2a0] sm:$0xff]  ;;  %v1538_v5 = vld [vmem:[#allocation9 + $0x2a8] sm:$0xff]  ;;  %v1524_v8 = vld [vmem:[#allocation9 + $0x238] sm:$0xff] }
  0xdc   : > { %v3841_v7 = vpack.c.bf16 %v1538_v5, %v1537_v4  ;;  %v1507_v9 = vld [vmem:[#allocation9 + $0x1b0] sm:$0xff]  ;;  %v1508_v10 = vld [vmem:[#allocation9 + $0x1b8] sm:$0xff]  ;;  %v3813_v11 = vpack.c.bf16 %v1524_v8, %v1523_v6  ;;  %v1525_v15 = vld [vmem:[#allocation9 + $0x240] sm:$0xff] }
  0xdd   : > { %3756 = vmatpush3.bf16.msra.mxu0 %v3753_v16  ;;  %3788 = vmatpush3.bf16.msra.mxu1 %v3753_v16  ;;  %v3815_v12 = vpack.c.bf16 %v1508_v10, %v1507_v9  ;;  %v1539_v13 = vld [vmem:[#allocation9 + $0x2b0] sm:$0xff]  ;;  %v1540_v14 = vld [vmem:[#allocation9 + $0x2b8] sm:$0xff]  ;;  %v1526_v17 = vld [vmem:[#allocation9 + $0x248] sm:$0xff] }
  0xde   : > { %3758 = vmatprep.subr.bf16.mxu0 %v3757_v19  ;;  %3790 = vmatprep.subr.bf16.mxu1 %v3757_v19  ;;  %v3845_v16 = vpack.c.bf16 %v1540_v14, %v1539_v13  ;;  %v1509_v18 = vld [vmem:[#allocation9 + $0x1c0] sm:$0xff]  ;;  %v3817_v20 = vpack.c.bf16 %v1526_v17, %v1525_v15  ;;  %v1542_v23 = vld [vmem:[#allocation9 + $0x2c8] sm:$0xff]  ;;  %v1527_v24 = vld [vmem:[#allocation9 + $0x250] sm:$0xff]  ;;  %v736_v14 = vstv %s4927_s13  ;;  %s4416_s13 = scalar_lea.vmem %s6097_s0, 2048 }
  0xdf   : > { %v1528_v26 = vld [vmem:[#allocation9 + $0x258] sm:$0xff]  ;;  %v1511_v27 = vld [vmem:[#allocation9 + $0x1d0] sm:$0xff]  ;;  %v1529_v34 = vld [vmem:[#allocation9 + $0x260] sm:$0xff]  ;;  %vm5051_vm0 = vcmp.eq.s32.totalorder %v736_v14, 1  ;;  %p4417_p2 = scmp.ne.s32.totalorder %s6097_s0, %s4416_s13 }
  0xe0   : > { %v1512_v28 = vld [vmem:[#allocation9 + $0x1d8] sm:$0xff]  ;;  %v3821_v29 = vpack.c.bf16 %v1528_v26, %v1527_v24  ;;  %v1530_v35 = vld [vmem:[#allocation9 + $0x268] sm:$0xff]  ;;  %v1531_v42 = vld [vmem:[#allocation9 + $0x270] sm:$0xff] }
  0xe1   : > { %3760 = vmatpush3.bf16.msra.mxu0 %v3757_v19  ;;  %3792 = vmatpush3.bf16.msra.mxu1 %v3757_v19  ;;  %v1510_v19 = vld [vmem:[#allocation9 + $0x1c8] sm:$0xff]  ;;  %v1544_v32 = vld [vmem:[#allocation9 + $0x2d8] sm:$0xff]  ;;  %v4936_v0 = vld [vmem:[#allocation9] sm:$0xff]  ;;  %p4418_p6 = pnand %p4417_p2, %p4756_p10 }
  0xe2   : > { %3762 = vmatprep.subr.bf16.mxu0 %v3761_v22  ;;  %3794 = vmatprep.subr.bf16.mxu1 %v3761_v22  ;;  %v3819_v21 = vpack.c.bf16 %v1510_v19, %v1509_v18  ;;  %v4943_v4 = vld [vmem:[#allocation9 + $0x8] sm:$0xff]  ;;  %v4945_v5 = vld [vmem:[#allocation9 + $0x90] sm:$0xff]  ;;  %v4947_v6 = vld [vmem:[#allocation9 + $0x98] sm:$0xff] }
  0xe3   : > { %v4953_v9 = vld [vmem:[#allocation9 + $0x10] sm:$0xff]  ;;  %v4955_v10 = vld [vmem:[#allocation9 + $0x18] sm:$0xff]  ;;  %v4968_v15 = vld [vmem:[#allocation9 + $0xa8] sm:$0xff]  ;;  %p4419_p3 = pneg %p4418_p6 }
  0xe4   : > { %v4972_v17 = vld [vmem:[#allocation9 + $0x28] sm:$0xff]  ;;  %v4987_v24 = vld [vmem:[#allocation9 + $0x30] sm:$0xff]  ;;  %v5069_v14 = vld [vmem:[#allocation9 + $0x3a0] sm:$0xff] }
  0xe5   : > { %3764 = vmatpush3.bf16.msra.mxu0 %v3761_v22  ;;  %3796 = vmatpush3.bf16.msra.mxu1 %v3761_v22  ;;  %v1541_v22 = vld [vmem:[#allocation9 + $0x2c0] sm:$0xff]  ;;  %6304 = vst [vmem:[#allocation25_spill] sm:$0xff] %v4972_v17  ;;  %6307 = vst [vmem:[#allocation28_spill] sm:$0xff] %v4987_v24  ;;  %v5061_v13 = vld [vmem:[#allocation9 + $0x390] sm:$0xff]  ;;  %v6335_v24 = vmov 0  ;;  %v6342_v17 = vstv %s4966_s15  ;;  %s4535_s15 = smov [#allocation12]  }
  0xe6   : > { %3766 = vmatprep.subr.bf16.mxu0 %v3765_v25  ;;  %3798 = vmatprep.subr.bf16.mxu1 %v3765_v25  ;;  %v5071_v26 = vld [vmem:[#allocation9 + $0x3a8] sm:$0xff]  ;;  %v5096_v8 = vld [vmem:[#allocation9 + $0x3b8] sm:$0xff]  ;;  %vm5170_vm4 = vcmp.eq.s32.totalorder %v6342_v17, 1  ;;  %s4420_s14 = sshll.u32 %s4535_s15, 4  ;;  %s4421_s14 = int_to_ptr.vmem [resolvable:$false] %s4420_s14 }
  0xe7   : > { %s4422_s8 = scalar_lea.vmem %s4421_s14, 4096  ;;  %p4423_p5 = scmp.lt.s32.totalorder %s6097_s0, %s4421_s14 }
  0xe8   : > { %p4424_p7 = scmp.lt.s32.totalorder %s4422_s8, %s4416_s13 }
  0xe9   : > { %3768 = vmatpush3.bf16.msra.mxu0 %v3765_v25  ;;  %3800 = vmatpush3.bf16.msra.mxu1 %v3765_v25  ;;  %v3849_v25 = vpack.c.bf16 %v1542_v23, %v1541_v22  ;;  %v4982_v22 = vld [vmem:[#allocation9 + $0xb8] sm:$0xff] }
  0xea   : > { %3802 = vmatprep.subr.bf16.mxu0 %v3801_v30  ;;  %3834 = vmatprep.subr.bf16.mxu1 %v3833_v31  ;;  %v3823_v30 = vpack.c.bf16 %v1512_v28, %v1511_v27  ;;  %6306 = vst [vmem:[#allocation27_spill] sm:$0xff] %v4982_v22  ;;  %v5067_v27 = vld [vmem:[#allocation9 + $0x318] sm:$0xff]  ;;  %v5084_v28 = vld [vmem:[#allocation9 + $0x328] sm:$0xff]  ;;  %v5161_v22 = vld [vmem:[#allocation9 + $0x360] sm:$0xff]  ;;  %p4425_p13 = por %p4424_p7, %p4423_p5 }
  0xeb   : > { %6340 = vst [vmem:[#allocation56_spill] sm:$0xff] %v5161_v22 }
  0xec   : > { %3452 = vmatmul.mubr.f32.vlgmr.msra.gmra.mrb[0].mxu0 %v442_v36  ;;  %3508 = vmatmul.mubr.f32.vlgmr.msra.gmra.mrb[0].mxu1 %v642_v37  ;;  %v1513_v36 = vld [vmem:[#allocation9 + $0x1e0] sm:$0xff]  ;;  %v3825_v37 = vpack.c.bf16 %v1530_v35, %v1529_v34  ;;  %v5086_v34 = vld [vmem:[#allocation9 + $0x3b0] sm:$0xff]  ;;  %p4426_p0 = pnand %p4425_p13, %p4419_p3 }
  0xed   : > { %3454 = vmatprep.mubr.f32.mxu0 %v443_v38  ;;  %3510 = vmatprep.mubr.f32.mxu1 %v643_v39  ;;  %v1514_v38 = vld [vmem:[#allocation9 + $0x1e8] sm:$0xff]  ;;  %v5009_v35 = vld [vmem:[#allocation9 + $0x40] sm:$0xff] }
  0xee   : > { %3804 = vmatpush3.bf16.msra.mxu0 %v3803_v40  ;;  %3836 = vmatpush3.bf16.msra.mxu1 %v3833_v31  ;;  %v1543_v31 = vld [vmem:[#allocation9 + $0x2d0] sm:$0xff]  ;;  %v3827_v39 = vpack.c.bf16 %v1514_v38, %v1513_v36  ;;  %v1545_v40 = vld [vmem:[#allocation9 + $0x2e0] sm:$0xff]  ;;  %6311 = vst [vmem:[#allocation32_spill] sm:$0xff] %v5009_v35  ;;  %v5011_v36 = vld [vmem:[#allocation9 + $0x48] sm:$0xff] }
  0xef   : > { %3806 = vmatprep.subr.bf16.mxu0 %v3805_v41  ;;  %3838 = vmatprep.subr.bf16.mxu1 %v3837_v62  ;;  %v3853_v33 = vpack.c.bf16 %v1544_v32, %v1543_v31  ;;  %v1546_v41 = vld [vmem:[#allocation9 + $0x2e8] sm:$0xff]  ;;  %6312 = vst [vmem:[#allocation33_spill] sm:$0xff] %v5011_v36  ;;  %v5114_v35 = vld [vmem:[#allocation9 + $0x340] sm:$0xff] }
  0xf0   : > { %3455 = vmatmul.mubr.f32.gmra.mrb[2].mxu0 %v444_v44  ;;  %3511 = vmatmul.mubr.f32.gmra.mrb[2].mxu1 %v644_v45  ;;  %v3857_v43 = vpack.c.bf16 %v1546_v41, %v1545_v40  ;;  %v1532_v44 = vld [vmem:[#allocation9 + $0x278] sm:$0xff]  ;;  %v1515_v45 = vld [vmem:[#allocation9 + $0x1f0] sm:$0xff]  ;;  %v5001_v31 = vld [vmem:[#allocation9 + $0xc8] sm:$0xff]  ;;  %6329 = vst [vmem:[#allocation48_spill] sm:$0xff] %v5114_v35 }
  0xf1   : > { %3457 = vmatprep.mubr.f32.mxu0 %v445_v46  ;;  %v1516_v46 = vld [vmem:[#allocation9 + $0x1f8] sm:$0xff]  ;;  %6310 = vst [vmem:[#allocation31_spill] sm:$0xff] %v5001_v31 }
  0xf2   : > { %3808 = vmatpush3.bf16.msra.mxu0 %v3807_v47  ;;  %3840 = vmatpush3.bf16.msra.mxu1 %v3837_v62  ;;  %v3829_v47 = vpack.c.bf16 %v1532_v44, %v1531_v42  ;;  %v5022_v41 = vld [vmem:[#allocation9 + $0xd8] sm:$0xff]  ;;  %v5082_v42 = vld [vmem:[#allocation9 + $0x320] sm:$0xff] }
  0xf3   : > { %3810 = vmatprep.subr.bf16.mxu0 %v3809_v2  ;;  %3842 = vmatprep.subr.bf16.mxu1 %v3841_v7  ;;  %6314 = vst [vmem:[#allocation35_spill] sm:$0xff] %v5022_v41  ;;  %v5027_v44 = vld [vmem:[#allocation9 + $0x58] sm:$0xff]  ;;  %v5112_v41 = vld [vmem:[#allocation9 + $0x3c8] sm:$0xff] }
  0xf4   : > { %3458 = vmatmul.mubr.f32.gmra.mrb[4].mxu0 %v446_v48  ;;  %v3831_v48 = vpack.c.bf16 %v1516_v46, %v1515_v45  ;;  %6316 = vst [vmem:[#allocation37_spill] sm:$0xff] %v5027_v44  ;;  %6328 = vst [vmem:[#allocation47_spill] sm:$0xff] %v5112_v41  ;;  %v5129_v44 = vld [vmem:[#allocation2 + $0x200] sm:$0x1] }
  0xf5   : > { %3460 = vmatprep.mubr.f32.mxu0 %v447_v49  ;;  %v1547_v49 = vld [vmem:[#allocation9 + $0x2f0] sm:$0xff]  ;;  %6333 = vst [vmem:[#allocation52_spill] sm:$0xff] %v5129_v44 }
  0xf6   : > { %3812 = vmatpush3.bf16.msra.mxu0 %v3811_v3  ;;  %3844 = vmatpush3.bf16.msra.mxu1 %v3841_v7  ;;  %v5178_v41 = vld [vmem:[#allocation9 + $0x3f0] sm:$0xff] }
  0xf7   : > { %3814 = vmatprep.subr.bf16.mxu0 %v3813_v11  ;;  %3846 = vmatprep.subr.bf16.mxu1 %v3845_v16  ;;  %v4957_v11 = vld [vmem:[#allocation9 + $0xa0] sm:$0xff]  ;;  %6345 = vst [vmem:[#allocation58_spill] sm:$0xff] %v5178_v41 }
  0xf8   : > { %3461 = vmatmul.mubr.f32.gmra.mrb[6].mxu0 %v448_v50  ;;  %v1548_v50 = vld [vmem:[#allocation9 + $0x2f8] sm:$0xff] }
  0xf9   : > { %3463 = vmatprep.mubr.f32.mxu0 %v449_v51  ;;  %v3861_v51 = vpack.c.bf16 %v1548_v50, %v1547_v49  ;;  %v5040_v50 = vld [vmem:[#allocation9 + $0xe0] sm:$0xff]  ;;  %v5100_v49 = vld [vmem:[#allocation9 + $0x338] sm:$0xff] }
  0xfa   : > { %3816 = vmatpush3.bf16.msra.mxu0 %v3815_v12  ;;  %3848 = vmatpush3.bf16.msra.mxu1 %v3845_v16  ;;  %v4970_v16 = vld [vmem:[#allocation9 + $0x20] sm:$0xff]  ;;  %6318 = vst [vmem:[#allocation39_spill] sm:$0xff] %v5040_v50  ;;  %v5145_v50 = vld [vmem:[#allocation9 + $0x3d8] sm:$0xff] }
  0xfb   : > { %3818 = vmatprep.subr.bf16.mxu0 %v3817_v20  ;;  %3850 = vmatprep.subr.bf16.mxu1 %v3849_v25  ;;  %6303 = vst [vmem:[#allocation24_spill] sm:$0xff] %v4970_v16  ;;  %v5091_v20 = vld [vmem:[%s6156_s3] ss:$0 sm:$0xff]  ;;  %6338 = vst [vmem:[#allocation54_spill] sm:$0xff] %v5145_v50 }
  0xfc   : > { %3464 = vmatmul.mubr.f32.gmra.mrb[8].mxu0 %v450_v52  ;;  %v1463_v52 = vld [vmem:[#allocation9 + $0x80] sm:$0xff] }
  0xfd   : > { %3466 = vmatprep.mubr.f32.mxu0 %v451_v53  ;;  %v1464_v53 = vld [vmem:[#allocation9 + $0x88] sm:$0xff] }
  0xfe   : > { %3820 = vmatpush3.bf16.msra.mxu0 %v3819_v21  ;;  %3852 = vmatpush3.bf16.msra.mxu1 %v3849_v25  ;;  %v4980_v21 = vld [vmem:[#allocation9 + $0xb0] sm:$0xff] }
  0xff   : > { %3822 = vmatprep.subr.bf16.mxu0 %v3821_v29  ;;  %3854 = vmatprep.subr.bf16.mxu1 %v3853_v33  ;;  %6305 = vst [vmem:[#allocation26_spill] sm:$0xff] %v4980_v21  ;;  %v4997_v29 = vld [vmem:[#allocation9 + $0x38] sm:$0xff]  ;;  %v5157_v21 = vld [vmem:[#allocation9 + $0x3e0] sm:$0xff] }
 0x100   : > { %3467 = vmatmul.mubr.f32.gmra.mrb[10].mxu0 %v452_v54  ;;  %v3865_v54 = vpack.c.bf16 %v1464_v53, %v1463_v52  ;;  %6308 = vst [vmem:[#allocation29_spill] sm:$0xff] %v4997_v29  ;;  %v5045_v53 = vld [vmem:[#allocation9 + $0x300] sm:$0xff]  ;;  %v5098_v52 = vld [vmem:[#allocation9 + $0x330] sm:$0xff]  ;;  %6339 = vst [vmem:[#allocation55_spill] sm:$0xff] %v5157_v21  ;;  %v6351_v21 = vmov 0 }
 0x101   : > { %3469 = vmatprep.mubr.f32.mxu0 %v453_v55  ;;  %v2193_v55 = vld [vmem:[#allocation9 + $0x380] sm:$0xff]  ;;  %6325 = vst [vmem:[#allocation44_spill] sm:$0xff] %v5098_v52  ;;  %v5191_v52 = vld [vmem:[#allocation9 + $0x378] sm:$0xff] }
 0x102   : > { %3824 = vmatpush3.bf16.msra.mxu0 %v3823_v30  ;;  %3856 = vmatpush3.bf16.msra.mxu1 %v3853_v33  ;;  %v4999_v30 = vld [vmem:[#allocation9 + $0xc0] sm:$0xff]  ;;  %v5065_v33 = vld [vmem:[#allocation9 + $0x310] sm:$0xff]  ;;  %6349 = vst [vmem:[#allocation62_spill] sm:$0xff] %v5191_v52 }
 0x103   : > { %3826 = vmatprep.subr.bf16.mxu0 %v3825_v37  ;;  %3858 = vmatprep.subr.bf16.mxu1 %v3857_v43  ;;  %6309 = vst [vmem:[#allocation30_spill] sm:$0xff] %v4999_v30  ;;  %v5013_v37 = vld [vmem:[#allocation9 + $0xd0] sm:$0xff] }
 0x104   : > { %3470 = vmatmul.mubr.f32.gmra.mrb[12].mxu0 %v454_v56  ;;  %v2194_v56 = vld [vmem:[#allocation9 + $0x388] sm:$0xff]  ;;  %6313 = vst [vmem:[#allocation34_spill] sm:$0xff] %v5013_v37  ;;  %v5110_v37 = vld [vmem:[#allocation9 + $0x3c0] sm:$0xff] }
 0x105   : > { %3472 = vmatprep.mubr.f32.mxu0 %v455_v57  ;;  %v3929_v57 = vpack.c.bf16 %v2194_v56, %v2193_v55  ;;  %v5049_v55 = vld [vmem:[#allocation2 + $0x8] sm:$0x80]  ;;  %v6320_v56 = vmov 0  ;;  %6327 = vst [vmem:[#allocation46_spill] sm:$0xff] %v5110_v37  ;;  %v5176_v37 = vld [vmem:[#allocation9 + $0x368] sm:$0xff] }
 0x106   : > { %3828 = vmatpush3.bf16.msra.mxu0 %v3827_v39  ;;  %3860 = vmatpush3.bf16.msra.mxu1 %v3857_v43  ;;  %v5025_v43 = vld [vmem:[#allocation9 + $0x50] sm:$0xff]  ;;  %v6321_v56 = vsel %vm5051_vm0, 4294967295, %v6320_v56 }
 0x107   : > { %3830 = vmatprep.subr.bf16.mxu0 %v3829_v47  ;;  %3862 = vmatprep.subr.bf16.mxu1 %v3861_v51  ;;  %6315 = vst [vmem:[#allocation36_spill] sm:$0xff] %v5025_v43  ;;  %6322 = vst [vmem:[#allocation41_spill] sm:$0xff] %v6321_v56  ;;  %v5063_v47 = vld [vmem:[#allocation9 + $0x398] sm:$0xff]  ;;  %v5159_v43 = vld [vmem:[#allocation9 + $0x3e8] sm:$0xff] }
 0x108   : > { %3473 = vmatmul.mubr.f32.gmra.mrb[14].mxu0 %v456_v58  ;;  %v766_v58 = vlaneseq }
 0x10a   : > { %3832 = vmatpush3.bf16.msra.mxu0 %v3831_v48  ;;  %3864 = vmatpush3.bf16.msra.mxu1 %v3861_v51  ;;  %v4918_v59 = vshrl.u32 %v766_v58, 7  ;;  %v5042_v51 = vld [vmem:[#allocation9 + $0xe8] sm:$0xff]  ;;  %v5126_v58 = vld [vmem:[#allocation9 + $0x3d0] sm:$0xff] }
 0x10b   : > { %3866 = vmatprep.subr.bf16.mxu1 %v3865_v54  ;;  %3930 = vmatprep.subr.bf16.mxu0 %v3929_v57  ;;  %6319 = vst [vmem:[#allocation40_spill] sm:$0xff] %v5042_v51  ;;  %v5047_v54 = vld [vmem:[#allocation9 + $0x308] sm:$0xff]  ;;  %6332 = vst [vmem:[#allocation51_spill] sm:$0xff] %v5126_v58 }
 0x10c   : > { %v4922_v60 = vadd.s32 16, %v4918_v59  ;;  %v4925_v61 = vadd.s32 24, %v4918_v59  ;;  %v4930_v62 = vadd.s32 32, %v4918_v59  ;;  %v4933_v63 = vadd.s32 8, %v4918_v59  ;;  %v5124_v57 = vld [vmem:[#allocation9 + $0x348] sm:$0xff] }
 0x10d   : > { %v4939_v1 = vadd.s32 40, %v4918_v59  ;;  %v4950_v7 = vadd.s32 48, %v4918_v59  ;;  %v4960_v12 = vadd.s32 56, %v4918_v59  ;;  %v4975_v18 = vadd.s32 64, %v4918_v59  ;;  %6331 = vst [vmem:[#allocation50_spill] sm:$0xff] %v5124_v57 }
 0x10e   : > { %6302 = vst [vmem:[#allocation23_spill] sm:$0xff] %v4933_v63  ;;  %v4985_v23 = vadd.s32 72, %v4918_v59  ;;  %v4990_v25 = vadd.s32 80, %v4918_v59  ;;  %v5004_v32 = vadd.s32 88, %v4918_v59  ;;  %v5016_v38 = vadd.s32 104, %v4918_v59  ;;  %v5180_v63 = vld [vmem:[#allocation9 + $0x3f8] sm:$0xff] }
 0x10f   : > { %v5019_v39 = vadd.s32 96, %v4918_v59  ;;  %v5030_v45 = vadd.s32 136, %v4918_v59  ;;  %v5033_v46 = vadd.s32 112, %v4918_v59  ;;  %v5059_v48 = vadd.s32 120, %v4918_v59  ;;  %6346 = vst [vmem:[#allocation59_spill] sm:$0xff] %v5180_v63 }
 0x110   : > { %v5074_v19 = vadd.s32 128, %v4918_v59  ;;  %v5104_v40 = vadd.s32 144, %v4918_v59  ;;  %v5117_v3 = vadd.s32 152, %v4918_v59  ;;  %v6334_v31 = vand.u32 15, %v4922_v60  ;;  %v5147_v60 = vld [vmem:[#allocation9 + $0x350] sm:$0xff] }
 0x111   : > { %6317 = vst [vmem:[#allocation38_spill] sm:$0xff] %v5030_v45  ;;  %6323 = vst [vmem:[#allocation42_spill] sm:$0xff] %v5059_v48  ;;  %v5189_v45 = vld [vmem:[#allocation9 + $0x370] sm:$0xff]  ;;  %v6350_v17 = vand.u32 15, %v4925_v61  ;;  %v6355_v61 = vmov 0 }
 0x112   : > { %6324 = vst [vmem:[#allocation43_spill] sm:$0xff] %v5074_v19  ;;  %6326 = vst [vmem:[#allocation45_spill] sm:$0xff] %v5104_v40  ;;  %vm5133_vm3 = vcmp.ne.s32.totalorder %v6334_v31, 0  ;;  %v5149_v31 = vld [vmem:[#allocation9 + $0x358] sm:$0xff] }
 0x113   : > { %6330 = vst [vmem:[#allocation49_spill] sm:$0xff] %v5117_v3  ;;  %v6336_v24 = vsel %vm5133_vm3, 4294967295, %v6335_v24  ;;  %6348 = vst [vmem:[#allocation61_spill] sm:$0xff] %v5189_v45  ;;  %vm5218_vm5 = vcmp.ne.s32.totalorder %v6350_v17, 15  ;;  %v6364_v45 = vmov 0 }
 0x114   : > { %6337 = vst [vmem:[#allocation53_spill] sm:$0xff] %v6336_v24  ;;  %v6352_v21 = vsel %vm5218_vm5, 4294967295, %v6351_v21 }
 0x115   : > { %6353 = vst [vmem:[#allocation63_spill] sm:$0xff] %v6352_v21 }
 0x1bf   : > { %v3453_v51 = vpop.f32.mrb[0].mxu0  ;;  %v3509_v29 = vpop.f32.mrb[0].mxu1 }
 0x1c0   : > { %v552_v19 = vadd.f32 %v3453_v51, %v5091_v20  ;;  %v5166_v48 = vadd.f32 %v3509_v29, %v5091_v20  ;;  %v546_v36 = vpop.f32.mrb[1].mxu0  ;;  %v711_v16 = vpop.f32.mrb[1].mxu1 }
 0x1c1   : > { %v547_v29 = vadd.f32 %v5091_v20, %v546_v36  ;;  %v5185_v40 = vadd.f32 %v5091_v20, %v711_v16 }
 0x1c2   : > { %6341 = vst [vmem:[#allocation57_spill] sm:$0xff] %v5166_v48  ;;  %v5194_v35 = vmax.f32 %v552_v19, 0.0  ;;  %v6205_v57 = vmax.f32 %v5166_v48, 0.0 }
 0x1c3   : > { %6347 = vst [vmem:[#allocation60_spill] sm:$0xff] %v5185_v40  ;;  %v5201_v36 = vmax.f32 %v547_v29, 0.0  ;;  %v3456_v3 = vpop.f32.mrb[2].mxu0  ;;  %v3512_v58 = vpop.f32.mrb[2].mxu1  ;;  %v6357_v50 = vmax.f32 %v5185_v40, 0.0 }
 0x1c4   : > { %v5213_v51 = vsel %vm5051_vm0, %v6205_v57, 0.0  ;;  %v562_v29 = vadd.f32 %v3456_v3, %v5091_v20  ;;  %v556_v16 = vpop.f32.mrb[3].mxu0  ;;  %v721_v44 = vpop.f32.mrb[3].mxu1  ;;  %v6354_v3 = vand.u32 15, %v4930_v62  ;;  %v727_v48 = vadd.f32 %v3512_v58, %v5091_v20 }
 0x1c5   : > { %v1138_v57 = vrot.slane %v5201_v36, 7  ;;  %1613 = vmatprep.mubr.f32.mxu0 %v5201_v36  ;;  %v557_v19 = vadd.f32 %v5091_v20, %v556_v16  ;;  %v5242_v2 = vsel %vm5051_vm0, %v6357_v50, 0.0  ;;  %v6358_v62 = vrot.slane %v5194_v35, 1 }
 0x1c6   : > { %vm5231_vm6 = vcmp.ne.s32.totalorder %v6354_v3, 0  ;;  %v5235_v17 = vmax.f32 %v562_v29, 0.0  ;;  %746 = vst [vmem:[#allocation2 + $0x20] sm:$0xff] %v5242_v2  ;;  %v6359_v29 = vrot.slane %v5201_v36, 1  ;;  %v6361_v16 = vrot.slane %v5213_v51, 7 }
 0x1c7   : > { %v6356_v61 = vsel %vm5231_vm6, 4294967295, %v6355_v61  ;;  %v3459_v52 = vpop.f32.mrb[4].mxu0  ;;  %v722_v50 = vadd.f32 %v5091_v20, %v721_v44  ;;  %v6363_v58 = vand.u32 15, %v4939_v1  ;;  %v5268_v41 = vmax.f32 %v557_v19, 0.0 }
 0x1c8   : > { %v5252_v3 = vsel %vm6219_vm1, %v6359_v29, %v6358_v62  ;;  %v5257_v56 = vsel %vm1132_vm2, %v6361_v16, %v1138_v57  ;;  %751 = vst [vmem:[#allocation2 + $0x98] sm:$0xff] %v5235_v17  ;;  %v572_v62 = vadd.f32 %v3459_v52, %v5091_v20  ;;  %v566_v29 = vpop.f32.mrb[5].mxu0  ;;  %v733_v1 = vmax.f32 %v727_v48, 0.0 }
 0x1c9   : > { %6360 = vst [vmem:[#allocation64_spill] sm:$0xff] %v5252_v3  ;;  %6362 = vst [vmem:[#allocation65_spill] sm:$0xff] %v5257_v56  ;;  %vm5262_vm7 = vcmp.ne.s32.totalorder %v6363_v58, 15  ;;  %3545 = vmatprep.mubr.f32.mxu1 %v5252_v3  ;;  %v567_v44 = vadd.f32 %v5091_v20, %v566_v29  ;;  %v732_v58 = vmax.f32 %v722_v50, 0.0  ;;  %v1307_v63 = vrot.slane %v5235_v17, 1  ;;  %4223 = vmatmul.mubr.msk.f32.vlgmr.msra.gmra.mrb[16].mxu0 %vm5133_vm3, %v5257_v56 }
 0x1ca   : > { %v6365_v45 = vsel %vm5262_vm7, 4294967295, %v6364_v45  ;;  %6367 = vst [vmem:[#allocation67_spill] sm:$0xff] %v5268_v41  ;;  %750 = vst [vmem:[#allocation2 + $0x80] sm:$0xff] %v5268_v41  ;;  %v1305_v22 = vrot.slane %v5268_v41, 1  ;;  %v5277_v40 = vmax.f32 %v572_v62, 0.0  ;;  %v6369_v52 = vrot.slane %v5194_v35, 7  ;;  %1618 = vmatprep.mubr.f32.mxu0 %v5194_v35 }
 0x1cb   : > { %6366 = vst [vmem:[#allocation66_spill] sm:$0xff] %v6365_v45  ;;  %v6370_v48 = vand.u32 15, %v4960_v12  ;;  %v6371_v50 = vmov 0  ;;  %v1142_v29 = vrot.slane %v5268_v41, 7  ;;  %v5294_v16 = vmax.f32 %v567_v44, 0.0  ;;  %v3462_v62 = vpop.f32.mrb[6].mxu0 }
 0x1cc   : > { %6368 = vst [vmem:[#allocation68_spill] sm:$0xff] %v5277_v40  ;;  %v5285_v19 = vsel %vm1132_vm2, %v1138_v57, %v6369_v52  ;;  %v5298_v3 = vsel %vm5170_vm4, %v733_v1, 0.0  ;;  %v5302_v24 = vsel %vm5170_vm4, %v732_v58, 0.0  ;;  %v6375_v12 = vand.u32 15, %v4950_v7  ;;  %753 = vst [vmem:[#allocation2 + $0xc8] sm:$0xff] %v5277_v40  ;;  %v576_v52 = vpop.f32.mrb[7].mxu0 }
 0x1cd   : > { %vm5289_vm8 = vcmp.ne.s32.totalorder %v6370_v48, 15  ;;  %6374 = vst [vmem:[#allocation70_spill] sm:$0xff] %v5294_v16  ;;  %v6376_v57 = vmov 0  ;;  %v6379_v44 = vpack.c.bf16 %v5047_v54, %v5045_v53  ;;  %v1311_v30 = vrot.slane %v5277_v40, 1  ;;  %765 = vst [vmem:[#allocation2 + $0x1e8] sm:$0xff] %v5298_v3  ;;  %1619 = vmatmul.mubr.f32.gmra.mrb[18].mxu0 %v5285_v19 }
 0x1ce   : > { %v6372_v50 = vsel %vm5289_vm8, 4294967295, %v6371_v50  ;;  %vm5307_vm9 = vcmp.ne.s32.totalorder %v6375_v12, 0  ;;  %v582_v58 = vadd.f32 %v3462_v62, %v5091_v20  ;;  %764 = vst [vmem:[#allocation2 + $0x1d0] sm:$0xff] %v5302_v24  ;;  %v6380_v7 = vand.u32 15, %v4975_v18  ;;  %752 = vst [vmem:[#allocation2 + $0xb0] sm:$0xff] %v5294_v16  ;;  %1623 = vmatprep.mubr.f32.mxu0 %v5268_v41 }
 0x1cf   : > { %6373 = vst [vmem:[#allocation69_spill] sm:$0xff] %v6372_v50  ;;  %v6377_v57 = vsel %vm5307_vm9, 4294967295, %v6376_v57  ;;  %3932 = vmatpush3.bf16.msra.mxu0 %v6379_v44  ;;  %v6383_v53 = vrot.slane %v5242_v2, 7  ;;  %v6384_v54 = vrot.slane %v5049_v55, 7  ;;  %v6385_v62 = vpack.c.bf16 %v5063_v47, %v5061_v13  ;;  %v5349_v13 = vld [vmem:[#allocation2 + $0x20] sm:$0xfe] }
 0x1d0   : > { %6378 = vst [vmem:[#allocation71_spill] sm:$0xff] %v6377_v57  ;;  %vm5322_vm10 = vcmp.ne.s32.totalorder %v6380_v7, 0  ;;  %v1309_v18 = vrot.slane %v5294_v16, 1  ;;  %v577_v7 = vadd.f32 %v5091_v20, %v576_v52  ;;  %v6386_v56 = vand.u32 15, %v4985_v23  ;;  %v6446_v50 = vld [vmem:[#allocation25_spill] sm:$0xff]  ;;  %v1487_v44 = vld [vmem:[#allocation9 + $0x140] sm:$0xff] }
 0x1d1   : > { %v5331_v12 = vsel %vm1132_vm2, %v6384_v54, %v6383_v53  ;;  %3934 = vmatprep.subr.bf16.mxu0 %v6385_v62  ;;  %v6387_v55 = vmov 0  ;;  %v5347_v53 = vmax.f32 %v582_v58, 0.0  ;;  %v6390_v54 = vrot.slane %v5194_v35, 1  ;;  %v6484_v57 = vld [vmem:[#allocation49_spill] sm:$0xff] }
 0x1d2   : > { %vm5343_vm11 = vcmp.ne.s32.totalorder %v6386_v56, 15  ;;  %v5359_v62 = vsel %vm6219_vm1, %v1305_v22, %v1307_v63  ;;  %v5361_v23 = vmax.f32 %v577_v7, 0.0  ;;  %v3465_v56 = vpop.f32.mrb[8].mxu0  ;;  %v6393_v1 = vrot.slane %v5194_v35, 7 }
 0x1d3   : > { %v6388_v55 = vsel %vm5343_vm11, 4294967295, %v6387_v55  ;;  %v5356_v52 = vsel %vm6219_vm1, %v6390_v54, %v1305_v22  ;;  %6392 = vst [vmem:[#allocation74_spill] sm:$0xff] %v5359_v62  ;;  %1383 = vst [vmem:[#allocation2 + $0x88] sm:$0xff] %v5359_v62  ;;  %v6394_v54 = vand.u32 15, %v4918_v59  ;;  %v6397_v22 = vpack.c.bf16 %v5067_v27, %v5065_v33 }
 0x1d4   : > { %6389 = vst [vmem:[#allocation72_spill] sm:$0xff] %v6388_v55  ;;  %6391 = vst [vmem:[#allocation73_spill] sm:$0xff] %v5356_v52  ;;  %v5369_v47 = vsel %vm1132_vm2, %v6393_v1, %v1142_v29  ;;  %v1315_v58 = vrot.slane %v5347_v53, 1  ;;  %v592_v41 = vadd.f32 %v3465_v56, %v5091_v20  ;;  %v586_v1 = vpop.f32.mrb[9].mxu0  ;;  %4224 = vmatmul.mubr.msk.f32.vlgmr.msra.gmra.mrb[4].mxu1 %vm5218_vm5, %v5356_v52  ;;  %v6398_v59 = vand.u32 15, %v4990_v25  ;;  %v6489_v55 = vld [vmem:[#allocation29_spill] sm:$0xff] }
 0x1d5   : > { %vm5373_vm12 = vcmp.ne.s32.totalorder %v6394_v54, 0  ;;  %3936 = vmatpush3.bf16.msra.mxu0 %v6397_v22  ;;  %755 = vst [vmem:[#allocation2 + $0xf8] sm:$0xff] %v5347_v53  ;;  %v6401_v27 = vpack.c.bf16 %v5071_v26, %v5069_v14  ;;  %754 = vst [vmem:[#allocation2 + $0xe0] sm:$0xff] %v5361_v23  ;;  %v6222_v33 = vrot.slane %v5361_v23, 7  ;;  %v1313_v56 = vrot.slane %v5361_v23, 1  ;;  %3548 = vmatprep.mubr.f32.mxu1 %v5359_v62 }
 0x1d6   : > { %vm5389_vm13 = vcmp.ne.s32.totalorder %v6398_v59, 0  ;;  %v587_v22 = vadd.f32 %v5091_v20, %v586_v1  ;;  %v6402_v7 = vpack.c.bf16 %v4943_v4, %v4936_v0  ;;  %v5405_v25 = vsel %vm6219_vm1, %v1307_v63, %v1309_v18  ;;  %4225 = vmatmul.mubr.msk.f32.gmra.mrb[20].mxu0 %vm5231_vm6, %v5369_v47 }
 0x1d7   : > { %3938 = vmatprep.subr.bf16.mxu0 %v6401_v27  ;;  %6403 = vst [vmem:[#allocation75_spill] sm:$0xff] %v5405_v25  ;;  %v6404_v26 = vand.u32 15, %v5004_v32  ;;  %v6405_v14 = vmov 0  ;;  %v5413_v59 = vmax.f32 %v592_v41, 0.0  ;;  %v6408_v1 = vpack.c.bf16 %v4947_v6, %v4945_v5  ;;  %v3468_v5 = vpop.f32.mrb[10].mxu0  ;;  %1628 = vmatprep.mubr.f32.mxu0 %v5235_v17 }
 0x1d8   : > { %3868 = vmatpush3.bf16.msra.mxu1 %v6402_v7  ;;  %v1364_v63 = vsel %vm5262_vm7, %v5405_v25, 0.0  ;;  %v5425_v0 = vsel %vm6219_vm1, %v1309_v18, %v1311_v30  ;;  %v6410_v4 = vrot.slane %v5235_v17, 7  ;;  %v5432_v41 = vmax.f32 %v587_v22, 0.0  ;;  %v5434_v6 = vld [vmem:[#allocation2 + $0x1e8] sm:$0x7f] }
 0x1d9   : > { %vm5409_vm14 = vcmp.ne.s32.totalorder %v6404_v26, 15  ;;  %3870 = vmatprep.subr.bf16.mxu1 %v6408_v1  ;;  %6409 = vst [vmem:[#allocation77_spill] sm:$0xff] %v5425_v0  ;;  %1384 = vst [vmem:[#allocation2 + $0xa0] sm:$0xff] %v1364_v63  ;;  %v5438_v7 = vsel %vm6219_vm1, %v1311_v30, %v1313_v56  ;;  %v5441_v27 = vsel %vm6219_vm1, %v1313_v56, %v1315_v58  ;;  %v6413_v18 = vrot.slane %v5294_v16, 7  ;;  %v6556_v1 = vld [vmem:[#allocation64_spill] sm:$0xff] }
 0x1da   : > { %v6406_v14 = vsel %vm5409_vm14, 4294967295, %v6405_v14  ;;  %v5430_v32 = vsel %vm1132_vm2, %v1142_v29, %v6410_v4  ;;  %6411 = vst [vmem:[#allocation78_spill] sm:$0xff] %v5438_v7  ;;  %6412 = vst [vmem:[#allocation79_spill] sm:$0xff] %v5441_v27  ;;  %v6414_v26 = vmov %v6410_v4  ;;  %v6416_v22 = vand.u32 15, %v5019_v39  ;;  %4226 = vmatmul.mubr.msk.f32.gmra.mrb[6].mxu1 %vm5262_vm7, %v5405_v25  ;;  %v2573_v25 = vld [vmem:[#allocation11 + $0x18] sm:$0xff] }
 0x1db   : > { %6407 = vst [vmem:[#allocation76_spill] sm:$0xff] %v6406_v14  ;;  %v5448_v29 = vsel %vm1132_vm2, %v6414_v26, %v6413_v18  ;;  %v6419_v30 = vpack.c.bf16 %v5084_v28, %v5082_v42  ;;  %757 = vst [vmem:[#allocation2 + $0x128] sm:$0xff] %v5413_v59  ;;  %v1319_v63 = vrot.slane %v5413_v59, 1  ;;  %v602_v4 = vadd.f32 %v3468_v5, %v5091_v20  ;;  %v596_v18 = vpop.f32.mrb[11].mxu0  ;;  %v6508_v14 = vld [vmem:[#allocation34_spill] sm:$0xff] }
 0x1dc   : > { %6415 = vst [vmem:[#allocation80_spill] sm:$0xff] %v5448_v29  ;;  %vm5452_vm15 = vcmp.ne.s32.totalorder %v6416_v22, 0  ;;  %v6420_v39 = vpack.c.bf16 %v5096_v8, %v5086_v34  ;;  %756 = vst [vmem:[#allocation2 + $0x110] sm:$0xff] %v5432_v41  ;;  %v1154_v28 = vrot.slane %v5432_v41, 7  ;;  %v1317_v42 = vrot.slane %v5432_v41, 1  ;;  %3551 = vmatprep.mubr.f32.mxu1 %v5425_v0  ;;  %1629 = vmatmul.mubr.f32.gmra.mrb[22].mxu0 %v5430_v32  ;;  %v2217_v34 = vld [vmem:[#allocation9 + $0x440] sm:$0xff] }
 0x1dd   : > { %3940 = vmatpush3.bf16.msra.mxu0 %v6419_v30  ;;  %v597_v22 = vadd.f32 %v5091_v20, %v596_v18  ;;  %v6421_v5 = vpack.c.bf16 %v4955_v10, %v4953_v9  ;;  %v6422_v30 = vand.u32 15, %v5016_v38  ;;  %v6423_v26 = vmov 0  ;;  %1633 = vmatprep.mubr.f32.mxu0 %v5294_v16 }
 0x1de   : > { %3942 = vmatprep.subr.bf16.mxu0 %v6420_v39  ;;  %v6426_v8 = vand.u32 15, %v5033_v46  ;;  %v5490_v39 = vmax.f32 %v602_v4, 0.0  ;;  %v6429_v9 = vpack.c.bf16 %v4968_v15, %v4957_v11  ;;  %v6430_v10 = vrot.slane %v5277_v40, 7  ;;  %v3471_v11 = vpop.f32.mrb[12].mxu0  ;;  %4227 = vmatmul.mubr.msk.f32.gmra.mrb[8].mxu1 %vm5289_vm8, %v5438_v7  ;;  %v6447_v7 = vld [vmem:[#allocation24_spill] sm:$0xff] }
 0x1df   : > { %3872 = vmatpush3.bf16.msra.mxu1 %v6421_v5  ;;  %vm5480_vm4 = vcmp.ne.s32.totalorder %v6422_v30, 15  ;;  %v6431_v38 = vrot.slane %v5294_v16, 7  ;;  %v5510_v5 = vmax.f32 %v597_v22, 0.0  ;;  %vm6433_vm7 = vcmask 1046528   ;;  %3554 = vmatprep.mubr.f32.mxu1 %v5441_v27 }
 0x1e0   : > { %v6424_v26 = vsel %vm5480_vm4, 4294967295, %v6423_v26  ;;  %vm5486_vm1 = vcmp.ne.s32.totalorder %v6426_v8, 0  ;;  %3874 = vmatprep.subr.bf16.mxu1 %v6429_v9  ;;  %v6432_v46 = vmov %v6430_v10  ;;  %v5514_v15 = vsel %vm6433_vm7, %v1315_v58, %v1317_v42  ;;  %vm6435_vm5 = vmmov %vm6433_vm7  ;;  %v6437_v8 = vld [vmem:[#allocation44_spill] sm:$0xff]  ;;  %759 = vst [vmem:[#allocation2 + $0x158] sm:$0xff] %v5490_v39  ;;  %v6439_v58 = vld [vmem:[#allocation38_spill] sm:$0xff]  ;;  %4228 = vmatmul.mubr.msk.f32.gmra.mrb[24].mxu0 %vm5307_vm9, %v5448_v29 }
 0x1e1   : > { %6425 = vst [vmem:[#allocation81_spill] sm:$0xff] %v6424_v26  ;;  %v5501_v18 = vsel %vm1132_vm2, %v6431_v38, %v6430_v10  ;;  %v5508_v4 = vsel %vm1132_vm2, %v6432_v46, %v6222_v33  ;;  %6434 = vst [vmem:[#allocation82_spill] sm:$0xff] %v5514_v15  ;;  %v5517_v30 = vsel %vm6435_vm5, %v1317_v42, %v1319_v63  ;;  %v1160_v10 = vrot.slane %v5490_v39, 7  ;;  %v606_v46 = vpop.f32.mrb[13].mxu0 }
 0x1e2   : > { %6436 = vst [vmem:[#allocation83_spill] sm:$0xff] %v5517_v30  ;;  %v6438_v9 = vpack.c.bf16 %v5100_v49, %v6437_v8  ;;  %v1323_v22 = vrot.slane %v5490_v39, 1  ;;  %v612_v38 = vadd.f32 %v3471_v11, %v5091_v20  ;;  %v6440_v42 = vand.u32 15, %v6439_v58  ;;  %v6443_v49 = vld [vmem:[#allocation47_spill] sm:$0xff]  ;;  %v6444_v8 = vld [vmem:[#allocation46_spill] sm:$0xff]  ;;  %758 = vst [vmem:[#allocation2 + $0x140] sm:$0xff] %v5510_v5  ;;  %1638 = vmatprep.mubr.f32.mxu0 %v5277_v40 }
 0x1e3   : > { %v1158_v33 = vrot.slane %v5510_v5, 7  ;;  %v1321_v11 = vrot.slane %v5510_v5, 1  ;;  %v607_v0 = vadd.f32 %v5091_v20, %v606_v46  ;;  %v6448_v45 = vpack.c.bf16 %v6446_v50, %v6447_v7  ;;  %v6455_v46 = vld [vmem:[#allocation43_spill] sm:$0xff]  ;;  %4229 = vmatmul.mubr.msk.f32.gmra.mrb[10].mxu1 %vm5343_vm11, %v5514_v15  ;;  %v6490_v15 = vld [vmem:[#allocation28_spill] sm:$0xff]  ;;  %v2151_v48 = vld [vmem:[#allocation2 + $0x128] sm:$0xff] }
 0x1e4   : > { %3944 = vmatpush3.bf16.msra.mxu0 %v6438_v9  ;;  %vm5531_vm5 = vcmp.ne.s32.totalorder %v6440_v42, 15  ;;  %v6445_v9 = vpack.c.bf16 %v6443_v49, %v6444_v8  ;;  %v6449_v58 = vrot.slane %v5347_v53, 7  ;;  %v6450_v42 = vrot.slane %v5361_v23, 7  ;;  %v6451_v8 = vld [vmem:[#allocation42_spill] sm:$0xff]  ;;  %3557 = vmatprep.mubr.f32.mxu1 %v5517_v30  ;;  %v6524_v30 = vld [vmem:[#allocation36_spill] sm:$0xff] }
 0x1e5   : > { %3876 = vmatpush3.bf16.msra.mxu1 %v6448_v45  ;;  %v6456_v62 = vand.u32 15, %v6455_v46  ;;  %v6457_v50 = vmov 0  ;;  %v6459_v45 = vld [vmem:[#allocation23_spill] sm:$0xff]  ;;  %v6461_v27 = vmov 0  ;;  %v6471_v52 = vmov 0  ;;  %1639 = vmatmul.mubr.f32.gmra.mrb[26].mxu0 %v5501_v18 }
 0x1e6   : > { %3946 = vmatprep.subr.bf16.mxu0 %v6445_v9  ;;  %v5551_v49 = vsel %vm1132_vm2, %v6450_v42, %v6449_v58  ;;  %v6452_v9 = vand.u32 15, %v6451_v8  ;;  %v6460_v7 = vand.u32 15, %v6459_v45  ;;  %v5571_v58 = vmax.f32 %v612_v38, 0.0  ;;  %v6464_v42 = vld [vmem:[#allocation27_spill] sm:$0xff]  ;;  %v6465_v8 = vld [vmem:[#allocation26_spill] sm:$0xff]  ;;  %v6469_v38 = vld [vmem:[#allocation45_spill] sm:$0xff]  ;;  %1643 = vmatprep.mubr.f32.mxu0 %v5361_v23 }
 0x1e7   : > { %vm5561_vm8 = vcmp.ne.s32.totalorder %v6456_v62, 0  ;;  %v6467_v62 = vrot.slane %v5347_v53, 7  ;;  %v6468_v45 = vrot.slane %v5413_v59, 7  ;;  %v6470_v21 = vand.u32 15, %v6469_v38  ;;  %v2157_v54 = vld [vmem:[#allocation2 + $0x158] sm:$0xff] }
 0x1e8   : > { %vm5555_vm7 = vcmp.ne.s32.totalorder %v6452_v9, 15  ;;  %v6458_v50 = vsel %vm5561_vm8, 4294967295, %v6457_v50  ;;  %vm5567_vm6 = vcmp.ne.s32.totalorder %v6460_v7, 15  ;;  %v6466_v9 = vpack.c.bf16 %v6464_v42, %v6465_v8  ;;  %v3474_v8 = vpop.f32.mrb[14].mxu0  ;;  %761 = vst [vmem:[#allocation2 + $0x188] sm:$0xff] %v5571_v58 }
 0x1e9   : > { %v6462_v27 = vsel %vm5567_vm6, 4294967295, %v6461_v27  ;;  %v5582_v46 = vsel %vm1132_vm2, %v6467_v62, %v1154_v28  ;;  %v5587_v7 = vsel %vm1132_vm2, %v1154_v28, %v6468_v45  ;;  %vm5591_vm6 = vcmp.ne.s32.totalorder %v6470_v21, 0  ;;  %v6479_v28 = vld [vmem:[#allocation48_spill] sm:$0xff]  ;;  %4231 = vmatmul.mubr.msk.f32.gmra.mrb[28].mxu0 %vm5322_vm10, %v5508_v4 }
 0x1ea   : > { %6463 = vst [vmem:[#allocation44_spill] sm:$0xff] %v6462_v27  ;;  %3878 = vmatprep.subr.bf16.mxu1 %v6466_v9  ;;  %v6472_v52 = vsel %vm5591_vm6, 4294967295, %v6471_v52  ;;  %v5595_v42 = vmax.f32 %v607_v0, 0.0  ;;  %vm6474_vm9 = vcmask 1046528   ;;  %v6478_v27 = vld [vmem:[#allocation50_spill] sm:$0xff]  ;;  %v1164_v21 = vrot.slane %v5571_v58, 7  ;;  %1648 = vmatprep.mubr.f32.mxu0 %v5347_v53 }
 0x1eb   : > { %6473 = vst [vmem:[#allocation38_spill] sm:$0xff] %v6472_v52  ;;  %v5599_v9 = vsel %vm6474_vm9, %v1319_v63, %v1321_v11  ;;  %vm6476_vm8 = vmmov %vm6474_vm9  ;;  %v6480_v45 = vpack.c.bf16 %v6478_v27, %v6479_v28  ;;  %v1327_v0 = vrot.slane %v5571_v58, 1  ;;  %v622_v38 = vadd.f32 %v3474_v8, %v5091_v20  ;;  %v616_v52 = vpop.f32.mrb[15].mxu0  ;;  %v6481_v63 = vld [vmem:[#allocation54_spill] sm:$0xff] }
 0x1ec   : > { %6475 = vst [vmem:[#allocation47_spill] sm:$0xff] %v5599_v9  ;;  %v5602_v62 = vsel %vm6476_vm8, %v1321_v11, %v1323_v22  ;;  %v6482_v11 = vld [vmem:[#allocation51_spill] sm:$0xff]  ;;  %v6485_v27 = vand.u32 15, %v6484_v57  ;;  %v6486_v28 = vmov 0  ;;  %760 = vst [vmem:[#allocation2 + $0x170] sm:$0xff] %v5595_v42  ;;  %v1325_v8 = vrot.slane %v5595_v42, 1  ;;  %4230 = vmatmul.mubr.msk.f32.gmra.mrb[12].mxu1 %vm5409_vm14, %v5599_v9 }
 0x1ed   : > { %6477 = vst [vmem:[#allocation46_spill] sm:$0xff] %v5602_v62  ;;  %3948 = vmatpush3.bf16.msra.mxu0 %v6480_v45  ;;  %v6483_v40 = vpack.c.bf16 %v6481_v63, %v6482_v11  ;;  %v1162_v45 = vrot.slane %v5595_v42, 7  ;;  %v617_v29 = vadd.f32 %v5091_v20, %v616_v52  ;;  %v6491_v16 = vpack.c.bf16 %v6489_v55, %v6490_v15  ;;  %v6493_v11 = vld [vmem:[#allocation31_spill] sm:$0xff] }
 0x1ee   : > { %vm5619_vm8 = vcmp.ne.s32.totalorder %v6485_v27, 15  ;;  %v5636_v63 = vmax.f32 %v622_v38, 0.0  ;;  %v6494_v27 = vld [vmem:[#allocation30_spill] sm:$0xff]  ;;  %v6496_v20 = vrot.slane %v5213_v51, 7  ;;  %v6497_v55 = vrot.slane %v5242_v2, 7  ;;  %3560 = vmatprep.mubr.f32.mxu1 %v5602_v62  ;;  %1649 = vmatmul.mubr.f32.gmra.mrb[30].mxu0 %v5551_v49 }
 0x1ef   : > { %3950 = vmatprep.subr.bf16.mxu0 %v6483_v40  ;;  %v6487_v28 = vsel %vm5619_vm8, 4294967295, %v6486_v28  ;;  %3880 = vmatpush3.bf16.msra.mxu1 %v6491_v16  ;;  %v6492_v40 = vrot.slane %v5413_v59, 7  ;;  %v5650_v52 = vsel %vm1132_vm2, %v1158_v33, %v1160_v10  ;;  %v5652_v15 = vmax.f32 %v617_v29, 0.0  ;;  %vm6498_vm8 = vmmov %vm6474_vm9  ;;  %v1478_v62 = vld [vmem:[#allocation9 + $0xf8] sm:$0xff] }
 0x1f0   : > { %6488 = vst [vmem:[#allocation25_spill] sm:$0xff] %v6487_v28  ;;  %v6495_v28 = vpack.c.bf16 %v6493_v11, %v6494_v27  ;;  %v5647_v16 = vsel %vm1132_vm2, %v6497_v55, %v6496_v20  ;;  %v5656_v38 = vsel %vm6474_vm9, %v1323_v22, %v1325_v8  ;;  %v6499_v2 = vpack.c.bf16 %v5149_v31, %v5147_v60  ;;  %v6500_v22 = vld [vmem:[#allocation55_spill] sm:$0xff]  ;;  %v6502_v60 = vld [vmem:[#allocation33_spill] sm:$0xff]  ;;  %v6503_v31 = vld [vmem:[#allocation32_spill] sm:$0xff] }
 0x1f1   : > { %v5634_v57 = vsel %vm1132_vm2, %v6492_v40, %v1158_v33  ;;  %v5662_v40 = vsel %vm1132_vm2, %v1160_v10, %v1162_v45  ;;  %763 = vst [vmem:[#allocation2 + $0x1b8] sm:$0xff] %v5636_v63  ;;  %v1168_v33 = vrot.slane %v5636_v63, 7  ;;  %v1331_v29 = vrot.slane %v5636_v63, 1  ;;  %vm6511_vm9 = vmmov %vm6498_vm8  ;;  %4232 = vmatmul.mubr.msk.f32.gmra.mrb[14].mxu1 %vm5480_vm4, %v5656_v38  ;;  %1653 = vmatprep.mubr.f32.mxu0 %v5432_v41 }
 0x1f2   : > { %3882 = vmatprep.subr.bf16.mxu1 %v6495_v28  ;;  %v5659_v28 = vsel %vm6498_vm8, %v1325_v8, %v1327_v0  ;;  %3952 = vmatpush3.bf16.msra.mxu0 %v6499_v2  ;;  %v6501_v8 = vpack.c.bf16 %v5159_v43, %v6500_v22  ;;  %v1166_v10 = vrot.slane %v5652_v15, 7  ;;  %v1329_v11 = vrot.slane %v5652_v15, 1  ;;  %vm6516_vm14 = vmmov %vm6498_vm8 }
 0x1f3   : > { %v6504_v27 = vpack.c.bf16 %v6502_v60, %v6503_v31  ;;  %v5683_v20 = vsel %vm1132_vm2, %v1162_v45, %v1164_v21  ;;  %v6505_v55 = vrot.slane %v5213_v51, 1  ;;  %v6506_v2 = vrot.slane %v5349_v13, 1  ;;  %v1459_v60 = vld [vmem:[#allocation9 + $0x60] sm:$0xff]  ;;  %v1460_v45 = vld [vmem:[#allocation9 + $0x68] sm:$0xff]  ;;  %vm6517_vm6 = vmmov %vm6498_vm8  ;;  %3563 = vmatprep.mubr.f32.mxu1 %v5659_v28  ;;  %4234 = vmatmul.mubr.msk.f32.gmra.mrb[32].mxu0 %vm5389_vm13, %v5582_v46 }
 0x1f4   : > { %3954 = vmatprep.subr.bf16.mxu0 %v6501_v8  ;;  %v1335_v22 = vrot.slane %v5298_v3, 1  ;;  %v6507_v8 = vld [vmem:[#allocation35_spill] sm:$0xff]  ;;  %v6510_v31 = vrot.slane %v5302_v24, 1  ;;  %v6512_v13 = vrot.slane %v5201_v36, 1  ;;  %v5724_v51 = vsel %vm1132_vm2, %v1164_v21, %v1166_v10  ;;  %1658 = vmatprep.mubr.f32.mxu0 %v5413_v59 }
 0x1f5   : > { %3884 = vmatpush3.bf16.msra.mxu1 %v6504_v27  ;;  %v5690_v43 = vsel %vm6498_vm8, %v6506_v2, %v6505_v55  ;;  %v6509_v9 = vpack.c.bf16 %v6507_v8, %v6508_v14  ;;  %v6514_v14 = vrot.slane %v5302_v24, 7  ;;  %v5718_v2 = vsel %vm6516_vm14, %v1327_v0, %v1329_v11  ;;  %v6520_v0 = vld [vmem:[#allocation59_spill] sm:$0xff]  ;;  %vm6534_vm14 = vmmov %vm6517_vm6 }
 0x1f6   : > { %v5702_v27 = vsel %vm6511_vm9, %v1331_v29, %v6510_v31  ;;  %v5709_v3 = vsel %vm6498_vm8, %v6505_v55, %v6512_v13  ;;  %v5721_v8 = vsel %vm6517_vm6, %v1329_v11, %v1331_v29  ;;  %v1477_v31 = vld [vmem:[#allocation9 + $0xf0] sm:$0xff]  ;;  %v6518_v13 = vld [vmem:[#allocation56_spill] sm:$0xff]  ;;  %v3891_v21 = vpack.c.bf16 %v1460_v45, %v1459_v60  ;;  %4233 = vmatmul.mubr.msk.f32.gmra.mrb[16].mxu1 %vm5555_vm7, %v5718_v2 }
 0x1f7   : > { %3886 = vmatprep.subr.bf16.mxu1 %v6509_v9  ;;  %6513 = vst [vmem:[#allocation24_spill] sm:$0xff] %v5709_v3  ;;  %v5714_v9 = vsel %vm1132_vm2, %v1168_v33, %v6514_v14  ;;  %v6519_v55 = vpack.c.bf16 %v5176_v37, %v6518_v13  ;;  %v5733_v14 = vsel %vm1132_vm2, %v1166_v10, %v1168_v33  ;;  %v6523_v11 = vld [vmem:[#allocation37_spill] sm:$0xff]  ;;  %v6526_v37 = vrot.slane %v5434_v6, 7  ;;  %v6528_v33 = vld [vmem:[#allocation40_spill] sm:$0xff]  ;;  %v6529_v10 = vld [vmem:[#allocation39_spill] sm:$0xff] }
 0x1f8   : > { %6515 = vst [vmem:[#allocation42_spill] sm:$0xff] %v5714_v9  ;;  %v6521_v9 = vld [vmem:[#allocation58_spill] sm:$0xff]  ;;  %v6525_v3 = vpack.c.bf16 %v6523_v11, %v6524_v30  ;;  %v6527_v13 = vrot.slane %v5302_v24, 7  ;;  %v6530_v26 = vpack.c.bf16 %v6528_v33, %v6529_v10  ;;  %v6532_v6 = vld [vmem:[#allocation52_spill] sm:$0xff]  ;;  %v1479_v11 = vld [vmem:[#allocation9 + $0x100] sm:$0xff]  ;;  %3566 = vmatprep.mubr.f32.mxu1 %v5721_v8  ;;  %1659 = vmatmul.mubr.f32.gmra.mrb[34].mxu0 %v5587_v7 }
 0x1f9   : > { %3956 = vmatpush3.bf16.msra.mxu0 %v6519_v55  ;;  %v6522_v29 = vpack.c.bf16 %v6520_v0, %v6521_v9  ;;  %v3893_v9 = vpack.c.bf16 %v1478_v62, %v1477_v31  ;;  %v1461_v0 = vld [vmem:[#allocation9 + $0x70] sm:$0xff]  ;;  %v1462_v30 = vld [vmem:[#allocation9 + $0x78] sm:$0xff]  ;;  %v6533_v45 = vrot.slane %v6532_v6, 1  ;;  %v6538_v10 = vld [vmem:[#allocation60_spill] sm:$0xff]  ;;  %1663 = vmatprep.mubr.f32.mxu0 %v5510_v5 }
 0x1fa   : > { %3888 = vmatpush3.bf16.msra.mxu1 %v6525_v3  ;;  %v5747_v55 = vsel %vm1132_vm2, %v6527_v13, %v6526_v37  ;;  %v6531_v3 = vrot.slane %v5302_v24, 1  ;;  %v1480_v37 = vld [vmem:[#allocation9 + $0x108] sm:$0xff]  ;;  %v6536_v13 = vld [vmem:[#allocation61_spill] sm:$0xff]  ;;  %v3895_v24 = vpack.c.bf16 %v1462_v30, %v1461_v0  ;;  %v1482_v31 = vld [vmem:[#allocation9 + $0x118] sm:$0xff]  ;;  %vm6547_vm2 = vnez %v6458_v50 }
 0x1fb   : > { %3958 = vmatprep.subr.bf16.mxu0 %v6522_v29  ;;  %3890 = vmatprep.subr.bf16.mxu1 %v6530_v26  ;;  %v5761_v29 = vsel %vm6534_vm14, %v1335_v22, %v6533_v45  ;;  %v6535_v26 = vld [vmem:[#allocation62_spill] sm:$0xff]  ;;  %v3897_v62 = vpack.c.bf16 %v1480_v37, %v1479_v11  ;;  %v1483_v0 = vld [vmem:[#allocation9 + $0x120] sm:$0xff]  ;;  %v1484_v30 = vld [vmem:[#allocation9 + $0x128] sm:$0xff] }
 0x1fc   : > { %v5756_v60 = vsel %vm6517_vm6, %v6531_v3, %v1335_v22  ;;  %v6537_v33 = vpack.c.bf16 %v6535_v26, %v6536_v13  ;;  %v1481_v22 = vld [vmem:[#allocation9 + $0x110] sm:$0xff]  ;;  %4235 = vmatmul.mubr.msk.f32.gmra.mrb[18].mxu1 %vm5531_vm5, %v5702_v27  ;;  %4239 = vmatmul.mubr.msk.f32.gmra.mrb[36].mxu0 %vm5452_vm15, %v5634_v57  ;;  %v3905_v11 = vpack.c.bf16 %v1484_v30, %v1483_v0  ;;  %v1486_v26 = vld [vmem:[#allocation9 + $0x138] sm:$0xff]  ;;  %v1488_v13 = vld [vmem:[#allocation9 + $0x148] sm:$0xff] }
 0x1fd   : > { %v6541_v6 = vld [vmem:[#allocation57_spill] sm:$0xff]  ;;  %1668 = vmatprep.mubr.f32.mxu0 %v5490_v39  ;;  %v1494_v3 = vld [vmem:[#allocation9 + $0x178] sm:$0xff]  ;;  %v2209_v30 = vld [vmem:[#allocation9 + $0x400] sm:$0xff] }
 0x1fe   : > { %3960 = vmatpush3.bf16.msra.mxu0 %v6537_v33  ;;  %3892 = vmatpush3.bf16.msra.mxu1 %v3891_v21  ;;  %v6539_v21 = vmax.f32 %v6538_v10, 0.0  ;;  %v6542_v45 = vmax.f32 %v6541_v6, 0.0  ;;  %v1485_v37 = vld [vmem:[#allocation9 + $0x130] sm:$0xff]  ;;  %v1492_v10 = vld [vmem:[#allocation9 + $0x168] sm:$0xff]  ;;  %v2221_v50 = vld [vmem:[#allocation9 + $0x460] sm:$0xff] }
 0x1ff   : > { %3894 = vmatprep.subr.bf16.mxu1 %v3893_v9  ;;  %v3901_v9 = vpack.c.bf16 %v1482_v31, %v1481_v22  ;;  %v6543_v33 = vld [vmem:[#allocation65_spill] sm:$0xff]  ;;  %v6545_v22 = vld [vmem:[#allocation67_spill] sm:$0xff]  ;;  %v2210_v6 = vld [vmem:[#allocation9 + $0x408] sm:$0xff] }
 0x200   : > { %4236 = vmatprep.mubr.msk.f32.mxu1 %vm5051_vm0, %v6539_v21  ;;  %1669 = vmatmul.mubr.f32.gmra.mrb[38].mxu0 %v5650_v52  ;;  %v1491_v31 = vld [vmem:[#allocation9 + $0x160] sm:$0xff]  ;;  %v1493_v21 = vld [vmem:[#allocation9 + $0x170] sm:$0xff] }
 0x201   : > { %1673 = vmatprep.mubr.f32.mxu0 %v5595_v42  ;;  %v2130_v0 = vld [vmem:[#allocation2 + $0x80] sm:$0xff] }
 0x202   : > { %3896 = vmatpush3.bf16.msra.mxu1 %v3895_v24  ;;  %v6562_v24 = vld [vmem:[#allocation66_spill] sm:$0xff] }
 0x203   : > { %3898 = vmatprep.subr.bf16.mxu1 %v3897_v62 }
 0x204   : > { %4241 = vmatmul.mubr.msk.f32.gmra.mrb[40].mxu0 %vm5486_vm1, %v5662_v40 }
 0x205   : > { %4237 = vmatmul.mubr.msk.f32.vlgmr.msra.gmra.mrb[20].mxu1 %vm5373_vm12, %v5331_v12  ;;  %v3909_v12 = vpack.c.bf16 %v1486_v26, %v1485_v37  ;;  %1678 = vmatprep.mubr.f32.mxu0 %v5571_v58  ;;  %v2133_v37 = vld [vmem:[#allocation2 + $0x98] sm:$0xff]  ;;  %v3961_v26 = vpack.c.bf16 %v2210_v6, %v2209_v30  ;;  %v2175_v30 = vld [vmem:[#allocation2 + $0x1e8] sm:$0xff] }
 0x206   : > { %3900 = vmatpush3.bf16.msra.mxu1 %v3897_v62  ;;  %4238 = vmatprep.mubr.msk.f32.mxu1 %vm5051_vm0, %v6542_v45  ;;  %v1490_v62 = vld [vmem:[#allocation9 + $0x158] sm:$0xff]  ;;  %vm6546_vm0 = vnez %v6356_v61  ;;  %v6549_v45 = vld [vmem:[#allocation80_spill] sm:$0xff] }
 0x207   : > { %3902 = vmatprep.subr.bf16.mxu1 %v3901_v9  ;;  %v2139_v61 = vld [vmem:[#allocation2 + $0xc8] sm:$0xff] }
 0x208   : > { %1679 = vmatmul.mubr.f32.gmra.mrb[42].mxu0 %v5683_v20 }
 0x209   : > { %1909 = vmatmul.mubr.f32.gmra.mrb[22].mxu1 %v5647_v16  ;;  %v1489_v16 = vld [vmem:[#allocation9 + $0x150] sm:$0xff]  ;;  %1683 = vmatprep.mubr.f32.mxu0 %v5652_v15 }
 0x20a   : > { %1913 = vmatprep.mubr.f32.mxu1 %v5201_v36  ;;  %3904 = vmatpush3.bf16.msra.mxu1 %v3901_v9  ;;  %v3913_v36 = vpack.c.bf16 %v1488_v13, %v1487_v44  ;;  %v6548_v9 = vld [vmem:[#allocation70_spill] sm:$0xff] }
 0x20b   : > { %3906 = vmatprep.subr.bf16.mxu1 %v3905_v11  ;;  %v6560_v44 = vld [vmem:[#allocation74_spill] sm:$0xff] }
 0x20c   : > { %4243 = vmatmul.mubr.msk.f32.gmra.mrb[44].mxu0 %vm6547_vm2, %v5724_v51 }
 0x20d   : > { %4240 = vmatmul.mubr.msk.f32.gmra.mrb[24].mxu1 %vm5133_vm3, %v6543_v33  ;;  %1688 = vmatprep.mubr.f32.mxu0 %v5636_v63  ;;  %v6552_v63 = vld [vmem:[#allocation68_spill] sm:$0xff]  ;;  %v6561_v33 = vld [vmem:[#allocation75_spill] sm:$0xff] }
 0x20e   : > { %1918 = vmatprep.mubr.f32.mxu1 %v5194_v35  ;;  %3908 = vmatpush3.bf16.msra.mxu1 %v3905_v11  ;;  %v3917_v35 = vpack.c.bf16 %v1490_v62, %v1489_v16  ;;  %v6550_v11 = vld [vmem:[#allocation71_spill] sm:$0xff]  ;;  %v2169_v16 = vld [vmem:[#allocation2 + $0x1b8] sm:$0xff] }
 0x20f   : > { %3910 = vmatprep.subr.bf16.mxu1 %v3909_v12  ;;  %vm6551_vm3 = vnez %v6550_v11  ;;  %v6575_v11 = vld [vmem:[#allocation47_spill] sm:$0xff] }
 0x210   : > { %1689 = vmatmul.mubr.f32.gmra.mrb[46].mxu0 %v5733_v14 }
 0x211   : > { %1919 = vmatmul.mubr.f32.gmra.mrb[26].mxu1 %v5285_v19  ;;  %v3921_v19 = vpack.c.bf16 %v1492_v10, %v1491_v31  ;;  %2289 = vmatprep.mubr.f32.mxu0 %v2130_v0  ;;  %v6568_v31 = vld [vmem:[#allocation79_spill] sm:$0xff]  ;;  %v6572_v0 = vld [vmem:[#allocation42_spill] sm:$0xff] }
 0x212   : > { %1923 = vmatprep.mubr.f32.mxu1 %v6545_v22  ;;  %3912 = vmatpush3.bf16.msra.mxu1 %v3909_v12  ;;  %v2136_v12 = vld [vmem:[#allocation2 + $0xb0] sm:$0xff]  ;;  %v2220_v22 = vld [vmem:[#allocation9 + $0x458] sm:$0xff] }
 0x213   : > { %3914 = vmatprep.subr.bf16.mxu1 %v3913_v36  ;;  %v2172_v10 = vld [vmem:[#allocation2 + $0x1d0] sm:$0xff] }
 0x214   : > { %4245 = vmatmul.mubr.msk.f32.vlgmr.msra.gmra.mrb[48].mxu0 %vm6546_vm0, %v5369_v47 }
 0x215   : > { %4242 = vmatmul.mubr.msk.f32.gmra.mrb[28].mxu1 %vm6546_vm0, %v5369_v47  ;;  %2294 = vmatprep.mubr.f32.mxu0 %v2133_v37  ;;  %v2142_v47 = vld [vmem:[#allocation2 + $0xe0] sm:$0xff]  ;;  %v6578_v37 = vld [vmem:[#allocation46_spill] sm:$0xff] }
 0x216   : > { %1928 = vmatprep.mubr.f32.mxu1 %v5235_v17  ;;  %3916 = vmatpush3.bf16.msra.mxu1 %v3913_v36  ;;  %v3925_v17 = vpack.c.bf16 %v1494_v3, %v1493_v21  ;;  %v6564_v36 = vld [vmem:[#allocation77_spill] sm:$0xff]  ;;  %v6569_v21 = vld [vmem:[#allocation82_spill] sm:$0xff] }
 0x217   : > { %3918 = vmatprep.subr.bf16.mxu1 %v3917_v35 }
 0x218   : > { %2295 = vmatmul.mubr.f32.gmra.mrb[50].mxu0 %v5430_v32 }
 0x219   : > { %1929 = vmatmul.mubr.f32.gmra.mrb[30].mxu1 %v5430_v32  ;;  %2299 = vmatprep.mubr.f32.mxu0 %v2136_v12  ;;  %v2211_v32 = vld [vmem:[#allocation9 + $0x410] sm:$0xff] }
 0x21a   : > { %1933 = vmatprep.mubr.f32.mxu1 %v6548_v9  ;;  %3920 = vmatpush3.bf16.msra.mxu1 %v3917_v35  ;;  %v6566_v35 = vld [vmem:[#allocation69_spill] sm:$0xff]  ;;  %v6571_v9 = vld [vmem:[#allocation83_spill] sm:$0xff] }
 0x21b   : > { %3922 = vmatprep.subr.bf16.mxu1 %v3921_v19 }
 0x21c   : > { %4247 = vmatmul.mubr.msk.f32.gmra.mrb[52].mxu0 %vm6551_vm3, %v6549_v45 }
 0x21d   : > { %4244 = vmatmul.mubr.msk.f32.gmra.mrb[32].mxu1 %vm6551_vm3, %v6549_v45  ;;  %2304 = vmatprep.mubr.f32.mxu0 %v2139_v61  ;;  %v2224_v45 = vld [vmem:[#allocation9 + $0x478] sm:$0xff] }
 0x21e   : > { %1938 = vmatprep.mubr.f32.mxu1 %v6552_v63  ;;  %3924 = vmatpush3.bf16.msra.mxu1 %v3921_v19  ;;  %v6576_v63 = vld [vmem:[#allocation76_spill] sm:$0xff]  ;;  %v2131_v61 = vld [vmem:[#allocation2 + $0x88] sm:$0xff] }
 0x21f   : > { %3926 = vmatprep.subr.bf16.mxu1 %v3925_v17  ;;  %vm6577_vm9 = vnez %v6576_v63 }
 0x220   : > { %2305 = vmatmul.mubr.f32.gmra.mrb[54].mxu0 %v5501_v18 }
 0x221   : > { %1939 = vmatmul.mubr.f32.gmra.mrb[34].mxu1 %v5501_v18  ;;  %2309 = vmatprep.mubr.f32.mxu0 %v2142_v47  ;;  %v2134_v47 = vld [vmem:[#allocation2 + $0xa0] sm:$0xff] }
 0x222   : > { %1943 = vmatprep.mubr.f32.mxu1 %v5361_v23  ;;  %3928 = vmatpush3.bf16.msra.mxu1 %v3925_v17  ;;  %v2148_v23 = vld [vmem:[#allocation2 + $0x110] sm:$0xff]  ;;  %v6573_v17 = vld [vmem:[#allocation38_spill] sm:$0xff] }
 0x223   : > { %3962 = vmatprep.subr.bf16.mxu1 %v3961_v26 }
 0x224   : > { %4249 = vmatmul.mubr.msk.f32.gmra.mrb[56].mxu0 %vm5322_vm10, %v5508_v4 }
 0x225   : > { %4246 = vmatmul.mubr.msk.f32.gmra.mrb[36].mxu1 %vm5322_vm10, %v5508_v4  ;;  %v2213_v4 = vld [vmem:[#allocation9 + $0x420] sm:$0xff] }
 0x226   : > { %1948 = vmatprep.mubr.f32.mxu1 %v5347_v53  ;;  %v2145_v53 = vld [vmem:[#allocation2 + $0xf8] sm:$0xff] }
 0x227   : > { %2314 = vmatprep.mubr.f32.mxu0 %v2145_v53  ;;  %v2571_v53 = vld [vmem:[#allocation11 + $0x8] sm:$0xff] }
 0x228   : > { %2315 = vmatmul.mubr.f32.gmra.mrb[58].mxu0 %v5551_v49 }
 0x229   : > { %1949 = vmatmul.mubr.f32.gmra.mrb[38].mxu1 %v5551_v49  ;;  %2319 = vmatprep.mubr.f32.mxu0 %v2148_v23  ;;  %v6553_v49 = vld [vmem:[#allocation24_spill] sm:$0xff]  ;;  %v6580_v23 = vld [vmem:[#allocation25_spill] sm:$0xff] }
 0x22a   : > { %1953 = vmatprep.mubr.f32.mxu1 %v5432_v41  ;;  %v2212_v41 = vld [vmem:[#allocation9 + $0x418] sm:$0xff] }
 0x22b   : > { %v3965_v18 = vpack.c.bf16 %v2212_v41, %v2211_v32  ;;  %v2580_v41 = vld [vmem:[#allocation11 + $0x50] sm:$0xff] }
 0x22c   : > { %4251 = vmatmul.mubr.msk.f32.gmra.mrb[60].mxu0 %vm5389_vm13, %v5582_v46 }
 0x22d   : > { %4248 = vmatmul.mubr.msk.f32.gmra.mrb[40].mxu1 %vm5389_vm13, %v5582_v46  ;;  %2324 = vmatprep.mubr.f32.mxu0 %v2151_v48  ;;  %v2163_v46 = vld [vmem:[#allocation2 + $0x188] sm:$0xff]  ;;  %vm6567_vm13 = vnez %v6566_v35  ;;  %v2575_v48 = vld [vmem:[#allocation11 + $0x28] sm:$0xff] }
 0x22e   : > { %1958 = vmatprep.mubr.f32.mxu1 %v5413_v59  ;;  %v2154_v59 = vld [vmem:[#allocation2 + $0x140] sm:$0xff] }
 0x230   : > { %2325 = vmatmul.mubr.f32.gmra.mrb[62].mxu0 %v5587_v7 }
 0x231   : > { %1959 = vmatmul.mubr.f32.gmra.mrb[42].mxu1 %v5587_v7  ;;  %2329 = vmatprep.mubr.f32.mxu0 %v2154_v59 }
 0x232   : > { %1963 = vmatprep.mubr.f32.mxu1 %v5510_v5  ;;  %v2214_v5 = vld [vmem:[#allocation9 + $0x428] sm:$0xff] }
 0x233   : > { %v3969_v7 = vpack.c.bf16 %v2214_v5, %v2213_v4  ;;  %v2582_v4 = vld [vmem:[#allocation11 + $0x60] sm:$0xff]  ;;  %v2583_v5 = vld [vmem:[#allocation11 + $0x68] sm:$0xff] }
 0x234   : > { %4253 = vmatmul.mubr.msk.f32.gmra.mrb[64].mxu0 %vm5452_vm15, %v5634_v57 }
 0x235   : > { %4250 = vmatmul.mubr.msk.f32.gmra.mrb[44].mxu1 %vm5452_vm15, %v5634_v57  ;;  %2334 = vmatprep.mubr.f32.mxu0 %v2157_v54  ;;  %v2216_v57 = vld [vmem:[#allocation9 + $0x438] sm:$0xff]  ;;  %vm6574_vm15 = vnez %v6573_v17  ;;  %v2578_v54 = vld [vmem:[#allocation11 + $0x40] sm:$0xff] }
 0x236   : > { %1968 = vmatprep.mubr.f32.mxu1 %v5490_v39  ;;  %v2160_v39 = vld [vmem:[#allocation2 + $0x170] sm:$0xff] }
 0x238   : > { %2335 = vmatmul.mubr.f32.gmra.mrb[66].mxu0 %v5650_v52 }
 0x239   : > { %1969 = vmatmul.mubr.f32.gmra.mrb[46].mxu1 %v5650_v52  ;;  %2339 = vmatprep.mubr.f32.mxu0 %v2160_v39  ;;  %v6557_v52 = vld [vmem:[#allocation73_spill] sm:$0xff]  ;;  %v2581_v39 = vld [vmem:[#allocation11 + $0x58] sm:$0xff] }
 0x23a   : > { %1973 = vmatprep.mubr.f32.mxu1 %v5595_v42  ;;  %v2215_v42 = vld [vmem:[#allocation9 + $0x430] sm:$0xff] }
 0x23b   : > { %v3973_v13 = vpack.c.bf16 %v2216_v57, %v2215_v42 }
 0x23c   : > { %4255 = vmatmul.mubr.msk.f32.gmra.mrb[68].mxu0 %vm5486_vm1, %v5662_v40 }
 0x23d   : > { %4252 = vmatmul.mubr.msk.f32.gmra.mrb[48].mxu1 %vm5486_vm1, %v5662_v40  ;;  %2344 = vmatprep.mubr.f32.mxu0 %v2163_v46  ;;  %v2218_v40 = vld [vmem:[#allocation9 + $0x448] sm:$0xff]  ;;  %vm6563_vm1 = vnez %v6562_v24 }
 0x23e   : > { %1978 = vmatprep.mubr.f32.mxu1 %v5571_v58  ;;  %v6554_v58 = vld [vmem:[#allocation44_spill] sm:$0xff]  ;;  %v3977_v62 = vpack.c.bf16 %v2218_v40, %v2217_v34  ;;  %v2585_v34 = vld [vmem:[#allocation11 + $0x78] sm:$0xff] }
 0x23f   : > { %vm6555_vm10 = vnez %v6554_v58 }
 0x240   : > { %2345 = vmatmul.mubr.f32.gmra.mrb[70].mxu0 %v5683_v20 }
 0x241   : > { %1979 = vmatmul.mubr.f32.gmra.mrb[50].mxu1 %v5683_v20  ;;  %2349 = vmatprep.mubr.f32.mxu0 %v5652_v15  ;;  %v2219_v20 = vld [vmem:[#allocation9 + $0x450] sm:$0xff]  ;;  %v6565_v15 = vld [vmem:[#allocation78_spill] sm:$0xff] }
 0x242   : > { %3601 = vmatprep.mubr.f32.mxu1 %v5690_v43  ;;  %v6558_v43 = vld [vmem:[#allocation63_spill] sm:$0xff]  ;;  %v3981_v19 = vpack.c.bf16 %v2220_v22, %v2219_v20 }
 0x243   : > { %vm6559_vm12 = vnez %v6558_v43 }
 0x244   : > { %4258 = vmatmul.mubr.msk.f32.gmra.mrb[72].mxu0 %vm6547_vm2, %v5724_v51  ;;  %v2222_v51 = vld [vmem:[#allocation9 + $0x468] sm:$0xff] }
 0x245   : > { %4254 = vmatmul.mubr.msk.f32.vlgmr.msra.gmra.mrb[4].mxu1 %vm6555_vm10, %v6553_v49  ;;  %2354 = vmatprep.mubr.f32.mxu0 %v2169_v16  ;;  %v3985_v6 = vpack.c.bf16 %v2222_v51, %v2221_v50  ;;  %v4017_v49 = vpack.c.bf16 %v2583_v5, %v2582_v4 }
 0x246   : > { %3964 = vmatpush3.bf16.msra.mxu1 %v3961_v26  ;;  %3604 = vmatprep.mubr.f32.mxu1 %v6556_v1 }
 0x247   : > { %3966 = vmatprep.subr.bf16.mxu1 %v3965_v18 }
 0x248   : > { %2355 = vmatmul.mubr.f32.gmra.mrb[74].mxu0 %v5733_v14  ;;  %v2223_v14 = vld [vmem:[#allocation9 + $0x470] sm:$0xff] }
 0x249   : > { %4256 = vmatmul.mubr.msk.f32.gmra.mrb[6].mxu1 %vm6559_vm12, %v6557_v52  ;;  %2359 = vmatprep.mubr.f32.mxu0 %v2172_v10  ;;  %v3989_v26 = vpack.c.bf16 %v2224_v45, %v2223_v14 }
 0x24a   : > { %3968 = vmatpush3.bf16.msra.mxu1 %v3965_v18  ;;  %3607 = vmatprep.mubr.f32.mxu1 %v6560_v44  ;;  %v4013_v18 = vpack.c.bf16 %v2581_v39, %v2580_v41 }
 0x24b   : > { %3970 = vmatprep.subr.bf16.mxu1 %v3969_v7 }
 0x24c   : > { %4261 = vmatmul.mubr.msk.f32.gmra.mrb[76].mxu0 %vm6574_vm15, %v6572_v0 }
 0x24d   : > { %4257 = vmatmul.mubr.msk.f32.gmra.mrb[8].mxu1 %vm6563_vm1, %v6561_v33  ;;  %2364 = vmatprep.mubr.f32.mxu0 %v2175_v30 }
 0x24e   : > { %3972 = vmatpush3.bf16.msra.mxu1 %v3969_v7  ;;  %3610 = vmatprep.mubr.f32.mxu1 %v6564_v36 }
 0x24f   : > { %3974 = vmatprep.subr.bf16.mxu1 %v3973_v13 }
 0x250   : > { %2365 = vmatmul.mubr.f32.gmra.mrb[78].mxu0 %v5747_v55  ;;  %v2570_v55 = vld [vmem:[#allocation11] sm:$0xff] }
 0x251   : > { %4259 = vmatmul.mubr.msk.f32.gmra.mrb[10].mxu1 %vm6567_vm13, %v6565_v15 }
 0x252   : > { %3976 = vmatpush3.bf16.msra.mxu1 %v3973_v13  ;;  %3613 = vmatprep.mubr.f32.mxu1 %v6568_v31  ;;  %v2584_v13 = vld [vmem:[#allocation11 + $0x70] sm:$0xff] }
 0x253   : > { %3978 = vmatprep.subr.bf16.mxu1 %v3977_v62  ;;  %v4021_v33 = vpack.c.bf16 %v2585_v34, %v2584_v13 }
 0x255   : > { %4260 = vmatmul.mubr.msk.f32.gmra.mrb[12].mxu1 %vm5343_vm11, %v6569_v21 }
 0x256   : > { %3980 = vmatpush3.bf16.msra.mxu1 %v3977_v62  ;;  %3616 = vmatprep.mubr.f32.mxu1 %v6571_v9 }
 0x257   : > { %3982 = vmatprep.subr.bf16.mxu1 %v3981_v19 }
 0x259   : > { %4262 = vmatmul.mubr.msk.f32.gmra.mrb[14].mxu1 %vm6577_vm9, %v6575_v11 }
 0x25a   : > { %3984 = vmatpush3.bf16.msra.mxu1 %v3981_v19  ;;  %3619 = vmatprep.mubr.f32.mxu1 %v6578_v37 }
 0x25b   : > { %3986 = vmatprep.subr.bf16.mxu1 %v3985_v6 }
 0x25d   : > { %4263 = vmatmul.mubr.msk.f32.gmra.mrb[16].mxu1 %vm5480_vm4, %v5656_v38 }
 0x25e   : > { %3988 = vmatpush3.bf16.msra.mxu1 %v3985_v6  ;;  %3622 = vmatprep.mubr.f32.mxu1 %v5659_v28 }
 0x25f   : > { %3990 = vmatprep.subr.bf16.mxu1 %v3989_v26 }
 0x261   : > { %4264 = vmatmul.mubr.msk.f32.gmra.mrb[18].mxu1 %vm5555_vm7, %v5718_v2 }
 0x262   : > { %3992 = vmatpush3.bf16.msra.mxu1 %v3989_v26  ;;  %3657 = vmatprep.mubr.f32.mxu1 %v2131_v61 }
 0x265   : > { %3658 = vmatmul.mubr.f32.vlgmr.msra.gmra.mrb[4].mxu1 %v2134_v47 }
 0x266   : > { %3660 = vmatprep.mubr.f32.mxu1 %v6564_v36 }
 0x269   : > { %4265 = vmatmul.mubr.msk.f32.gmra.mrb[6].mxu1 %vm6567_vm13, %v6565_v15 }
 0x26a   : > { %3663 = vmatprep.mubr.f32.mxu1 %v6568_v31 }
 0x26d   : > { %4266 = vmatmul.mubr.msk.f32.gmra.mrb[8].mxu1 %vm5343_vm11, %v6569_v21  ;;  %vm6581_vm11 = vnez %v6580_v23 }
 0x26e   : > { %3666 = vmatprep.mubr.f32.mxu1 %v6571_v9 }
 0x271   : > { %4267 = vmatmul.mubr.msk.f32.gmra.mrb[10].mxu1 %vm6577_vm9, %v6575_v11 }
 0x272   : > { %3669 = vmatprep.mubr.f32.mxu1 %v6578_v37 }
 0x275   : > { %4268 = vmatmul.mubr.msk.f32.gmra.mrb[12].mxu1 %vm5480_vm4, %v5656_v38  ;;  %v3993_v38 = vpack.c.bf16 %v2571_v53, %v2570_v55 }
 0x276   : > { %3672 = vmatprep.mubr.f32.mxu1 %v5659_v28  ;;  %v2572_v28 = vld [vmem:[#allocation11 + $0x10] sm:$0xff] }
 0x277   : > { %3994 = vmatprep.subr.bf16.mxu0 %v3993_v38 }
 0x278   : > { %3996 = vmatpush3.bf16.msra.mxu0 %v3993_v38 }
 0x279   : > { %4269 = vmatmul.mubr.msk.f32.gmra.mrb[14].mxu1 %vm5555_vm7, %v5718_v2  ;;  %v3997_v2 = vpack.c.bf16 %v2573_v25, %v2572_v28 }
 0x27a   : > { %3675 = vmatprep.mubr.f32.mxu1 %v5721_v8  ;;  %v2574_v8 = vld [vmem:[#allocation11 + $0x20] sm:$0xff] }
 0x27b   : > { %3998 = vmatprep.subr.bf16.mxu0 %v3997_v2  ;;  %v4001_v56 = vpack.c.bf16 %v2575_v48, %v2574_v8 }
 0x27c   : > { %4000 = vmatpush3.bf16.msra.mxu0 %v3997_v2 }
 0x27d   : > { %4270 = vmatmul.mubr.msk.f32.gmra.mrb[16].mxu1 %vm5531_vm5, %v5702_v27  ;;  %4002 = vmatprep.subr.bf16.mxu0 %v4001_v56  ;;  %v2576_v27 = vld [vmem:[#allocation11 + $0x30] sm:$0xff] }
 0x27e   : > { %3678 = vmatprep.mubr.f32.mxu1 %v5756_v60  ;;  %v2577_v60 = vld [vmem:[#allocation11 + $0x38] sm:$0xff] }
 0x27f   : > { %v4005_v59 = vpack.c.bf16 %v2577_v60, %v2576_v27 }
 0x280   : > { %4004 = vmatpush3.bf16.msra.mxu0 %v4001_v56 }
 0x281   : > { %4271 = vmatmul.mubr.msk.f32.gmra.mrb[18].mxu1 %vm6581_vm11, %v5761_v29  ;;  %4006 = vmatprep.subr.bf16.mxu0 %v4005_v59  ;;  %v2579_v29 = vld [vmem:[#allocation11 + $0x48] sm:$0xff] }
 0x282   : > { %v4009_v32 = vpack.c.bf16 %v2579_v29, %v2578_v54 }
 0x284   : > { %4008 = vmatpush3.bf16.msra.mxu0 %v4005_v59 }
 0x285   : > { %4010 = vmatprep.subr.bf16.mxu0 %v4009_v32 }
 0x288   : > { %4012 = vmatpush3.bf16.msra.mxu0 %v4009_v32 }
 0x289   : > { %4014 = vmatprep.subr.bf16.mxu0 %v4013_v18 }
 0x28c   : > { %4016 = vmatpush3.bf16.msra.mxu0 %v4013_v18 }
 0x28d   : > { %4018 = vmatprep.subr.bf16.mxu0 %v4017_v49 }
 0x290   : > { %4020 = vmatpush3.bf16.msra.mxu0 %v4017_v49 }
 0x291   : > { %4022 = vmatprep.subr.bf16.mxu0 %v4021_v33 }
 0x294   : > { %4024 = vmatpush3.bf16.msra.mxu0 %v4021_v33 }
 0x29c   : > { %v3083_v58 = vpop.f32.mrb[16].mxu0 }
 0x29d   : > { %v3084_v1 = vpop.f32.mrb[17].mxu0 }
 0x29e   : > { %v3085_v46 = vadd.f32 %v3084_v1, %v3083_v58 }
 0x2a0   : > { %v3086_v7 = vpop.f32.mrb[18].mxu0 }
 0x2a1   : > { %v3087_v42 = vpop.f32.mrb[19].mxu0 }
 0x2a2   : > { %v3088_v57 = vadd.f32 %v3087_v42, %v3086_v7 }
 0x2a9   : > { %v3089_v52 = vpop.f32.mrb[20].mxu0 }
 0x2aa   : > { %v3090_v43 = vpop.f32.mrb[21].mxu0 }
 0x2ab   : > { %v3091_v44 = vadd.f32 %v3090_v43, %v3089_v52 }
 0x2af   : > { %v3092_v40 = vpop.f32.mrb[22].mxu0 }
 0x2b0   : > { %v3093_v24 = vpop.f32.mrb[23].mxu0 }
 0x2b1   : > { %v3094_v36 = vadd.f32 %v3093_v24, %v3092_v40 }
 0x2b3   : > { %v3095_v16 = vpop.f32.mrb[24].mxu0 }
 0x2b4   : > { %v3096_v62 = vpop.f32.mrb[25].mxu0 }
 0x2b5   : > { %v3097_v20 = vadd.f32 %v3096_v62, %v3095_v16 }
 0x2b8   : > { %v3098_v22 = vpop.f32.mrb[26].mxu0 }
 0x2b9   : > { %v3099_v15 = vpop.f32.mrb[27].mxu0 }
 0x2ba   : > { %v3100_v35 = vadd.f32 %v3099_v15, %v3098_v22 }
 0x2bc   : > { %v3101_v31 = vpop.f32.mrb[28].mxu0 }
 0x2bd   : > { %v3102_v10 = vpop.f32.mrb[29].mxu0 }
 0x2be   : > { %v3103_v19 = vadd.f32 %v3102_v10, %v3101_v31 }
 0x2c1   : > { %v3104_v50 = vpop.f32.mrb[30].mxu0 }
 0x2c2   : > { %v3105_v51 = vpop.f32.mrb[31].mxu0 }
 0x2c3   : > { %v3106_v21 = vadd.f32 %v3105_v51, %v3104_v50 }
 0x2c6   : > { %v3107_v3 = vpop.f32.mrb[32].mxu0 }
 0x2c7   : > { %v3108_v9 = vpop.f32.mrb[33].mxu0 }
 0x2c8   : > { %v5944_v0 = vadd.f32 %v3108_v9, %v3107_v3 }
 0x2cb   : > { %v3110_v17 = vpop.f32.mrb[34].mxu0 }
 0x2cc   : > { %v3111_v30 = vpop.f32.mrb[35].mxu0 }
 0x2cd   : > { %v5946_v14 = vadd.f32 %v3111_v30, %v3110_v17 }
 0x2cf   : > { %v3113_v63 = vpop.f32.mrb[36].mxu0 }
 0x2d0   : > { %v3114_v37 = vpop.f32.mrb[37].mxu0 }
 0x2d1   : > { %v5948_v61 = vadd.f32 %v3114_v37, %v3113_v63 }
 0x2d3   : > { %v3116_v53 = vpop.f32.mrb[38].mxu0 }
 0x2d4   : > { %v3117_v23 = vpop.f32.mrb[39].mxu0 }
 0x2d5   : > { %v5950_v25 = vadd.f32 %v3117_v23, %v3116_v53 }
 0x2d7   : > { %v3119_v48 = vpop.f32.mrb[40].mxu0 }
 0x2d8   : > { %v3195_v6 = vpop.f32.mrb[20].mxu1  ;;  %v3120_v56 = vpop.f32.mrb[41].mxu0 }
 0x2d9   : > { %v3196_v45 = vpop.f32.mrb[21].mxu1  ;;  %v5952_v59 = vadd.f32 %v3120_v56, %v3119_v48 }
 0x2da   : > { %v3197_v11 = vadd.f32 %v3196_v45, %v3195_v6 }
 0x2db   : > { %v3122_v32 = vpop.f32.mrb[42].mxu0 }
 0x2dc   : > { %v4028_v26 = vadd.f32 %v3197_v11, %v3085_v46  ;;  %v3198_v12 = vpop.f32.mrb[22].mxu1  ;;  %v3123_v41 = vpop.f32.mrb[43].mxu0 }
 0x2dd   : > { %v3199_v47 = vpop.f32.mrb[23].mxu1  ;;  %v5954_v4 = vadd.f32 %v3123_v41, %v3122_v32 }
 0x2de   : > { %v3200_v55 = vadd.f32 %v3199_v47, %v3198_v12 }
 0x2df   : > { %v3125_v58 = vpop.f32.mrb[44].mxu0 }
 0x2e0   : > { %v4025_v38 = vadd.f32 %v3200_v55, %v3088_v57  ;;  %v3201_v28 = vpop.f32.mrb[24].mxu1  ;;  %v3126_v1 = vpop.f32.mrb[45].mxu0 }
 0x2e1   : > { %v3202_v2 = vpop.f32.mrb[25].mxu1  ;;  %v5956_v42 = vadd.f32 %v3126_v1, %v3125_v58 }
 0x2e2   : > { %v3203_v8 = vadd.f32 %v3202_v2, %v3201_v28 }
 0x2e3   : > { %v3128_v43 = vpop.f32.mrb[46].mxu0 }
 0x2e4   : > { %v4034_v27 = vadd.f32 %v3203_v8, %v3091_v44  ;;  %v3204_v60 = vpop.f32.mrb[26].mxu1  ;;  %v3129_v44 = vpop.f32.mrb[47].mxu0 }
 0x2e5   : > { %v3205_v54 = vpop.f32.mrb[27].mxu1  ;;  %v5958_v40 = vadd.f32 %v3129_v44, %v3128_v43 }
 0x2e6   : > { %v3206_v29 = vadd.f32 %v3205_v54, %v3204_v60 }
 0x2e8   : > { %v4031_v39 = vadd.f32 %v3206_v29, %v3094_v36  ;;  %v3207_v18 = vpop.f32.mrb[28].mxu1  ;;  %v3307_v36 = vpop.f32.mrb[48].mxu0 }
 0x2e9   : > { %v3208_v5 = vpop.f32.mrb[29].mxu1  ;;  %v3308_v16 = vpop.f32.mrb[49].mxu0 }
 0x2ea   : > { %v3209_v49 = vadd.f32 %v3208_v5, %v3207_v18  ;;  %v3309_v15 = vadd.f32 %v3308_v16, %v3307_v36 }
 0x2eb   : > { %v3310_v10 = vpop.f32.mrb[50].mxu0 }
 0x2ec   : > { %v4040_v46 = vadd.f32 %v3209_v49, %v3097_v20  ;;  %v3210_v7 = vpop.f32.mrb[30].mxu1  ;;  %v5960_v50 = vadd.f32 %v4028_v26, %v3309_v15  ;;  %v3311_v51 = vpop.f32.mrb[51].mxu0 }
 0x2ed   : > { %v3211_v57 = vpop.f32.mrb[31].mxu1  ;;  %v3312_v17 = vadd.f32 %v3311_v51, %v3310_v10 }
 0x2ee   : > { %v3212_v52 = vadd.f32 %v3211_v57, %v3210_v7 }
 0x2ef   : > { %v3313_v6 = vpop.f32.mrb[52].mxu0  ;;  %v5962_v45 = vadd.f32 %v4025_v38, %v3312_v17 }
 0x2f0   : > { %v4037_v13 = vadd.f32 %v3212_v52, %v3100_v35  ;;  %v3213_v34 = vpop.f32.mrb[32].mxu1  ;;  %v3314_v11 = vpop.f32.mrb[53].mxu0 }
 0x2f1   : > { %v3214_v33 = vpop.f32.mrb[33].mxu1  ;;  %v3315_v37 = vadd.f32 %v3314_v11, %v3313_v6 }
 0x2f2   : > { %v3215_v24 = vadd.f32 %v3214_v33, %v3213_v34 }
 0x2f3   : > { %v3316_v55 = vpop.f32.mrb[54].mxu0  ;;  %v5965_v53 = vadd.f32 %v4034_v27, %v3315_v37 }
 0x2f4   : > { %v4046_v62 = vadd.f32 %v3215_v24, %v3103_v19  ;;  %v3216_v22 = vpop.f32.mrb[34].mxu1  ;;  %v3317_v26 = vpop.f32.mrb[55].mxu0 }
 0x2f5   : > { %v3217_v31 = vpop.f32.mrb[35].mxu1  ;;  %v3318_v28 = vadd.f32 %v3317_v26, %v3316_v55 }
 0x2f6   : > { %v3218_v20 = vadd.f32 %v3217_v31, %v3216_v22 }
 0x2f7   : > { %v3319_v48 = vpop.f32.mrb[56].mxu0  ;;  %v5968_v38 = vadd.f32 %v4031_v39, %v3318_v28 }
 0x2f8   : > { %v4043_v3 = vadd.f32 %v3218_v20, %v3106_v21  ;;  %v3219_v9 = vpop.f32.mrb[36].mxu1  ;;  %v3320_v56 = vpop.f32.mrb[57].mxu0 }
 0x2f9   : > { %v3220_v35 = vpop.f32.mrb[37].mxu1  ;;  %v3321_v54 = vadd.f32 %v3320_v56, %v3319_v48 }
 0x2fa   : > { %v3221_v30 = vadd.f32 %v3220_v35, %v3219_v9 }
 0x2fb   : > { %v3322_v41 = vpop.f32.mrb[58].mxu0  ;;  %v5971_v27 = vadd.f32 %v4040_v46, %v3321_v54 }
 0x2fc   : > { %v4052_v63 = vadd.f32 %v3221_v30, %v5944_v0  ;;  %v3222_v19 = vpop.f32.mrb[38].mxu1  ;;  %v3323_v18 = vpop.f32.mrb[59].mxu0 }
 0x2fd   : > { %v3223_v12 = vpop.f32.mrb[39].mxu1  ;;  %v3324_v49 = vadd.f32 %v3323_v18, %v3322_v41 }
 0x2fe   : > { %v3224_v47 = vadd.f32 %v3223_v12, %v3222_v19 }
 0x2ff   : > { %v3325_v7 = vpop.f32.mrb[60].mxu0  ;;  %v5974_v39 = vadd.f32 %v4037_v13, %v3324_v49 }
 0x300   : > { %v4049_v21 = vadd.f32 %v3224_v47, %v5946_v14  ;;  %v3225_v23 = vpop.f32.mrb[40].mxu1  ;;  %v3326_v57 = vpop.f32.mrb[61].mxu0 }
 0x301   : > { %v3226_v2 = vpop.f32.mrb[41].mxu1  ;;  %v3327_v43 = vadd.f32 %v3326_v57, %v3325_v7 }
 0x302   : > { %v3227_v8 = vadd.f32 %v3226_v2, %v3225_v23 }
 0x303   : > { %v3328_v33 = vpop.f32.mrb[62].mxu0  ;;  %v5977_v46 = vadd.f32 %v4046_v62, %v3327_v43 }
 0x304   : > { %v4058_v0 = vadd.f32 %v3227_v8, %v5948_v61  ;;  %v3228_v60 = vpop.f32.mrb[42].mxu1  ;;  %v3329_v24 = vpop.f32.mrb[63].mxu0 }
 0x305   : > { %v3229_v29 = vpop.f32.mrb[43].mxu1  ;;  %v3330_v16 = vadd.f32 %v3329_v24, %v3328_v33 }
 0x306   : > { %v3230_v32 = vadd.f32 %v3229_v29, %v3228_v60 }
 0x307   : > { %v3331_v31 = vpop.f32.mrb[64].mxu0  ;;  %v5980_v13 = vadd.f32 %v4043_v3, %v3330_v16 }
 0x308   : > { %v4055_v14 = vadd.f32 %v3230_v32, %v5950_v25  ;;  %v3231_v5 = vpop.f32.mrb[44].mxu1  ;;  %v3332_v20 = vpop.f32.mrb[65].mxu0 }
 0x309   : > { %v3232_v58 = vpop.f32.mrb[45].mxu1  ;;  %v3333_v51 = vadd.f32 %v3332_v20, %v3331_v31 }
 0x30a   : > { %v3233_v1 = vadd.f32 %v3232_v58, %v3231_v5  ;;  %v6001_v5 = vld [vmem:[%s6582_s9] ss:$0 sm:$0xff] }
 0x30b   : > { %v3334_v35 = vpop.f32.mrb[66].mxu0  ;;  %v5983_v62 = vadd.f32 %v4052_v63, %v3333_v51 }
 0x30c   : > { %v4064_v61 = vadd.f32 %v3233_v1, %v5952_v59  ;;  %v3234_v52 = vpop.f32.mrb[46].mxu1  ;;  %v3335_v30 = vpop.f32.mrb[67].mxu0 }
 0x30d   : > { %v3235_v44 = vpop.f32.mrb[47].mxu1  ;;  %v3336_v6 = vadd.f32 %v3335_v30, %v3334_v35 }
 0x30e   : > { %v3236_v34 = vadd.f32 %v3235_v44, %v3234_v52 }
 0x30f   : > { %v3337_v11 = vpop.f32.mrb[68].mxu0  ;;  %v4050_v19 = vadd.f32 %v4049_v21, %v3336_v6 }
 0x310   : > { %v4061_v25 = vadd.f32 %v3236_v34, %v5954_v4  ;;  %v3237_v36 = vpop.f32.mrb[48].mxu1  ;;  %v3338_v37 = vpop.f32.mrb[69].mxu0 }
 0x311   : > { %v3238_v22 = vpop.f32.mrb[49].mxu1  ;;  %v3339_v12 = vadd.f32 %v3338_v37, %v3337_v11 }
 0x312   : > { %v3239_v15 = vadd.f32 %v3238_v22, %v3237_v36 }
 0x313   : > { %v3340_v3 = vpop.f32.mrb[70].mxu0  ;;  %v5986_v47 = vadd.f32 %v4058_v0, %v3339_v12 }
 0x314   : > { %v4070_v59 = vadd.f32 %v3239_v15, %v5956_v42  ;;  %v3240_v10 = vpop.f32.mrb[50].mxu1  ;;  %v3341_v55 = vpop.f32.mrb[71].mxu0 }
 0x315   : > { %v3241_v9 = vpop.f32.mrb[51].mxu1  ;;  %v3342_v42 = vadd.f32 %v3341_v55, %v3340_v3 }
 0x316   : > { %v3242_v17 = vadd.f32 %v3241_v9, %v3240_v10 }
 0x317   : > { %v3343_v26 = vpop.f32.mrb[72].mxu0  ;;  %v5988_v23 = vadd.f32 %v4055_v14, %v3342_v42 }
 0x318   : > { %v4067_v4 = vadd.f32 %v3242_v17, %v5958_v40  ;;  %v3344_v28 = vpop.f32.mrb[73].mxu0 }
 0x319   : > { %v3345_v2 = vadd.f32 %v3344_v28, %v3343_v26 }
 0x31b   : > { %v3346_v63 = vpop.f32.mrb[74].mxu0  ;;  %v5990_v8 = vadd.f32 %v4064_v61, %v3345_v2 }
 0x31c   : > { %v3347_v48 = vpop.f32.mrb[75].mxu0 }
 0x31d   : > { %v3348_v40 = vadd.f32 %v3347_v48, %v3346_v63 }
 0x31f   : > { %v3349_v56 = vpop.f32.mrb[76].mxu0  ;;  %v5992_v60 = vadd.f32 %v4061_v25, %v3348_v40 }
 0x320   : > { %v3350_v21 = vpop.f32.mrb[77].mxu0 }
 0x321   : > { %v3351_v54 = vadd.f32 %v3350_v21, %v3349_v56 }
 0x323   : > { %v3352_v29 = vpop.f32.mrb[78].mxu0  ;;  %v5994_v0 = vadd.f32 %v4070_v59, %v3351_v54 }
 0x324   : > { %v3353_v32 = vpop.f32.mrb[79].mxu0 }
 0x325   : > { %v3354_v41 = vadd.f32 %v3353_v32, %v3352_v29 }
 0x327   : > { %v5996_v18 = vadd.f32 %v4067_v4, %v3354_v41 }
 0x338   : > { %v3659_v14 = vpop.f32.mrb[4].mxu1 }
 0x339   : > { %v4027_v49 = vadd.f32 %v5962_v45, %v3659_v14  ;;  %v2436_v58 = vpop.f32.mrb[5].mxu1 }
 0x33a   : > { %v4030_v1 = vadd.f32 %v5960_v50, %v2436_v58 }
 0x33b   : > { %v2539_v7 = vadd.f32 %v4027_v49, %v6001_v5 }
 0x33c   : > { %v2538_v57 = vadd.f32 %v4030_v1, %v6001_v5  ;;  %v3662_v61 = vpop.f32.mrb[6].mxu1 }
 0x33d   : > { %v4033_v52 = vadd.f32 %v5968_v38, %v3662_v61  ;;  %v2446_v43 = vpop.f32.mrb[7].mxu1  ;;  %v2555_v33 = vmax.f32 %v2539_v7, 0.0 }
 0x33e   : > { %v2554_v44 = vmax.f32 %v2538_v57, 0.0  ;;  %v4036_v34 = vadd.f32 %v5965_v53, %v2446_v43 }
 0x33f   : > { %v2541_v24 = vadd.f32 %v4033_v52, %v6001_v5 }
 0x340   : > { %v2540_v25 = vadd.f32 %v4036_v34, %v6001_v5  ;;  %v3665_v45 = vpop.f32.mrb[8].mxu1  ;;  %3713 = vmatprep.mubr.f32.mxu0 %v2554_v44  ;;  %v2741_v34 = vld [vmem:[%s4876_s21 + $0x18] sm:$0xff] }
 0x341   : > { %v4039_v50 = vadd.f32 %v5974_v39, %v3665_v45  ;;  %v2456_v36 = vpop.f32.mrb[9].mxu1  ;;  %3714 = vmatmul.mubr.f32.vlgmr.msra.gmra.mrb[80].mxu0 %v2555_v33  ;;  %v2557_v15 = vmax.f32 %v2541_v24, 0.0  ;;  %v2740_v45 = vld [vmem:[%s4876_s21 + $0x10] sm:$0xff] }
 0x342   : > { %v2556_v16 = vmax.f32 %v2540_v25, 0.0  ;;  %v4042_v22 = vadd.f32 %v5971_v27, %v2456_v36 }
 0x343   : > { %v2543_v38 = vadd.f32 %v4039_v50, %v6001_v5 }
 0x344   : > { %v2542_v31 = vadd.f32 %v4042_v22, %v6001_v5  ;;  %v3668_v53 = vpop.f32.mrb[10].mxu1  ;;  %3716 = vmatprep.mubr.f32.mxu0 %v2556_v16 }
 0x345   : > { %v4045_v20 = vadd.f32 %v5980_v13, %v3668_v53  ;;  %v2466_v59 = vpop.f32.mrb[11].mxu1  ;;  %3717 = vmatmul.mubr.f32.gmra.mrb[82].mxu0 %v2557_v15  ;;  %v2559_v39 = vmax.f32 %v2543_v38, 0.0  ;;  %v2743_v38 = vld [vmem:[%s4876_s21 + $0x28] sm:$0xff] }
 0x346   : > { %v2558_v10 = vmax.f32 %v2542_v31, 0.0  ;;  %v4048_v51 = vadd.f32 %v5977_v46, %v2466_v59  ;;  %v2742_v59 = vld [vmem:[%s4876_s21 + $0x20] sm:$0xff] }
 0x347   : > { %v2545_v9 = vadd.f32 %v4045_v20, %v6001_v5 }
 0x348   : > { %v2544_v17 = vadd.f32 %v4048_v51, %v6001_v5  ;;  %v3671_v27 = vpop.f32.mrb[12].mxu1  ;;  %3719 = vmatprep.mubr.f32.mxu0 %v2558_v10 }
 0x349   : > { %v4051_v35 = vadd.f32 %v4050_v19, %v3671_v27  ;;  %v2476_v30 = vpop.f32.mrb[13].mxu1  ;;  %3720 = vmatmul.mubr.f32.gmra.mrb[84].mxu0 %v2559_v39  ;;  %v2561_v11 = vmax.f32 %v2545_v9, 0.0  ;;  %v2745_v27 = vld [vmem:[%s4876_s21 + $0x38] sm:$0xff] }
 0x34a   : > { %v2560_v4 = vmax.f32 %v2544_v17, 0.0  ;;  %v4054_v6 = vadd.f32 %v5983_v62, %v2476_v30 }
 0x34b   : > { %v2547_v13 = vadd.f32 %v4051_v35, %v6001_v5 }
 0x34c   : > { %v2546_v37 = vadd.f32 %v4054_v6, %v6001_v5  ;;  %v3674_v12 = vpop.f32.mrb[14].mxu1  ;;  %3722 = vmatprep.mubr.f32.mxu0 %v2560_v4  ;;  %v2744_v6 = vld [vmem:[%s4876_s21 + $0x30] sm:$0xff] }
 0x34d   : > { %v4057_v46 = vadd.f32 %v5988_v23, %v3674_v12  ;;  %v2486_v3 = vpop.f32.mrb[15].mxu1  ;;  %3723 = vmatmul.mubr.f32.gmra.mrb[86].mxu0 %v2561_v11  ;;  %v2563_v19 = vmax.f32 %v2547_v13, 0.0 }
 0x34e   : > { %v2562_v55 = vmax.f32 %v2546_v37, 0.0  ;;  %v4060_v42 = vadd.f32 %v5986_v47, %v2486_v3  ;;  %v2747_v3 = vld [vmem:[%s4876_s21 + $0x48] sm:$0xff] }
 0x34f   : > { %v2549_v26 = vadd.f32 %v4057_v46, %v6001_v5 }
 0x350   : > { %v2548_v28 = vadd.f32 %v4060_v42, %v6001_v5  ;;  %v3677_v62 = vpop.f32.mrb[16].mxu1  ;;  %3725 = vmatprep.mubr.f32.mxu0 %v2562_v55 }
 0x351   : > { %v4063_v2 = vadd.f32 %v5992_v60, %v3677_v62  ;;  %v2496_v63 = vpop.f32.mrb[17].mxu1  ;;  %3726 = vmatmul.mubr.f32.gmra.mrb[88].mxu0 %v2563_v19  ;;  %v2565_v23 = vmax.f32 %v2549_v26, 0.0  ;;  %v2746_v26 = vld [vmem:[%s4876_s21 + $0x40] sm:$0xff] }
 0x352   : > { %v2564_v48 = vmax.f32 %v2548_v28, 0.0  ;;  %v4066_v40 = vadd.f32 %v5990_v8, %v2496_v63 }
 0x353   : > { %v2551_v56 = vadd.f32 %v4063_v2, %v6001_v5 }
 0x354   : > { %v2550_v21 = vadd.f32 %v4066_v40, %v6001_v5  ;;  %v3680_v47 = vpop.f32.mrb[18].mxu1  ;;  %3728 = vmatprep.mubr.f32.mxu0 %v2564_v48  ;;  %v2749_v40 = vld [vmem:[%s4876_s21 + $0x58] sm:$0xff] }
 0x355   : > { %v4069_v54 = vadd.f32 %v5996_v18, %v3680_v47  ;;  %v2506_v29 = vpop.f32.mrb[19].mxu1  ;;  %3729 = vmatmul.mubr.f32.gmra.mrb[90].mxu0 %v2565_v23  ;;  %v2567_v41 = vmax.f32 %v2551_v56, 0.0  ;;  %v6037_v18 = vld [vmem:[%s6583_s6] ss:$0 sm:$0xff] }
 0x356   : > { %v2566_v32 = vmax.f32 %v2550_v21, 0.0  ;;  %v4072_v60 = vadd.f32 %v5994_v0, %v2506_v29  ;;  %v2739_v0 = vld [vmem:[%s4876_s21 + $0x8] sm:$0xff]  ;;  %v2748_v47 = vld [vmem:[%s4876_s21 + $0x50] sm:$0xff] }
 0x357   : > { %v2553_v14 = vadd.f32 %v4069_v54, %v6001_v5 }
 0x358   : > { %v2552_v8 = vadd.f32 %v4072_v60, %v6001_v5  ;;  %3731 = vmatprep.mubr.f32.mxu0 %v2566_v32  ;;  %v2738_v5 = vld [vmem:[%s4876_s21] sm:$0xff] }
 0x359   : > { %3732 = vmatmul.mubr.f32.gmra.mrb[92].mxu0 %v2567_v41  ;;  %v2569_v58 = vmax.f32 %v2553_v14, 0.0  ;;  %v2751_v14 = vld [vmem:[%s4876_s21 + $0x68] sm:$0xff] }
 0x35a   : > { %v2568_v49 = vmax.f32 %v2552_v8, 0.0 }
 0x35c   : > { %3734 = vmatprep.mubr.f32.mxu0 %v2568_v49 }
 0x35d   : > { %3735 = vmatmul.mubr.f32.gmra.mrb[94].mxu0 %v2569_v58 }
 0x414   : > { %v3715_v1 = vpop.f32.mrb[80].mxu0 }
 0x415   : > { %v2665_v7 = vadd.f32 %v3715_v1, %v6037_v18  ;;  %v2659_v57 = vpop.f32.mrb[81].mxu0  ;;  %v2750_v1 = vld [vmem:[%s4876_s21 + $0x60] sm:$0xff] }
 0x416   : > { %v2660_v61 = vadd.f32 %v6037_v18, %v2659_v57 }
 0x417   : > { %v2755_v52 = vadd.f32 %v2739_v0, %v2665_v7 }
 0x418   : > { %v2754_v43 = vadd.f32 %v2738_v5, %v2660_v61  ;;  %v3718_v44 = vpop.f32.mrb[82].mxu0 }
 0x419   : > { %v2771_v33 = vmax.f32 %v2755_v52, 0.0  ;;  %v2675_v24 = vadd.f32 %v3718_v44, %v6037_v18  ;;  %v2669_v25 = vpop.f32.mrb[83].mxu0  ;;  %v2753_v52 = vld [vmem:[%s4876_s21 + $0x78] sm:$0xff] }
 0x41a   : > { %v2770_v50 = vmax.f32 %v2754_v43, 0.0  ;;  %v2670_v36 = vadd.f32 %v6037_v18, %v2669_v25 }
 0x41b   : > { %2787 = vst [vmem:[%s6049_s19 + $0x8] sm:$0xff] %v2771_v33  ;;  %v2757_v16 = vadd.f32 %v2741_v34, %v2675_v24  ;;  %v2752_v33 = vld [vmem:[%s4876_s21 + $0x70] sm:$0xff]  ;;  %s2803_s21 = scalar_lea.sflag [#allocation5], %s4870_s27 }
 0x41c   : > { %2786 = vst [vmem:[%s6049_s19] sm:$0xff] %v2770_v50  ;;  %v2756_v22 = vadd.f32 %v2740_v45, %v2670_v36  ;;  %v3721_v15 = vpop.f32.mrb[84].mxu0 }
 0x41d   : > { %v2773_v31 = vmax.f32 %v2757_v16, 0.0  ;;  %v2685_v53 = vadd.f32 %v3721_v15, %v6037_v18  ;;  %v2679_v20 = vpop.f32.mrb[85].mxu0 }
 0x41e   : > { %v2772_v10 = vmax.f32 %v2756_v22, 0.0  ;;  %v2680_v51 = vadd.f32 %v6037_v18, %v2679_v20 }
 0x41f   : > { %2789 = vst [vmem:[%s6049_s19 + $0x18] sm:$0xff] %v2773_v31  ;;  %v2759_v39 = vadd.f32 %v2743_v38, %v2685_v53 }
 0x420   : > { %2788 = vst [vmem:[%s6049_s19 + $0x10] sm:$0xff] %v2772_v10  ;;  %v2758_v9 = vadd.f32 %v2742_v59, %v2680_v51  ;;  %v3724_v17 = vpop.f32.mrb[86].mxu0 }
 0x421   : > { %v2775_v35 = vmax.f32 %v2759_v39, 0.0  ;;  %v2695_v30 = vadd.f32 %v3724_v17, %v6037_v18  ;;  %v2689_v4 = vpop.f32.mrb[87].mxu0 }
 0x422   : > { %v2774_v11 = vmax.f32 %v2758_v9, 0.0  ;;  %v2690_v13 = vadd.f32 %v6037_v18, %v2689_v4 }
 0x423   : > { %2791 = vst [vmem:[%s6049_s19 + $0x28] sm:$0xff] %v2775_v35  ;;  %v2761_v37 = vadd.f32 %v2745_v27, %v2695_v30 }
 0x424   : > { %2790 = vst [vmem:[%s6049_s19 + $0x20] sm:$0xff] %v2774_v11  ;;  %v2760_v12 = vadd.f32 %v2744_v6, %v2690_v13  ;;  %v3727_v46 = vpop.f32.mrb[88].mxu0 }
 0x425   : > { %v2777_v55 = vmax.f32 %v2761_v37, 0.0  ;;  %v2705_v42 = vadd.f32 %v3727_v46, %v6037_v18  ;;  %v2699_v19 = vpop.f32.mrb[89].mxu0 }
 0x426   : > { %v2776_v28 = vmax.f32 %v2760_v12, 0.0  ;;  %v2700_v62 = vadd.f32 %v6037_v18, %v2699_v19 }
 0x427   : > { %2793 = vst [vmem:[%s6049_s19 + $0x38] sm:$0xff] %v2777_v55  ;;  %v2763_v2 = vadd.f32 %v2747_v3, %v2705_v42 }
 0x428   : > { %2792 = vst [vmem:[%s6049_s19 + $0x30] sm:$0xff] %v2776_v28  ;;  %v2762_v63 = vadd.f32 %v2746_v26, %v2700_v62  ;;  %v3730_v48 = vpop.f32.mrb[90].mxu0 }
 0x429   : > { %v2779_v23 = vmax.f32 %v2763_v2, 0.0  ;;  %v2715_v56 = vadd.f32 %v3730_v48, %v6037_v18  ;;  %v2709_v21 = vpop.f32.mrb[91].mxu0 }
 0x42a   : > { %v2778_v54 = vmax.f32 %v2762_v63, 0.0  ;;  %v2710_v29 = vadd.f32 %v6037_v18, %v2709_v21 }
 0x42b   : > { %2795 = vst [vmem:[%s6049_s19 + $0x48] sm:$0xff] %v2779_v23  ;;  %v2765_v32 = vadd.f32 %v2749_v40, %v2715_v56 }
 0x42c   : > { %2794 = vst [vmem:[%s6049_s19 + $0x40] sm:$0xff] %v2778_v54  ;;  %v2764_v60 = vadd.f32 %v2748_v47, %v2710_v29  ;;  %v3733_v41 = vpop.f32.mrb[92].mxu0 }
 0x42d   : > { %v2781_v8 = vmax.f32 %v2765_v32, 0.0  ;;  %v2725_v49 = vadd.f32 %v3733_v41, %v6037_v18  ;;  %v2719_v58 = vpop.f32.mrb[93].mxu0 }
 0x42e   : > { %v2780_v0 = vmax.f32 %v2764_v60, 0.0  ;;  %v2720_v7 = vadd.f32 %v6037_v18, %v2719_v58 }
 0x42f   : > { %2797 = vst [vmem:[%s6049_s19 + $0x58] sm:$0xff] %v2781_v8  ;;  %v2767_v57 = vadd.f32 %v2751_v14, %v2725_v49 }
 0x430   : > { %2796 = vst [vmem:[%s6049_s19 + $0x50] sm:$0xff] %v2780_v0  ;;  %v2766_v5 = vadd.f32 %v2750_v1, %v2720_v7  ;;  %v3736_v61 = vpop.f32.mrb[94].mxu0 }
 0x431   : > { %v2783_v43 = vmax.f32 %v2767_v57, 0.0  ;;  %v2735_v44 = vadd.f32 %v3736_v61, %v6037_v18  ;;  %v2729_v34 = vpop.f32.mrb[95].mxu0 }
 0x432   : > { %v2782_v24 = vmax.f32 %v2766_v5, 0.0  ;;  %v2730_v25 = vadd.f32 %v6037_v18, %v2729_v34 }
 0x433   : > { %2799 = vst [vmem:[%s6049_s19 + $0x68] sm:$0xff] %v2783_v43  ;;  %v2769_v45 = vadd.f32 %v2753_v52, %v2735_v44 }
 0x434   : > { %2798 = vst [vmem:[%s6049_s19 + $0x60] sm:$0xff] %v2782_v24  ;;  %v2768_v50 = vadd.f32 %v2752_v33, %v2730_v25 }
 0x435   : > { %v2785_v36 = vmax.f32 %v2769_v45, 0.0 }
 0x436   : > { %v2784_v16 = vmax.f32 %v2768_v50, 0.0 }
 0x437   : > { %2801 = vst [vmem:[%s6049_s19 + $0x78] sm:$0xff] %v2785_v36 }
 0x438   : > { %2800 = vst [vmem:[%s6049_s19 + $0x70] sm:$0xff] %v2784_v16 }
 0x439   : > { %4429 = shalt.err (!%p4426_p0)
}
 0x43a   : > { %s4430_s2 = scalar_lea.hbm %s6095_s5, 2048  ;;  %s4434_s18 = scalar_lea.hbm %s6585_s20, 8192 }
 0x43b   : > { %p4431_p9 = scmp.ne.s32.totalorder %s6095_s5, %s4430_s2  ;;  %p4435_p4 = scmp.lt.u32.totalorder %s6095_s5, %s6585_s20 }
 0x43c   : > { %p4436_p8 = scmp.lt.u32.totalorder %s4434_s18, %s4430_s2  ;;  %p4438_p2 = scmp.lt.u32.totalorder %s4430_s2, %s6095_s5 }
 0x43d   : > { %p4432_p11 = pnand %p4431_p9, %p4756_p10 }
 0x43e   : > { %p4437_p12 = por %p4436_p8, %p4435_p4 }
 0x43f   : > { %p4433_p1 = pneg %p4432_p11 }
 0x440   : > { %p4439_p6 = por %p4438_p2, %p4437_p12 }
 0x442   : > { %p4440_p3 = pnand %p4439_p6, %p4433_p1 }
 0x444   : > { %4443 = shalt.err (!%p4440_p3)
}
 0x445   : > { %s4536_s19 = smov 128   ;;  %s4537_s7 = smov 8  }
 0x446   : > { %4121 = dma.vmem_to_hbm [thread:$0]  (%p4756_p10), %s6097_s0, 2048, %s6095_s5, %s2803_s21, %s4536_s19, %s4536_s19, %s4537_s7  }
 0x447 PF: > { %s6586_s26 = sld [smem:[#allocation18_spill]]  ;;  %s6587_s23 = sld [smem:[#allocation20_spill]] }
 0x448   : > { %p4151_p5 = scmp.ge.s32.totalorder %s4526_s12, 2 }
 0x44d   : > { %s2833_s16 = sand.u32 1, %s6586_s26   ;;  %p6588_p7 = scmp.ne.s32.totalorder %s6587_s23, 0 }
 0x44e   : > { %s2834_s30 = scalar_lea.sflag [#allocation5], %s2833_s16 }
 0x44f   : > { %p4141_p13 = pnand %p4151_p5, %p6588_p7 }
 0x451   : > { %4493 = dma.done.wait (!%p4141_p13), %s2834_s30, 2048  }
 0x452   : > { %4495 = vsyncadd (!%p4141_p13), %s2834_s30, 4294965248  ;;  %s28_s12 = sadd.s32 1, %s4526_s12   ;;  %s6589_s24 = sld [smem:[#allocation21_spill]] }
 0x453   : > { %p25_p0 = scmp.ge.s32.totalorder %s28_s12, 6   ;;  %s6590_s0 = sld [smem:[#allocation22_spill]] }
 0x454   : > { %s6591_s27 = smov %s4502_s28  ;;  %s6592_s28 = smov %s4506_s29 }
 0x455   : > { %s6593_s29 = smov %s4781_s4  ;;  %s6594_s30 = smov %s4518_s10 }
 0x456   : > { %s6595_s9 = smov %s4522_s11  ;;  %27 = sbr.rel (!%p25_p0) target bundleno = 18 (0x12), region = 122 }
 0x458   : > { %s6596_s10 = smov %s6589_s24 }
 0x459   : > { %s6597_s11 = smov %s6590_s0 }
 0x45d   :  { %2839 = vsyncpa [#allocation4], 1 }
 0x45e   :  { %2841 = vsyncpa [#allocation4 + $0x1], 1 }
 0x45f   :  { %2842 = vsyncpa [#allocation7], 1 }
 0x460   :  { %2844 = vsyncpa [#allocation7 + $0x1], 1 }
 0x461   :  { %2845 = vsyncpa [#allocation10], 1 }
 0x462   :  { %2846 = vsyncpa [#allocation5], 1 }
 0x463   :  { %2848 = vsyncpa [#allocation5 + $0x1], 1 }

</bundles_post_ra>
